<compile_context>
chip_gen: v7x
topology: tpu7x:2x2x1
jax: 0.10.0
libtpu: 0.0.40
codegen_flags: <defaults>
</compile_context>

<pallas_src>
import functools

import jax
import jax.numpy as jnp
from jax.experimental import pallas as pl
from jax.experimental.pallas import tpu as pltpu


def _round_up(x, m):
    return ((x + m - 1) // m) * m


def _sigmoid(x):
    # sigmoid(x) == 0.5 * (1 + tanh(x / 2)) — single EUP transcendental.
    return 0.5 * (jnp.tanh(0.5 * x) + 1.0)


# ----------------------------------------------------------------------------
# GRU kernel: one grid step = one (batch_tile, time_block) pair.
#   inputs : x (tile_b, Tt, E_pad), Wx (E_pad, 3H_pad), Whzr (H_pad, 2H_pad),
#            Whm (H_pad, H_pad), bias (1, 3H_pad), [dropout mask]
#   outputs: hidden states (tile_b, Tt, H_pad)
#   scratch: carried h state (tile_b, H_pad) f32,
#            hoisted x-projection (tile_b, Tt, 3H_pad) f32
# ----------------------------------------------------------------------------
def gru_block_kernel(x_ref, wx_ref, whzr_ref, whm_ref, b_ref, *rest,
                     t_block, h_pad, apply_dropout):
    if apply_dropout:
        mask_ref, o_ref, h_ref, xp_ref = rest
    else:
        o_ref, h_ref, xp_ref = rest
        mask_ref = None

    tb = pl.program_id(1)

    @pl.when(tb == 0)
    def _init():
        h_ref[...] = jnp.zeros_like(h_ref)

    tile_b = x_ref.shape[0]
    e_pad = x_ref.shape[2]

    # ---- Hoisted input projection (+ folded biases) for the whole time
    # block: one MXU pass with M = tile_b * t_block instead of three tiny
    # matmuls inside every recurrence step.
    x2 = x_ref[...].reshape(tile_b * t_block, e_pad)
    xp = (jnp.dot(x2, wx_ref[...], preferred_element_type=jnp.float32)
          + b_ref[...])
    xp_ref[...] = xp.reshape(tile_b, t_block, 3 * h_pad)

    # ---- Sequential recurrence over the time block (static unrolled loop;
    # t_block <= 8 so indices are static -> static strided loads/stores).
    h = h_ref[...]                                    # (tile_b, H_pad) f32
    for i in range(t_block):
        xp_t = xp_ref[:, i, :]                        # (tile_b, 3H_pad) f32
        hc = h.astype(whzr_ref.dtype)
        # Fused update/reset hidden matmul (N = 2*H_pad fills the MXU).
        zr = xp_t[:, :2 * h_pad] + jnp.dot(
            hc, whzr_ref[...], preferred_element_type=jnp.float32)
        z = _sigmoid(zr[:, :h_pad])
        r = _sigmoid(zr[:, h_pad:])
        rh = (r * h).astype(whm_ref.dtype)
        h_hat = jnp.tanh(xp_t[:, 2 * h_pad:] + jnp.dot(
            rh, whm_ref[...], preferred_element_type=jnp.float32))
        h = (1.0 - z) * h + z * h_hat                 # matches PyTorch source
        if apply_dropout:
            o_ref[:, i, :] = (h * mask_ref[:, i, :]).astype(o_ref.dtype)
        else:
            o_ref[:, i, :] = h.astype(o_ref.dtype)
    h_ref[...] = h


# ----------------------------------------------------------------------------
# Encoder forward wrapper.
# ----------------------------------------------------------------------------
def encoder_forward(embedding, params, *, dropout_p=0.2, training=True,
                    dropout_key=None, compute_dtype=jnp.float32):
    """embedding: (B, T, E) f32.  params: split/pre-transposed gate weights:
      (wz_x (E,H), wz_h (H,H), bz (H,),
       wr_x, wr_h, br,
       wm_x, wm_h, bm)
    Returns (B, T, H) f32 hidden states (dropout applied iff training)."""
    wz_x, wz_h, bz, wr_x, wr_h, br, wm_x, wm_h, bm = params
    B, T, E = embedding.shape
    H = wz_h.shape[0]

    E_pad = _round_up(E, 128)
    H_pad = _round_up(H, 128)

    # Batch tiling: sublane-aligned exact divisor of the padded batch (no
    # junk-row blowup); prefer >= 2 tiles so v7x megacore gets both cores.
    B_pad = _round_up(B, 8)
    tile_b = B_pad
    if B_pad >= 16:
        d = 8
        while d <= min(128, B_pad // 2):
            if B_pad % d == 0:
                tile_b = d
            d += 8
    nb = B_pad // tile_b

    # Time blocking: Tt steps per grid iteration.  Zero-padded trailing time
    # steps cannot affect earlier outputs (they come after) and are sliced off.
    Tt = min(8, T)
    T_pad = _round_up(T, Tt)
    nt = T_pad // Tt

    # Pad activations; keep (B, T, feature) layout end to end (no transposes).
    x = jnp.asarray(embedding, jnp.float32)
    x = jnp.pad(x, ((0, B_pad - B), (0, T_pad - T), (0, E_pad - E)))
    x = x.astype(compute_dtype)                       # (B_pad, T_pad, E_pad)

    def pad2(w):                                       # -> padded f32 2D
        w = jnp.asarray(w, jnp.float32)
        r, c = w.shape
        return jnp.pad(w, ((0, (E_pad if r == E else H_pad) - r),
                           (0, H_pad - c)))

    # Fused weights: Wx = [Wzx|Wrx|Wmx], Whzr = [Wzh|Wrh], Whm.
    wx = jnp.concatenate([pad2(wz_x), pad2(wr_x), pad2(wm_x)],
                         axis=1).astype(compute_dtype)          # (E_pad, 3H_pad)
    whzr = jnp.concatenate([pad2(wz_h), pad2(wr_h)],
                           axis=1).astype(compute_dtype)        # (H_pad, 2H_pad)
    whm = pad2(wm_h).astype(compute_dtype)                      # (H_pad, H_pad)

    def pad_b(b):
        return jnp.pad(jnp.asarray(b, jnp.float32), (0, H_pad - H))

    bcat = jnp.concatenate([pad_b(bz), pad_b(br), pad_b(bm)]
                           ).reshape(1, 3 * H_pad)              # f32, folded once

    apply_dropout = bool(training) and dropout_p > 0.0

    inputs = [x, wx, whzr, whm, bcat]
    in_specs = [
        pl.BlockSpec((tile_b, Tt, E_pad), lambda b, t: (b, t, 0)),
        pl.BlockSpec((E_pad, 3 * H_pad), lambda b, t: (0, 0)),   # resident
        pl.BlockSpec((H_pad, 2 * H_pad), lambda b, t: (0, 0)),   # resident
        pl.BlockSpec((H_pad, H_pad), lambda b, t: (0, 0)),       # resident
        pl.BlockSpec((1, 3 * H_pad), lambda b, t: (0, 0)),       # resident
    ]

    if apply_dropout:
        # TODO(synk): the dropout mask uses jax.random (host key), so it cannot
        # bit-match torch's RNG; distribution/scaling match F.dropout(p=0.2).
        key = dropout_key if dropout_key is not None else jax.random.PRNGKey(0)
        keep = jax.random.bernoulli(key, 1.0 - dropout_p, (B_pad, T_pad, H_pad))
        mask = keep.astype(jnp.float32) * (1.0 / (1.0 - dropout_p))
        inputs.append(mask)
        in_specs.append(pl.BlockSpec((tile_b, Tt, H_pad),
                                     lambda b, t: (b, t, 0)))

    itemsize = jnp.dtype(compute_dtype).itemsize
    weight_bytes = (E_pad * 3 * H_pad + H_pad * 2 * H_pad + H_pad * H_pad
                    ) * itemsize + 3 * H_pad * 4
    block_bytes = tile_b * Tt * (E_pad * itemsize + H_pad * 4
                                 + (H_pad * 4 if apply_dropout else 0))
    scratch_bytes = tile_b * H_pad * 4 + tile_b * Tt * 3 * H_pad * 4
    footprint = 2 * weight_bytes + 2 * block_bytes + scratch_bytes + (2 << 20)
    vmem_limit = int(min(100 * (1 << 20), max(32 * (1 << 20), footprint)))

    cost = pl.CostEstimate(
        flops=int(2 * B_pad * T_pad * (E_pad * 3 * H_pad + H_pad * 3 * H_pad)),
        transcendentals=int(3 * B_pad * T_pad * H_pad),
        bytes_accessed=int(x.size * itemsize + weight_bytes
                           + B_pad * T_pad * H_pad * 4
                           * (2 if apply_dropout else 1)),
    )

    kernel = functools.partial(gru_block_kernel, t_block=Tt, h_pad=H_pad,
                               apply_dropout=apply_dropout)

    hidden = pl.pallas_call(
        kernel,
        out_shape=jax.ShapeDtypeStruct((B_pad, T_pad, H_pad), jnp.float32),
        grid=(nb, nt),
        in_specs=in_specs,
        out_specs=pl.BlockSpec((tile_b, Tt, H_pad), lambda b, t: (b, t, 0)),
        scratch_shapes=[pltpu.VMEM((tile_b, H_pad), jnp.float32),
                        pltpu.VMEM((tile_b, Tt, 3 * H_pad), jnp.float32)],
        compiler_params=pltpu.CompilerParams(
            dimension_semantics=("parallel", "arbitrary"),
            vmem_limit_bytes=vmem_limit),
        cost_estimate=cost,
    )(*inputs)

    return hidden[:B, :T, :H]                         # (B, T, H), no transposes


# ----------------------------------------------------------------------------
# Reference (plain JAX) + parameter init mirroring the PyTorch module.
# ----------------------------------------------------------------------------
def init_gru_params(key, embedding_size, rnn_size):
    E, H = embedding_size, rnn_size
    ks = jax.random.split(key, 6)
    bound = 1.0 / ((E + H) ** 0.5)                    # nn.Linear(E+H, H) range
    u = lambda k, shp: jax.random.uniform(k, shp, jnp.float32, -bound, bound)
    wz_x, wz_h = u(ks[0], (E, H)), u(ks[1], (H, H))
    wr_x, wr_h = u(ks[2], (E, H)), u(ks[3], (H, H))
    wm_x, wm_h = u(ks[4], (E, H)), u(ks[5], (H, H))
    zeros = jnp.zeros((H,), jnp.float32)              # gate biases zero-filled
    return (wz_x, wz_h, zeros, wr_x, wr_h, zeros, wm_x, wm_h, zeros)


def encoder_reference(embedding, params):
    wz_x, wz_h, bz, wr_x, wr_h, br, wm_x, wm_h, bm = params
    B, T, E = embedding.shape
    H = wz_h.shape[0]
    h = jnp.zeros((B, H), jnp.float32)
    outs = []
    for t in range(T):
        xt = embedding[:, t, :]
        z = jax.nn.sigmoid(xt @ wz_x + h @ wz_h + bz)
        r = jax.nn.sigmoid(xt @ wr_x + h @ wr_h + br)
        h_hat = jnp.tanh(xt @ wm_x + (r * h) @ wm_h + bm)
        h = (1.0 - z) * h + z * h_hat
        outs.append(h)
    return jnp.stack(outs, axis=1)                    # (B, T, H)


if __name__ == "__main__":
    key = jax.random.PRNGKey(0)
    k_x, k_p, k_d = jax.random.split(key, 3)

    B, T, E, H = 2, 8, 16, 32
    embedding = jax.random.normal(k_x, (B, T, E), jnp.float32)
    params = init_gru_params(k_p, E, H)

    # Deterministic path (dropout off) -> strict check vs. plain-JAX reference.
    out = encoder_forward(embedding, params, training=False)
    out = jax.block_until_ready(out)
    ref = encoder_reference(embedding, params)
    assert out.shape == (B, T, H)
    err = float(jnp.max(jnp.abs(out - ref)))
    assert err < 2e-3, err

    # bf16 MXU operands with f32 accumulation/state -> loose check.
    out_bf16 = encoder_forward(embedding, params, training=False,
                               compute_dtype=jnp.bfloat16)
    out_bf16 = jax.block_until_ready(out_bf16)
    assert out_bf16.shape == (B, T, H)
    assert bool(jnp.all(jnp.isfinite(out_bf16)))
    assert float(jnp.max(jnp.abs(out_bf16 - ref))) < 0.25

    # Training path: dropout(p=0.2) fused into the kernel's output store.
    out_train = encoder_forward(embedding, params, training=True,
                                dropout_key=k_d)
    out_train = jax.block_until_ready(out_train)
    assert out_train.shape == (B, T, H)
    drop_frac = float(jnp.mean(out_train == 0.0))
    assert 0.05 <= drop_frac <= 0.45, drop_frac
    # Kept elements are the no-dropout outputs scaled by 1/(1-p).
    keep_mask = out_train != 0.0
    scaled = ref / (1.0 - 0.2)
    kept_err = float(jnp.max(jnp.abs(
        jnp.where(keep_mask, out_train - scaled, 0.0))))
    assert kept_err < 2e-3, kept_err

    print("KERNEL_OK")
</pallas_src>

<mosaic_0001>
module attributes {stable_mosaic.version = 11 : i64} {
  func.func @gru_block_kernel(%arg0: i32, %arg1: i32, %arg2: memref<8x8x128xf32, #tpu.memory_space<vmem>>, %arg3: memref<128x384xf32, #tpu.memory_space<vmem>>, %arg4: memref<128x256xf32, #tpu.memory_space<vmem>>, %arg5: memref<128x128xf32, #tpu.memory_space<vmem>>, %arg6: memref<1x384xf32, #tpu.memory_space<vmem>>, %arg7: memref<8x8x128xf32, #tpu.memory_space<vmem>>, %arg8: memref<8x128xf32, #tpu.memory_space<vmem>>, %arg9: memref<8x8x384xf32, #tpu.memory_space<vmem>>) attributes {dimension_semantics = [#tpu.dimension_semantics<parallel>, #tpu.dimension_semantics<arbitrary>], iteration_bounds = array<i64: 1, 1>, scalar_prefetch = 0 : i64, scratch_operands = 2 : i64, tpu.core_type = #tpu.core_type<tc>, window_params = [{transform_indices = @transform_0, window_bounds = array<i64: 8, 8, 128>}, {pipeline_mode = #tpu.pipeline_mode<synchronous>, transform_indices = @transform_1, window_bounds = array<i64: 128, 384>}, {pipeline_mode = #tpu.pipeline_mode<synchronous>, transform_indices = @transform_2, window_bounds = array<i64: 128, 256>}, {pipeline_mode = #tpu.pipeline_mode<synchronous>, transform_indices = @transform_3, window_bounds = array<i64: 128, 128>}, {pipeline_mode = #tpu.pipeline_mode<synchronous>, transform_indices = @transform_4, window_bounds = array<i64: 1, 384>}, {transform_indices = @transform_5, window_bounds = array<i64: 8, 8, 128>}]} {
    %c0_i32 = arith.constant 0 : i32
    %0 = arith.cmpi eq, %arg1, %c0_i32 : i32
    %1 = arith.extui %0 : i1 to i32
    %c0_i32_0 = arith.constant 0 : i32
    %2 = arith.cmpi ne, %1, %c0_i32_0 : i32
    scf.if %2 {
      %cst_159 = arith.constant 0.000000e+00 : f32
      %302 = vector.broadcast %cst_159 : f32 to vector<8x128xf32>
      %c0_160 = arith.constant 0 : index
      %c0_161 = arith.constant 0 : index
      %303 = vector.load %arg8[%c0_160, %c0_161] : memref<8x128xf32, #tpu.memory_space<vmem>>, vector<8x128xf32>
      tpu.vector_store %arg8[%c0_160, %c0_161], %302 {strides = array<i32>} : memref<8x128xf32, #tpu.memory_space<vmem>>, vector<8x128xf32>,
    } else {
    }
    %c0 = arith.constant 0 : index
    %c0_1 = arith.constant 0 : index
    %c0_2 = arith.constant 0 : index
    %3 = vector.load %arg2[%c0, %c0_1, %c0_2] : memref<8x8x128xf32, #tpu.memory_space<vmem>>, vector<8x8x128xf32>
    %4 = vector.shape_cast %3 : vector<8x8x128xf32> to vector<64x128xf32>
    %c0_3 = arith.constant 0 : index
    %c0_4 = arith.constant 0 : index
    %5 = vector.load %arg3[%c0_3, %c0_4] : memref<128x384xf32, #tpu.memory_space<vmem>>, vector<128x384xf32>
    %cst = arith.constant dense<0.000000e+00> : vector<64x384xf32>
    %6 = tpu.matmul %4, %5, %cst {dimension_numbers = #tpu.dot_dimension_numbers<[1], [0], [0], [1], [0, 0, 1, 1], [], []>} : vector<64x128xf32>, vector<128x384xf32>, vector<64x384xf32> -> vector<64x384xf32>
    %c0_5 = arith.constant 0 : index
    %c0_6 = arith.constant 0 : index
    %7 = vector.load %arg6[%c0_5, %c0_6] : memref<1x384xf32, #tpu.memory_space<vmem>>, vector<1x384xf32>
    %8 = vector.broadcast %7 : vector<1x384xf32> to vector<64x384xf32>
    %9 = arith.addf %6, %8 : vector<64x384xf32>
    %10 = vector.shape_cast %9 : vector<64x384xf32> to vector<8x8x384xf32>
    %c0_7 = arith.constant 0 : index
    %c0_8 = arith.constant 0 : index
    %c0_9 = arith.constant 0 : index
    %11 = vector.load %arg9[%c0_7, %c0_8, %c0_9] : memref<8x8x384xf32, #tpu.memory_space<vmem>>, vector<8x8x384xf32>
    tpu.vector_store %arg9[%c0_7, %c0_8, %c0_9], %10 {strides = array<i32>} : memref<8x8x384xf32, #tpu.memory_space<vmem>>, vector<8x8x384xf32>,
    %c0_10 = arith.constant 0 : index
    %c0_11 = arith.constant 0 : index
    %12 = vector.load %arg8[%c0_10, %c0_11] : memref<8x128xf32, #tpu.memory_space<vmem>>, vector<8x128xf32>
    %c0_12 = arith.constant 0 : index
    %c0_13 = arith.constant 0 : index
    %c0_14 = arith.constant 0 : index
    %13 = vector.load %arg9[%c0_12, %c0_13, %c0_14] : memref<8x8x384xf32, #tpu.memory_space<vmem>>, vector<8x1x384xf32>
    %14 = vector.shape_cast %13 : vector<8x1x384xf32> to vector<8x384xf32>
    %15 = vector.extract_strided_slice %14 {offsets = [0, 0], sizes = [8, 256], strides = [1, 1]} : vector<8x384xf32> to vector<8x256xf32>
    %c0_15 = arith.constant 0 : index
    %c0_16 = arith.constant 0 : index
    %16 = vector.load %arg4[%c0_15, %c0_16] : memref<128x256xf32, #tpu.memory_space<vmem>>, vector<128x256xf32>
    %cst_17 = arith.constant dense<0.000000e+00> : vector<8x256xf32>
    %17 = tpu.matmul %12, %16, %cst_17 {dimension_numbers = #tpu.dot_dimension_numbers<[1], [0], [0], [1], [0, 0, 1, 1], [], []>} : vector<8x128xf32>, vector<128x256xf32>, vector<8x256xf32> -> vector<8x256xf32>
    %18 = arith.addf %15, %17 : vector<8x256xf32>
    %19 = vector.extract_strided_slice %18 {offsets = [0, 0], sizes = [8, 128], strides = [1, 1]} : vector<8x256xf32> to vector<8x128xf32>
    %cst_18 = arith.constant 5.000000e-01 : f32
    %20 = vector.broadcast %cst_18 : f32 to vector<8x128xf32>
    %21 = arith.mulf %20, %19 : vector<8x128xf32>
    %22 = math.tanh %21 : vector<8x128xf32>
    %cst_19 = arith.constant 1.000000e+00 : f32
    %23 = vector.broadcast %cst_19 : f32 to vector<8x128xf32>
    %24 = arith.addf %22, %23 : vector<8x128xf32>
    %cst_20 = arith.constant 5.000000e-01 : f32
    %25 = vector.broadcast %cst_20 : f32 to vector<8x128xf32>
    %26 = arith.mulf %25, %24 : vector<8x128xf32>
    %27 = vector.extract_strided_slice %18 {offsets = [0, 128], sizes = [8, 128], strides = [1, 1]} : vector<8x256xf32> to vector<8x128xf32>
    %cst_21 = arith.constant 5.000000e-01 : f32
    %28 = vector.broadcast %cst_21 : f32 to vector<8x128xf32>
    %29 = arith.mulf %28, %27 : vector<8x128xf32>
    %30 = math.tanh %29 : vector<8x128xf32>
    %cst_22 = arith.constant 1.000000e+00 : f32
    %31 = vector.broadcast %cst_22 : f32 to vector<8x128xf32>
    %32 = arith.addf %30, %31 : vector<8x128xf32>
    %cst_23 = arith.constant 5.000000e-01 : f32
    %33 = vector.broadcast %cst_23 : f32 to vector<8x128xf32>
    %34 = arith.mulf %33, %32 : vector<8x128xf32>
    %35 = arith.mulf %34, %12 : vector<8x128xf32>
    %36 = vector.extract_strided_slice %14 {offsets = [0, 256], sizes = [8, 128], strides = [1, 1]} : vector<8x384xf32> to vector<8x128xf32>
    %c0_24 = arith.constant 0 : index
    %c0_25 = arith.constant 0 : index
    %37 = vector.load %arg5[%c0_24, %c0_25] : memref<128x128xf32, #tpu.memory_space<vmem>>, vector<128x128xf32>
    %cst_26 = arith.constant dense<0.000000e+00> : vector<8x128xf32>
    %38 = tpu.matmul %35, %37, %cst_26 {dimension_numbers = #tpu.dot_dimension_numbers<[1], [0], [0], [1], [0, 0, 1, 1], [], []>} : vector<8x128xf32>, vector<128x128xf32>, vector<8x128xf32> -> vector<8x128xf32>
    %39 = arith.addf %36, %38 : vector<8x128xf32>
    %40 = math.tanh %39 : vector<8x128xf32>
    %cst_27 = arith.constant 1.000000e+00 : f32
    %41 = vector.broadcast %cst_27 : f32 to vector<8x128xf32>
    %42 = arith.subf %41, %26 : vector<8x128xf32>
    %43 = arith.mulf %42, %12 : vector<8x128xf32>
    %44 = arith.mulf %26, %40 : vector<8x128xf32>
    %45 = arith.addf %43, %44 : vector<8x128xf32>
    %c0_28 = arith.constant 0 : index
    %c0_29 = arith.constant 0 : index
    %c0_30 = arith.constant 0 : index
    %46 = vector.load %arg7[%c0_28, %c0_29, %c0_30] : memref<8x8x128xf32, #tpu.memory_space<vmem>>, vector<8x1x128xf32>
    %47 = vector.shape_cast %46 : vector<8x1x128xf32> to vector<8x128xf32>
    %48 = vector.shape_cast %45 : vector<8x128xf32> to vector<8x1x128xf32>
    tpu.vector_store %arg7[%c0_28, %c0_29, %c0_30], %48 {strides = array<i32>} : memref<8x8x128xf32, #tpu.memory_space<vmem>>, vector<8x1x128xf32>,
    %c0_31 = arith.constant 0 : index
    %c1 = arith.constant 1 : index
    %c0_32 = arith.constant 0 : index
    %49 = vector.load %arg9[%c0_31, %c1, %c0_32] : memref<8x8x384xf32, #tpu.memory_space<vmem>>, vector<8x1x384xf32>
    %50 = vector.shape_cast %49 : vector<8x1x384xf32> to vector<8x384xf32>
    %51 = vector.extract_strided_slice %50 {offsets = [0, 0], sizes = [8, 256], strides = [1, 1]} : vector<8x384xf32> to vector<8x256xf32>
    %c0_33 = arith.constant 0 : index
    %c0_34 = arith.constant 0 : index
    %52 = vector.load %arg4[%c0_33, %c0_34] : memref<128x256xf32, #tpu.memory_space<vmem>>, vector<128x256xf32>
    %cst_35 = arith.constant dense<0.000000e+00> : vector<8x256xf32>
    %53 = tpu.matmul %45, %52, %cst_35 {dimension_numbers = #tpu.dot_dimension_numbers<[1], [0], [0], [1], [0, 0, 1, 1], [], []>} : vector<8x128xf32>, vector<128x256xf32>, vector<8x256xf32> -> vector<8x256xf32>
    %54 = arith.addf %51, %53 : vector<8x256xf32>
    %55 = vector.extract_strided_slice %54 {offsets = [0, 0], sizes = [8, 128], strides = [1, 1]} : vector<8x256xf32> to vector<8x128xf32>
    %cst_36 = arith.constant 5.000000e-01 : f32
    %56 = vector.broadcast %cst_36 : f32 to vector<8x128xf32>
    %57 = arith.mulf %56, %55 : vector<8x128xf32>
    %58 = math.tanh %57 : vector<8x128xf32>
    %cst_37 = arith.constant 1.000000e+00 : f32
    %59 = vector.broadcast %cst_37 : f32 to vector<8x128xf32>
    %60 = arith.addf %58, %59 : vector<8x128xf32>
    %cst_38 = arith.constant 5.000000e-01 : f32
    %61 = vector.broadcast %cst_38 : f32 to vector<8x128xf32>
    %62 = arith.mulf %61, %60 : vector<8x128xf32>
    %63 = vector.extract_strided_slice %54 {offsets = [0, 128], sizes = [8, 128], strides = [1, 1]} : vector<8x256xf32> to vector<8x128xf32>
    %cst_39 = arith.constant 5.000000e-01 : f32
    %64 = vector.broadcast %cst_39 : f32 to vector<8x128xf32>
    %65 = arith.mulf %64, %63 : vector<8x128xf32>
    %66 = math.tanh %65 : vector<8x128xf32>
    %cst_40 = arith.constant 1.000000e+00 : f32
    %67 = vector.broadcast %cst_40 : f32 to vector<8x128xf32>
    %68 = arith.addf %66, %67 : vector<8x128xf32>
    %cst_41 = arith.constant 5.000000e-01 : f32
    %69 = vector.broadcast %cst_41 : f32 to vector<8x128xf32>
    %70 = arith.mulf %69, %68 : vector<8x128xf32>
    %71 = arith.mulf %70, %45 : vector<8x128xf32>
    %72 = vector.extract_strided_slice %50 {offsets = [0, 256], sizes = [8, 128], strides = [1, 1]} : vector<8x384xf32> to vector<8x128xf32>
    %c0_42 = arith.constant 0 : index
    %c0_43 = arith.constant 0 : index
    %73 = vector.load %arg5[%c0_42, %c0_43] : memref<128x128xf32, #tpu.memory_space<vmem>>, vector<128x128xf32>
    %cst_44 = arith.constant dense<0.000000e+00> : vector<8x128xf32>
    %74 = tpu.matmul %71, %73, %cst_44 {dimension_numbers = #tpu.dot_dimension_numbers<[1], [0], [0], [1], [0, 0, 1, 1], [], []>} : vector<8x128xf32>, vector<128x128xf32>, vector<8x128xf32> -> vector<8x128xf32>
    %75 = arith.addf %72, %74 : vector<8x128xf32>
    %76 = math.tanh %75 : vector<8x128xf32>
    %cst_45 = arith.constant 1.000000e+00 : f32
    %77 = vector.broadcast %cst_45 : f32 to vector<8x128xf32>
    %78 = arith.subf %77, %62 : vector<8x128xf32>
    %79 = arith.mulf %78, %45 : vector<8x128xf32>
    %80 = arith.mulf %62, %76 : vector<8x128xf32>
    %81 = arith.addf %79, %80 : vector<8x128xf32>
    %c0_46 = arith.constant 0 : index
    %c1_47 = arith.constant 1 : index
    %c0_48 = arith.constant 0 : index
    %82 = vector.load %arg7[%c0_46, %c1_47, %c0_48] : memref<8x8x128xf32, #tpu.memory_space<vmem>>, vector<8x1x128xf32>
    %83 = vector.shape_cast %82 : vector<8x1x128xf32> to vector<8x128xf32>
    %84 = vector.shape_cast %81 : vector<8x128xf32> to vector<8x1x128xf32>
    tpu.vector_store %arg7[%c0_46, %c1_47, %c0_48], %84 {strides = array<i32>} : memref<8x8x128xf32, #tpu.memory_space<vmem>>, vector<8x1x128xf32>,
    %c0_49 = arith.constant 0 : index
    %c2 = arith.constant 2 : index
    %c0_50 = arith.constant 0 : index
    %85 = vector.load %arg9[%c0_49, %c2, %c0_50] : memref<8x8x384xf32, #tpu.memory_space<vmem>>, vector<8x1x384xf32>
    %86 = vector.shape_cast %85 : vector<8x1x384xf32> to vector<8x384xf32>
    %87 = vector.extract_strided_slice %86 {offsets = [0, 0], sizes = [8, 256], strides = [1, 1]} : vector<8x384xf32> to vector<8x256xf32>
    %c0_51 = arith.constant 0 : index
    %c0_52 = arith.constant 0 : index
    %88 = vector.load %arg4[%c0_51, %c0_52] : memref<128x256xf32, #tpu.memory_space<vmem>>, vector<128x256xf32>
    %cst_53 = arith.constant dense<0.000000e+00> : vector<8x256xf32>
    %89 = tpu.matmul %81, %88, %cst_53 {dimension_numbers = #tpu.dot_dimension_numbers<[1], [0], [0], [1], [0, 0, 1, 1], [], []>} : vector<8x128xf32>, vector<128x256xf32>, vector<8x256xf32> -> vector<8x256xf32>
    %90 = arith.addf %87, %89 : vector<8x256xf32>
    %91 = vector.extract_strided_slice %90 {offsets = [0, 0], sizes = [8, 128], strides = [1, 1]} : vector<8x256xf32> to vector<8x128xf32>
    %cst_54 = arith.constant 5.000000e-01 : f32
    %92 = vector.broadcast %cst_54 : f32 to vector<8x128xf32>
    %93 = arith.mulf %92, %91 : vector<8x128xf32>
    %94 = math.tanh %93 : vector<8x128xf32>
    %cst_55 = arith.constant 1.000000e+00 : f32
    %95 = vector.broadcast %cst_55 : f32 to vector<8x128xf32>
    %96 = arith.addf %94, %95 : vector<8x128xf32>
    %cst_56 = arith.constant 5.000000e-01 : f32
    %97 = vector.broadcast %cst_56 : f32 to vector<8x128xf32>
    %98 = arith.mulf %97, %96 : vector<8x128xf32>
    %99 = vector.extract_strided_slice %90 {offsets = [0, 128], sizes = [8, 128], strides = [1, 1]} : vector<8x256xf32> to vector<8x128xf32>
    %cst_57 = arith.constant 5.000000e-01 : f32
    %100 = vector.broadcast %cst_57 : f32 to vector<8x128xf32>
    %101 = arith.mulf %100, %99 : vector<8x128xf32>
    %102 = math.tanh %101 : vector<8x128xf32>
    %cst_58 = arith.constant 1.000000e+00 : f32
    %103 = vector.broadcast %cst_58 : f32 to vector<8x128xf32>
    %104 = arith.addf %102, %103 : vector<8x128xf32>
    %cst_59 = arith.constant 5.000000e-01 : f32
    %105 = vector.broadcast %cst_59 : f32 to vector<8x128xf32>
    %106 = arith.mulf %105, %104 : vector<8x128xf32>
    %107 = arith.mulf %106, %81 : vector<8x128xf32>
    %108 = vector.extract_strided_slice %86 {offsets = [0, 256], sizes = [8, 128], strides = [1, 1]} : vector<8x384xf32> to vector<8x128xf32>
    %c0_60 = arith.constant 0 : index
    %c0_61 = arith.constant 0 : index
    %109 = vector.load %arg5[%c0_60, %c0_61] : memref<128x128xf32, #tpu.memory_space<vmem>>, vector<128x128xf32>
    %cst_62 = arith.constant dense<0.000000e+00> : vector<8x128xf32>
    %110 = tpu.matmul %107, %109, %cst_62 {dimension_numbers = #tpu.dot_dimension_numbers<[1], [0], [0], [1], [0, 0, 1, 1], [], []>} : vector<8x128xf32>, vector<128x128xf32>, vector<8x128xf32> -> vector<8x128xf32>
    %111 = arith.addf %108, %110 : vector<8x128xf32>
    %112 = math.tanh %111 : vector<8x128xf32>
    %cst_63 = arith.constant 1.000000e+00 : f32
    %113 = vector.broadcast %cst_63 : f32 to vector<8x128xf32>
    %114 = arith.subf %113, %98 : vector<8x128xf32>
    %115 = arith.mulf %114, %81 : vector<8x128xf32>
    %116 = arith.mulf %98, %112 : vector<8x128xf32>
    %117 = arith.addf %115, %116 : vector<8x128xf32>
    %c0_64 = arith.constant 0 : index
    %c2_65 = arith.constant 2 : index
    %c0_66 = arith.constant 0 : index
    %118 = vector.load %arg7[%c0_64, %c2_65, %c0_66] : memref<8x8x128xf32, #tpu.memory_space<vmem>>, vector<8x1x128xf32>
    %119 = vector.shape_cast %118 : vector<8x1x128xf32> to vector<8x128xf32>
    %120 = vector.shape_cast %117 : vector<8x128xf32> to vector<8x1x128xf32>
    tpu.vector_store %arg7[%c0_64, %c2_65, %c0_66], %120 {strides = array<i32>} : memref<8x8x128xf32, #tpu.memory_space<vmem>>, vector<8x1x128xf32>,
    %c0_67 = arith.constant 0 : index
    %c3 = arith.constant 3 : index
    %c0_68 = arith.constant 0 : index
    %121 = vector.load %arg9[%c0_67, %c3, %c0_68] : memref<8x8x384xf32, #tpu.memory_space<vmem>>, vector<8x1x384xf32>
    %122 = vector.shape_cast %121 : vector<8x1x384xf32> to vector<8x384xf32>
    %123 = vector.extract_strided_slice %122 {offsets = [0, 0], sizes = [8, 256], strides = [1, 1]} : vector<8x384xf32> to vector<8x256xf32>
    %c0_69 = arith.constant 0 : index
    %c0_70 = arith.constant 0 : index
    %124 = vector.load %arg4[%c0_69, %c0_70] : memref<128x256xf32, #tpu.memory_space<vmem>>, vector<128x256xf32>
    %cst_71 = arith.constant dense<0.000000e+00> : vector<8x256xf32>
    %125 = tpu.matmul %117, %124, %cst_71 {dimension_numbers = #tpu.dot_dimension_numbers<[1], [0], [0], [1], [0, 0, 1, 1], [], []>} : vector<8x128xf32>, vector<128x256xf32>, vector<8x256xf32> -> vector<8x256xf32>
    %126 = arith.addf %123, %125 : vector<8x256xf32>
    %127 = vector.extract_strided_slice %126 {offsets = [0, 0], sizes = [8, 128], strides = [1, 1]} : vector<8x256xf32> to vector<8x128xf32>
    %cst_72 = arith.constant 5.000000e-01 : f32
    %128 = vector.broadcast %cst_72 : f32 to vector<8x128xf32>
    %129 = arith.mulf %128, %127 : vector<8x128xf32>
    %130 = math.tanh %129 : vector<8x128xf32>
    %cst_73 = arith.constant 1.000000e+00 : f32
    %131 = vector.broadcast %cst_73 : f32 to vector<8x128xf32>
    %132 = arith.addf %130, %131 : vector<8x128xf32>
    %cst_74 = arith.constant 5.000000e-01 : f32
    %133 = vector.broadcast %cst_74 : f32 to vector<8x128xf32>
    %134 = arith.mulf %133, %132 : vector<8x128xf32>
    %135 = vector.extract_strided_slice %126 {offsets = [0, 128], sizes = [8, 128], strides = [1, 1]} : vector<8x256xf32> to vector<8x128xf32>
    %cst_75 = arith.constant 5.000000e-01 : f32
    %136 = vector.broadcast %cst_75 : f32 to vector<8x128xf32>
    %137 = arith.mulf %136, %135 : vector<8x128xf32>
    %138 = math.tanh %137 : vector<8x128xf32>
    %cst_76 = arith.constant 1.000000e+00 : f32
    %139 = vector.broadcast %cst_76 : f32 to vector<8x128xf32>
    %140 = arith.addf %138, %139 : vector<8x128xf32>
    %cst_77 = arith.constant 5.000000e-01 : f32
    %141 = vector.broadcast %cst_77 : f32 to vector<8x128xf32>
    %142 = arith.mulf %141, %140 : vector<8x128xf32>
    %143 = arith.mulf %142, %117 : vector<8x128xf32>
    %144 = vector.extract_strided_slice %122 {offsets = [0, 256], sizes = [8, 128], strides = [1, 1]} : vector<8x384xf32> to vector<8x128xf32>
    %c0_78 = arith.constant 0 : index
    %c0_79 = arith.constant 0 : index
    %145 = vector.load %arg5[%c0_78, %c0_79] : memref<128x128xf32, #tpu.memory_space<vmem>>, vector<128x128xf32>
    %cst_80 = arith.constant dense<0.000000e+00> : vector<8x128xf32>
    %146 = tpu.matmul %143, %145, %cst_80 {dimension_numbers = #tpu.dot_dimension_numbers<[1], [0], [0], [1], [0, 0, 1, 1], [], []>} : vector<8x128xf32>, vector<128x128xf32>, vector<8x128xf32> -> vector<8x128xf32>
    %147 = arith.addf %144, %146 : vector<8x128xf32>
    %148 = math.tanh %147 : vector<8x128xf32>
    %cst_81 = arith.constant 1.000000e+00 : f32
    %149 = vector.broadcast %cst_81 : f32 to vector<8x128xf32>
    %150 = arith.subf %149, %134 : vector<8x128xf32>
    %151 = arith.mulf %150, %117 : vector<8x128xf32>
    %152 = arith.mulf %134, %148 : vector<8x128xf32>
    %153 = arith.addf %151, %152 : vector<8x128xf32>
    %c0_82 = arith.constant 0 : index
    %c3_83 = arith.constant 3 : index
    %c0_84 = arith.constant 0 : index
    %154 = vector.load %arg7[%c0_82, %c3_83, %c0_84] : memref<8x8x128xf32, #tpu.memory_space<vmem>>, vector<8x1x128xf32>
    %155 = vector.shape_cast %154 : vector<8x1x128xf32> to vector<8x128xf32>
    %156 = vector.shape_cast %153 : vector<8x128xf32> to vector<8x1x128xf32>
    tpu.vector_store %arg7[%c0_82, %c3_83, %c0_84], %156 {strides = array<i32>} : memref<8x8x128xf32, #tpu.memory_space<vmem>>, vector<8x1x128xf32>,
    %c0_85 = arith.constant 0 : index
    %c4 = arith.constant 4 : index
    %c0_86 = arith.constant 0 : index
    %157 = vector.load %arg9[%c0_85, %c4, %c0_86] : memref<8x8x384xf32, #tpu.memory_space<vmem>>, vector<8x1x384xf32>
    %158 = vector.shape_cast %157 : vector<8x1x384xf32> to vector<8x384xf32>
    %159 = vector.extract_strided_slice %158 {offsets = [0, 0], sizes = [8, 256], strides = [1, 1]} : vector<8x384xf32> to vector<8x256xf32>
    %c0_87 = arith.constant 0 : index
    %c0_88 = arith.constant 0 : index
    %160 = vector.load %arg4[%c0_87, %c0_88] : memref<128x256xf32, #tpu.memory_space<vmem>>, vector<128x256xf32>
    %cst_89 = arith.constant dense<0.000000e+00> : vector<8x256xf32>
    %161 = tpu.matmul %153, %160, %cst_89 {dimension_numbers = #tpu.dot_dimension_numbers<[1], [0], [0], [1], [0, 0, 1, 1], [], []>} : vector<8x128xf32>, vector<128x256xf32>, vector<8x256xf32> -> vector<8x256xf32>
    %162 = arith.addf %159, %161 : vector<8x256xf32>
    %163 = vector.extract_strided_slice %162 {offsets = [0, 0], sizes = [8, 128], strides = [1, 1]} : vector<8x256xf32> to vector<8x128xf32>
    %cst_90 = arith.constant 5.000000e-01 : f32
    %164 = vector.broadcast %cst_90 : f32 to vector<8x128xf32>
    %165 = arith.mulf %164, %163 : vector<8x128xf32>
    %166 = math.tanh %165 : vector<8x128xf32>
    %cst_91 = arith.constant 1.000000e+00 : f32
    %167 = vector.broadcast %cst_91 : f32 to vector<8x128xf32>
    %168 = arith.addf %166, %167 : vector<8x128xf32>
    %cst_92 = arith.constant 5.000000e-01 : f32
    %169 = vector.broadcast %cst_92 : f32 to vector<8x128xf32>
    %170 = arith.mulf %169, %168 : vector<8x128xf32>
    %171 = vector.extract_strided_slice %162 {offsets = [0, 128], sizes = [8, 128], strides = [1, 1]} : vector<8x256xf32> to vector<8x128xf32>
    %cst_93 = arith.constant 5.000000e-01 : f32
    %172 = vector.broadcast %cst_93 : f32 to vector<8x128xf32>
    %173 = arith.mulf %172, %171 : vector<8x128xf32>
    %174 = math.tanh %173 : vector<8x128xf32>
    %cst_94 = arith.constant 1.000000e+00 : f32
    %175 = vector.broadcast %cst_94 : f32 to vector<8x128xf32>
    %176 = arith.addf %174, %175 : vector<8x128xf32>
    %cst_95 = arith.constant 5.000000e-01 : f32
    %177 = vector.broadcast %cst_95 : f32 to vector<8x128xf32>
    %178 = arith.mulf %177, %176 : vector<8x128xf32>
    %179 = arith.mulf %178, %153 : vector<8x128xf32>
    %180 = vector.extract_strided_slice %158 {offsets = [0, 256], sizes = [8, 128], strides = [1, 1]} : vector<8x384xf32> to vector<8x128xf32>
    %c0_96 = arith.constant 0 : index
    %c0_97 = arith.constant 0 : index
    %181 = vector.load %arg5[%c0_96, %c0_97] : memref<128x128xf32, #tpu.memory_space<vmem>>, vector<128x128xf32>
    %cst_98 = arith.constant dense<0.000000e+00> : vector<8x128xf32>
    %182 = tpu.matmul %179, %181, %cst_98 {dimension_numbers = #tpu.dot_dimension_numbers<[1], [0], [0], [1], [0, 0, 1, 1], [], []>} : vector<8x128xf32>, vector<128x128xf32>, vector<8x128xf32> -> vector<8x128xf32>
    %183 = arith.addf %180, %182 : vector<8x128xf32>
    %184 = math.tanh %183 : vector<8x128xf32>
    %cst_99 = arith.constant 1.000000e+00 : f32
    %185 = vector.broadcast %cst_99 : f32 to vector<8x128xf32>
    %186 = arith.subf %185, %170 : vector<8x128xf32>
    %187 = arith.mulf %186, %153 : vector<8x128xf32>
    %188 = arith.mulf %170, %184 : vector<8x128xf32>
    %189 = arith.addf %187, %188 : vector<8x128xf32>
    %c0_100 = arith.constant 0 : index
    %c4_101 = arith.constant 4 : index
    %c0_102 = arith.constant 0 : index
    %190 = vector.load %arg7[%c0_100, %c4_101, %c0_102] : memref<8x8x128xf32, #tpu.memory_space<vmem>>, vector<8x1x128xf32>
    %191 = vector.shape_cast %190 : vector<8x1x128xf32> to vector<8x128xf32>
    %192 = vector.shape_cast %189 : vector<8x128xf32> to vector<8x1x128xf32>
    tpu.vector_store %arg7[%c0_100, %c4_101, %c0_102], %192 {strides = array<i32>} : memref<8x8x128xf32, #tpu.memory_space<vmem>>, vector<8x1x128xf32>,
    %c0_103 = arith.constant 0 : index
    %c5 = arith.constant 5 : index
    %c0_104 = arith.constant 0 : index
    %193 = vector.load %arg9[%c0_103, %c5, %c0_104] : memref<8x8x384xf32, #tpu.memory_space<vmem>>, vector<8x1x384xf32>
    %194 = vector.shape_cast %193 : vector<8x1x384xf32> to vector<8x384xf32>
    %195 = vector.extract_strided_slice %194 {offsets = [0, 0], sizes = [8, 256], strides = [1, 1]} : vector<8x384xf32> to vector<8x256xf32>
    %c0_105 = arith.constant 0 : index
    %c0_106 = arith.constant 0 : index
    %196 = vector.load %arg4[%c0_105, %c0_106] : memref<128x256xf32, #tpu.memory_space<vmem>>, vector<128x256xf32>
    %cst_107 = arith.constant dense<0.000000e+00> : vector<8x256xf32>
    %197 = tpu.matmul %189, %196, %cst_107 {dimension_numbers = #tpu.dot_dimension_numbers<[1], [0], [0], [1], [0, 0, 1, 1], [], []>} : vector<8x128xf32>, vector<128x256xf32>, vector<8x256xf32> -> vector<8x256xf32>
    %198 = arith.addf %195, %197 : vector<8x256xf32>
    %199 = vector.extract_strided_slice %198 {offsets = [0, 0], sizes = [8, 128], strides = [1, 1]} : vector<8x256xf32> to vector<8x128xf32>
    %cst_108 = arith.constant 5.000000e-01 : f32
    %200 = vector.broadcast %cst_108 : f32 to vector<8x128xf32>
    %201 = arith.mulf %200, %199 : vector<8x128xf32>
    %202 = math.tanh %201 : vector<8x128xf32>
    %cst_109 = arith.constant 1.000000e+00 : f32
    %203 = vector.broadcast %cst_109 : f32 to vector<8x128xf32>
    %204 = arith.addf %202, %203 : vector<8x128xf32>
    %cst_110 = arith.constant 5.000000e-01 : f32
    %205 = vector.broadcast %cst_110 : f32 to vector<8x128xf32>
    %206 = arith.mulf %205, %204 : vector<8x128xf32>
    %207 = vector.extract_strided_slice %198 {offsets = [0, 128], sizes = [8, 128], strides = [1, 1]} : vector<8x256xf32> to vector<8x128xf32>
    %cst_111 = arith.constant 5.000000e-01 : f32
    %208 = vector.broadcast %cst_111 : f32 to vector<8x128xf32>
    %209 = arith.mulf %208, %207 : vector<8x128xf32>
    %210 = math.tanh %209 : vector<8x128xf32>
    %cst_112 = arith.constant 1.000000e+00 : f32
    %211 = vector.broadcast %cst_112 : f32 to vector<8x128xf32>
    %212 = arith.addf %210, %211 : vector<8x128xf32>
    %cst_113 = arith.constant 5.000000e-01 : f32
    %213 = vector.broadcast %cst_113 : f32 to vector<8x128xf32>
    %214 = arith.mulf %213, %212 : vector<8x128xf32>
    %215 = arith.mulf %214, %189 : vector<8x128xf32>
    %216 = vector.extract_strided_slice %194 {offsets = [0, 256], sizes = [8, 128], strides = [1, 1]} : vector<8x384xf32> to vector<8x128xf32>
    %c0_114 = arith.constant 0 : index
    %c0_115 = arith.constant 0 : index
    %217 = vector.load %arg5[%c0_114, %c0_115] : memref<128x128xf32, #tpu.memory_space<vmem>>, vector<128x128xf32>
    %cst_116 = arith.constant dense<0.000000e+00> : vector<8x128xf32>
    %218 = tpu.matmul %215, %217, %cst_116 {dimension_numbers = #tpu.dot_dimension_numbers<[1], [0], [0], [1], [0, 0, 1, 1], [], []>} : vector<8x128xf32>, vector<128x128xf32>, vector<8x128xf32> -> vector<8x128xf32>
    %219 = arith.addf %216, %218 : vector<8x128xf32>
    %220 = math.tanh %219 : vector<8x128xf32>
    %cst_117 = arith.constant 1.000000e+00 : f32
    %221 = vector.broadcast %cst_117 : f32 to vector<8x128xf32>
    %222 = arith.subf %221, %206 : vector<8x128xf32>
    %223 = arith.mulf %222, %189 : vector<8x128xf32>
    %224 = arith.mulf %206, %220 : vector<8x128xf32>
    %225 = arith.addf %223, %224 : vector<8x128xf32>
    %c0_118 = arith.constant 0 : index
    %c5_119 = arith.constant 5 : index
    %c0_120 = arith.constant 0 : index
    %226 = vector.load %arg7[%c0_118, %c5_119, %c0_120] : memref<8x8x128xf32, #tpu.memory_space<vmem>>, vector<8x1x128xf32>
    %227 = vector.shape_cast %226 : vector<8x1x128xf32> to vector<8x128xf32>
    %228 = vector.shape_cast %225 : vector<8x128xf32> to vector<8x1x128xf32>
    tpu.vector_store %arg7[%c0_118, %c5_119, %c0_120], %228 {strides = array<i32>} : memref<8x8x128xf32, #tpu.memory_space<vmem>>, vector<8x1x128xf32>,
    %c0_121 = arith.constant 0 : index
    %c6 = arith.constant 6 : index
    %c0_122 = arith.constant 0 : index
    %229 = vector.load %arg9[%c0_121, %c6, %c0_122] : memref<8x8x384xf32, #tpu.memory_space<vmem>>, vector<8x1x384xf32>
    %230 = vector.shape_cast %229 : vector<8x1x384xf32> to vector<8x384xf32>
    %231 = vector.extract_strided_slice %230 {offsets = [0, 0], sizes = [8, 256], strides = [1, 1]} : vector<8x384xf32> to vector<8x256xf32>
    %c0_123 = arith.constant 0 : index
    %c0_124 = arith.constant 0 : index
    %232 = vector.load %arg4[%c0_123, %c0_124] : memref<128x256xf32, #tpu.memory_space<vmem>>, vector<128x256xf32>
    %cst_125 = arith.constant dense<0.000000e+00> : vector<8x256xf32>
    %233 = tpu.matmul %225, %232, %cst_125 {dimension_numbers = #tpu.dot_dimension_numbers<[1], [0], [0], [1], [0, 0, 1, 1], [], []>} : vector<8x128xf32>, vector<128x256xf32>, vector<8x256xf32> -> vector<8x256xf32>
    %234 = arith.addf %231, %233 : vector<8x256xf32>
    %235 = vector.extract_strided_slice %234 {offsets = [0, 0], sizes = [8, 128], strides = [1, 1]} : vector<8x256xf32> to vector<8x128xf32>
    %cst_126 = arith.constant 5.000000e-01 : f32
    %236 = vector.broadcast %cst_126 : f32 to vector<8x128xf32>
    %237 = arith.mulf %236, %235 : vector<8x128xf32>
    %238 = math.tanh %237 : vector<8x128xf32>
    %cst_127 = arith.constant 1.000000e+00 : f32
    %239 = vector.broadcast %cst_127 : f32 to vector<8x128xf32>
    %240 = arith.addf %238, %239 : vector<8x128xf32>
    %cst_128 = arith.constant 5.000000e-01 : f32
    %241 = vector.broadcast %cst_128 : f32 to vector<8x128xf32>
    %242 = arith.mulf %241, %240 : vector<8x128xf32>
    %243 = vector.extract_strided_slice %234 {offsets = [0, 128], sizes = [8, 128], strides = [1, 1]} : vector<8x256xf32> to vector<8x128xf32>
    %cst_129 = arith.constant 5.000000e-01 : f32
    %244 = vector.broadcast %cst_129 : f32 to vector<8x128xf32>
    %245 = arith.mulf %244, %243 : vector<8x128xf32>
    %246 = math.tanh %245 : vector<8x128xf32>
    %cst_130 = arith.constant 1.000000e+00 : f32
    %247 = vector.broadcast %cst_130 : f32 to vector<8x128xf32>
    %248 = arith.addf %246, %247 : vector<8x128xf32>
    %cst_131 = arith.constant 5.000000e-01 : f32
    %249 = vector.broadcast %cst_131 : f32 to vector<8x128xf32>
    %250 = arith.mulf %249, %248 : vector<8x128xf32>
    %251 = arith.mulf %250, %225 : vector<8x128xf32>
    %252 = vector.extract_strided_slice %230 {offsets = [0, 256], sizes = [8, 128], strides = [1, 1]} : vector<8x384xf32> to vector<8x128xf32>
    %c0_132 = arith.constant 0 : index
    %c0_133 = arith.constant 0 : index
    %253 = vector.load %arg5[%c0_132, %c0_133] : memref<128x128xf32, #tpu.memory_space<vmem>>, vector<128x128xf32>
    %cst_134 = arith.constant dense<0.000000e+00> : vector<8x128xf32>
    %254 = tpu.matmul %251, %253, %cst_134 {dimension_numbers = #tpu.dot_dimension_numbers<[1], [0], [0], [1], [0, 0, 1, 1], [], []>} : vector<8x128xf32>, vector<128x128xf32>, vector<8x128xf32> -> vector<8x128xf32>
    %255 = arith.addf %252, %254 : vector<8x128xf32>
    %256 = math.tanh %255 : vector<8x128xf32>
    %cst_135 = arith.constant 1.000000e+00 : f32
    %257 = vector.broadcast %cst_135 : f32 to vector<8x128xf32>
    %258 = arith.subf %257, %242 : vector<8x128xf32>
    %259 = arith.mulf %258, %225 : vector<8x128xf32>
    %260 = arith.mulf %242, %256 : vector<8x128xf32>
    %261 = arith.addf %259, %260 : vector<8x128xf32>
    %c0_136 = arith.constant 0 : index
    %c6_137 = arith.constant 6 : index
    %c0_138 = arith.constant 0 : index
    %262 = vector.load %arg7[%c0_136, %c6_137, %c0_138] : memref<8x8x128xf32, #tpu.memory_space<vmem>>, vector<8x1x128xf32>
    %263 = vector.shape_cast %262 : vector<8x1x128xf32> to vector<8x128xf32>
    %264 = vector.shape_cast %261 : vector<8x128xf32> to vector<8x1x128xf32>
    tpu.vector_store %arg7[%c0_136, %c6_137, %c0_138], %264 {strides = array<i32>} : memref<8x8x128xf32, #tpu.memory_space<vmem>>, vector<8x1x128xf32>,
    %c0_139 = arith.constant 0 : index
    %c7 = arith.constant 7 : index
    %c0_140 = arith.constant 0 : index
    %265 = vector.load %arg9[%c0_139, %c7, %c0_140] : memref<8x8x384xf32, #tpu.memory_space<vmem>>, vector<8x1x384xf32>
    %266 = vector.shape_cast %265 : vector<8x1x384xf32> to vector<8x384xf32>
    %267 = vector.extract_strided_slice %266 {offsets = [0, 0], sizes = [8, 256], strides = [1, 1]} : vector<8x384xf32> to vector<8x256xf32>
    %c0_141 = arith.constant 0 : index
    %c0_142 = arith.constant 0 : index
    %268 = vector.load %arg4[%c0_141, %c0_142] : memref<128x256xf32, #tpu.memory_space<vmem>>, vector<128x256xf32>
    %cst_143 = arith.constant dense<0.000000e+00> : vector<8x256xf32>
    %269 = tpu.matmul %261, %268, %cst_143 {dimension_numbers = #tpu.dot_dimension_numbers<[1], [0], [0], [1], [0, 0, 1, 1], [], []>} : vector<8x128xf32>, vector<128x256xf32>, vector<8x256xf32> -> vector<8x256xf32>
    %270 = arith.addf %267, %269 : vector<8x256xf32>
    %271 = vector.extract_strided_slice %270 {offsets = [0, 0], sizes = [8, 128], strides = [1, 1]} : vector<8x256xf32> to vector<8x128xf32>
    %cst_144 = arith.constant 5.000000e-01 : f32
    %272 = vector.broadcast %cst_144 : f32 to vector<8x128xf32>
    %273 = arith.mulf %272, %271 : vector<8x128xf32>
    %274 = math.tanh %273 : vector<8x128xf32>
    %cst_145 = arith.constant 1.000000e+00 : f32
    %275 = vector.broadcast %cst_145 : f32 to vector<8x128xf32>
    %276 = arith.addf %274, %275 : vector<8x128xf32>
    %cst_146 = arith.constant 5.000000e-01 : f32
    %277 = vector.broadcast %cst_146 : f32 to vector<8x128xf32>
    %278 = arith.mulf %277, %276 : vector<8x128xf32>
    %279 = vector.extract_strided_slice %270 {offsets = [0, 128], sizes = [8, 128], strides = [1, 1]} : vector<8x256xf32> to vector<8x128xf32>
    %cst_147 = arith.constant 5.000000e-01 : f32
    %280 = vector.broadcast %cst_147 : f32 to vector<8x128xf32>
    %281 = arith.mulf %280, %279 : vector<8x128xf32>
    %282 = math.tanh %281 : vector<8x128xf32>
    %cst_148 = arith.constant 1.000000e+00 : f32
    %283 = vector.broadcast %cst_148 : f32 to vector<8x128xf32>
    %284 = arith.addf %282, %283 : vector<8x128xf32>
    %cst_149 = arith.constant 5.000000e-01 : f32
    %285 = vector.broadcast %cst_149 : f32 to vector<8x128xf32>
    %286 = arith.mulf %285, %284 : vector<8x128xf32>
    %287 = arith.mulf %286, %261 : vector<8x128xf32>
    %288 = vector.extract_strided_slice %266 {offsets = [0, 256], sizes = [8, 128], strides = [1, 1]} : vector<8x384xf32> to vector<8x128xf32>
    %c0_150 = arith.constant 0 : index
    %c0_151 = arith.constant 0 : index
    %289 = vector.load %arg5[%c0_150, %c0_151] : memref<128x128xf32, #tpu.memory_space<vmem>>, vector<128x128xf32>
    %cst_152 = arith.constant dense<0.000000e+00> : vector<8x128xf32>
    %290 = tpu.matmul %287, %289, %cst_152 {dimension_numbers = #tpu.dot_dimension_numbers<[1], [0], [0], [1], [0, 0, 1, 1], [], []>} : vector<8x128xf32>, vector<128x128xf32>, vector<8x128xf32> -> vector<8x128xf32>
    %291 = arith.addf %288, %290 : vector<8x128xf32>
    %292 = math.tanh %291 : vector<8x128xf32>
    %cst_153 = arith.constant 1.000000e+00 : f32
    %293 = vector.broadcast %cst_153 : f32 to vector<8x128xf32>
    %294 = arith.subf %293, %278 : vector<8x128xf32>
    %295 = arith.mulf %294, %261 : vector<8x128xf32>
    %296 = arith.mulf %278, %292 : vector<8x128xf32>
    %297 = arith.addf %295, %296 : vector<8x128xf32>
    %c0_154 = arith.constant 0 : index
    %c7_155 = arith.constant 7 : index
    %c0_156 = arith.constant 0 : index
    %298 = vector.load %arg7[%c0_154, %c7_155, %c0_156] : memref<8x8x128xf32, #tpu.memory_space<vmem>>, vector<8x1x128xf32>
    %299 = vector.shape_cast %298 : vector<8x1x128xf32> to vector<8x128xf32>
    %300 = vector.shape_cast %297 : vector<8x128xf32> to vector<8x1x128xf32>
    tpu.vector_store %arg7[%c0_154, %c7_155, %c0_156], %300 {strides = array<i32>} : memref<8x8x128xf32, #tpu.memory_space<vmem>>, vector<8x1x128xf32>,
    %c0_157 = arith.constant 0 : index
    %c0_158 = arith.constant 0 : index
    %301 = vector.load %arg8[%c0_157, %c0_158] : memref<8x128xf32, #tpu.memory_space<vmem>>, vector<8x128xf32>
    tpu.vector_store %arg8[%c0_157, %c0_158], %297 {strides = array<i32>} : memref<8x128xf32, #tpu.memory_space<vmem>>, vector<8x128xf32>,
    return
  }
  func.func @transform_0(%arg0: i32, %arg1: i32) -> (i32, i32, i32) {
    %c0_i32 = arith.constant 0 : i32
    %c0_i32_0 = arith.constant 0 : i32
    return %arg0, %arg1, %c0_i32 : i32, i32, i32
  }
  func.func @transform_1(%arg0: i32, %arg1: i32) -> (i32, i32) {
    %c0_i32 = arith.constant 0 : i32
    %c0_i32_0 = arith.constant 0 : i32
    %c0_i32_1 = arith.constant 0 : i32
    return %c0_i32, %c0_i32_0 : i32, i32
  }
  func.func @transform_2(%arg0: i32, %arg1: i32) -> (i32, i32) {
    %c0_i32 = arith.constant 0 : i32
    %c0_i32_0 = arith.constant 0 : i32
    %c0_i32_1 = arith.constant 0 : i32
    return %c0_i32, %c0_i32_0 : i32, i32
  }
  func.func @transform_3(%arg0: i32, %arg1: i32) -> (i32, i32) {
    %c0_i32 = arith.constant 0 : i32
    %c0_i32_0 = arith.constant 0 : i32
    %c0_i32_1 = arith.constant 0 : i32
    return %c0_i32, %c0_i32_0 : i32, i32
  }
  func.func @transform_4(%arg0: i32, %arg1: i32) -> (i32, i32) {
    %c0_i32 = arith.constant 0 : i32
    %c0_i32_0 = arith.constant 0 : i32
    %c0_i32_1 = arith.constant 0 : i32
    return %c0_i32, %c0_i32_0 : i32, i32
  }
  func.func @transform_5(%arg0: i32, %arg1: i32) -> (i32, i32, i32) {
    %c0_i32 = arith.constant 0 : i32
    %c0_i32_0 = arith.constant 0 : i32
    return %arg0, %arg1, %c0_i32 : i32, i32, i32
  }
}

</mosaic_0001>

<bundles_post_ra>
// kernel: tpu_custom_call.1
= control target key start
LH: loop header
LB: loop body
LE: loop exit
PB: predicated region body
PF: predicated region fallthrough
CT: control target
= control target key end

     0   :  { %10 = vsyncpa [#allocation5], 0  ;;  %s8628_s0 = inlined_call_operand.hbm [shape: f32[8,8,128], index: 0, kind: input, shape index: {}]   ;;  %s8629_s1 = inlined_call_operand.hbm [shape: f32[128,384], index: 1, kind: input, shape index: {}]   ;;  %s8630_s2 = inlined_call_operand.hbm [shape: f32[128,256], index: 2, kind: input, shape index: {}]   ;;  %s8631_s3 = inlined_call_operand.hbm [shape: f32[128,128], index: 3, kind: input, shape index: {}]   ;;  %s8632_s4 = inlined_call_operand.vmem [shape: f32[1,384], index: 4, kind: input, shape index: {}]   ;;  %s8633_s5 = inlined_call_operand.hbm [shape: f32[8,8,128], index: 5, kind: output, shape index: {}]  }
   0x1   :  { %11 = vsyncpa [#allocation8], 0 }
   0x2   :  { %12 = vsyncpa [#allocation11], 0 }
   0x3   :  { %13 = vsyncpa [#allocation6], 0  ;;  %s6971_s18 = smov [#allocation7]   ;;  %s6853_s22 = scalar_lea.hbm %s8629_s1, 6144 }
   0x4   :  { %s31_s19 = sshll.u32 %s6971_s18, 4  ;;  %p6854_p0 = scmp.ne.s32.totalorder %s8629_s1, %s6853_s22  ;;  %s32_s19 = int_to_ptr.vmem [resolvable:$true] %s31_s19 }
   0x5   :  { %p6857_p1 = scmp.lt.u32.totalorder %s6853_s22, %s8629_s1 }
   0x7   :  { %p6859_p2 = pnand %p6857_p1, %p6854_p0 }
   0x9   :  { %6862 = shalt.err (!%p6859_p2)
}
   0xa   :  { %s6863_s27 = scalar_lea.vmem %s32_s19, 6144  ;;  %p6868_p4 = scmp.lt.s32.totalorder %s32_s19, %s32_s19 }
   0xb   :  { %p6864_p3 = scmp.ne.s32.totalorder %s32_s19, %s6863_s27  ;;  %p6869_p5 = scmp.lt.s32.totalorder %s6863_s27, %s6863_s27 }
   0xd   :  { %p6870_p6 = por %p6869_p5, %p6868_p4 }
   0xf   :  { %p6871_p7 = pnand %p6870_p6, %p6864_p3 }
  0x11   :  { %6874 = shalt.err (!%p6871_p7)
}
  0x12   :  { %s6972_s28 = smov 384   ;;  %s6973_s29 = smov 24  }
  0x13   :  { %37 = dma.hbm_to_vmem [thread:$0]  %s8629_s1, 6144, %s32_s19, [#allocation8], %s6972_s28, %s6972_s28, %s6973_s29  }
  0x14   :  { %s6974_s7 = smov [#allocation4]   ;;  %s6875_s11 = scalar_lea.hbm %s8628_s0, 1024 }
  0x15   :  { %s19_s8 = sshll.u32 %s6974_s7, 4  ;;  %p6876_p8 = scmp.ne.s32.totalorder %s8628_s0, %s6875_s11  ;;  %s20_s8 = int_to_ptr.vmem [resolvable:$true] %s19_s8 }
  0x16   :  { %p6879_p9 = scmp.lt.u32.totalorder %s6875_s11, %s8628_s0 }
  0x18   :  { %p6881_p10 = pnand %p6879_p9, %p6876_p8 }
  0x1a   :  { %6884 = shalt.err (!%p6881_p10)
}
  0x1b   :  { %s6885_s16 = scalar_lea.vmem %s20_s8, 1024  ;;  %p6890_p12 = scmp.lt.s32.totalorder %s20_s8, %s20_s8 }
  0x1c   :  { %p6886_p11 = scmp.ne.s32.totalorder %s20_s8, %s6885_s16  ;;  %p6891_p13 = scmp.lt.s32.totalorder %s6885_s16, %s6885_s16 }
  0x1e   :  { %p6892_p0 = por %p6891_p13, %p6890_p12 }
  0x20   :  { %p6893_p1 = pnand %p6892_p0, %p6886_p11 }
  0x22   :  { %6896 = shalt.err (!%p6893_p1)
}
  0x23   :  { %s6975_s1 = smov 128   ;;  %s6976_s17 = smov 8  }
  0x24   :  { %25 = dma.hbm_to_vmem [thread:$0]  %s8628_s0, 1024, %s20_s8, [#allocation5], %s6975_s1, %s6975_s1, %s6976_s17  }
  0x25   :  { %s6977_s20 = smov [#allocation9]   ;;  %s6897_s24 = scalar_lea.hbm %s8630_s2, 4096 }
  0x26   :  { %s43_s21 = sshll.u32 %s6977_s20, 4  ;;  %p6898_p2 = scmp.ne.s32.totalorder %s8630_s2, %s6897_s24  ;;  %s44_s21 = int_to_ptr.vmem [resolvable:$true] %s43_s21 }
  0x27   :  { %p6901_p3 = scmp.lt.u32.totalorder %s6897_s24, %s8630_s2 }
  0x29   :  { %p6903_p4 = pnand %p6901_p3, %p6898_p2 }
  0x2b   :  { %6906 = shalt.err (!%p6903_p4)
}
  0x2c   :  { %s6907_s29 = scalar_lea.vmem %s44_s21, 4096  ;;  %p6912_p6 = scmp.lt.s32.totalorder %s44_s21, %s44_s21 }
  0x2d   :  { %p6908_p5 = scmp.ne.s32.totalorder %s44_s21, %s6907_s29  ;;  %p6913_p7 = scmp.lt.s32.totalorder %s6907_s29, %s6907_s29 }
  0x2f   :  { %p6914_p8 = por %p6913_p7, %p6912_p6 }
  0x31   :  { %p6915_p9 = pnand %p6914_p8, %p6908_p5 }
  0x33   :  { %6918 = shalt.err (!%p6915_p9)
}
  0x34   :  { %s6978_s0 = smov 256   ;;  %s6979_s30 = smov 16  }
  0x35   :  { %49 = dma.hbm_to_vmem [thread:$0]  %s8630_s2, 4096, %s44_s21, [#allocation8], %s6978_s0, %s6978_s0, %s6979_s30  }
  0x36   :  { %s6980_s8 = smov [#allocation10]   ;;  %s6919_s12 = scalar_lea.hbm %s8631_s3, 2048 }
  0x37   :  { %s55_s9 = sshll.u32 %s6980_s8, 4  ;;  %p6920_p10 = scmp.ne.s32.totalorder %s8631_s3, %s6919_s12  ;;  %s56_s9 = int_to_ptr.vmem [resolvable:$true] %s55_s9 }
  0x38   :  { %p6923_p11 = scmp.lt.u32.totalorder %s6919_s12, %s8631_s3 }
  0x3a   :  { %p6925_p12 = pnand %p6923_p11, %p6920_p10 }
  0x3c   :  { %6928 = shalt.err (!%p6925_p12)
}
  0x3d   :  { %s6929_s18 = scalar_lea.vmem %s56_s9, 2048  ;;  %p6934_p0 = scmp.lt.s32.totalorder %s56_s9, %s56_s9 }
  0x3e   :  { %p6930_p13 = scmp.ne.s32.totalorder %s56_s9, %s6929_s18  ;;  %p6935_p1 = scmp.lt.s32.totalorder %s6929_s18, %s6929_s18 }
  0x40   :  { %p6936_p2 = por %p6935_p1, %p6934_p0 }
  0x42   :  { %p6937_p3 = pnand %p6936_p2, %p6930_p13 }
  0x44   :  { %6940 = shalt.err (!%p6937_p3)
}
  0x45   :  { %61 = dma.hbm_to_vmem [thread:$0]  %s8631_s3, 2048, %s56_s9, [#allocation11], %s6975_s1, %s6975_s1, %s6976_s17  }
  0x46   :  { %6963 = dma.done.wait [#allocation5], 1024  }
  0x47   :  { %6964 = vsyncadd [#allocation5], 4294966272 }
  0x48   :  { %6965 = dma.done.wait [#allocation8], 10240  }
  0x49   :  { %6966 = vsyncadd [#allocation8], 4294957056 }
  0x4a   :  { %6967 = dma.done.wait [#allocation11], 2048  }
  0x4b   :  { %6968 = vsyncadd [#allocation11], 4294965248  ;;  %v6981_v0 = vmov 0.0   ;;  %v90_v1 = vld [vmem:[#allocation7 + $0x8] sm:$0xff]  ;;  %v93_v2 = vld [vmem:[#allocation7 + $0x20] sm:$0xff]  ;;  %vm6983_vm0 = vmmov 0  }
  0x4c   :  { %218 = vmatprep.mubr.f32.mxu0 %v6981_v0  ;;  %v91_v3 = vld [vmem:[#allocation7 + $0x10] sm:$0xff]  ;;  %v5942_v4 = vpack.c.bf16 %v93_v2, %v90_v1  ;;  %v94_v5 = vld [vmem:[#allocation7 + $0x28] sm:$0xff]  ;;  %v89_v6 = vld [vmem:[#allocation7] sm:$0xff] }
  0x4d   :  { %v92_v7 = vld [vmem:[#allocation7 + $0x18] sm:$0xff]  ;;  %v5974_v8 = vpack.c.bf16 %v94_v5, %v91_v3  ;;  %v99_v11 = vld [vmem:[#allocation7 + $0x50] sm:$0xff]  ;;  %v97_v12 = vld [vmem:[#allocation7 + $0x40] sm:$0xff] }
  0x4e   :  { %v5944_v9 = vpack.c.bf16 %v92_v7, %v89_v6  ;;  %v96_v10 = vld [vmem:[#allocation7 + $0x38] sm:$0xff]  ;;  %5943 = vmatprep.subr.bf16.mxu0 %v5942_v4  ;;  %v95_v15 = vld [vmem:[#allocation7 + $0x30] sm:$0xff]  ;;  %v98_v16 = vld [vmem:[#allocation7 + $0x48] sm:$0xff] }
  0x4f   :  { %v5946_v13 = vpack.c.bf16 %v99_v11, %v96_v10  ;;  %v100_v14 = vld [vmem:[#allocation7 + $0x58] sm:$0xff]  ;;  %5975 = vmatprep.subr.bf16.mxu1 %v5974_v8  ;;  %v5948_v18 = vpack.c.bf16 %v98_v16, %v95_v15  ;;  %v102_v19 = vld [vmem:[#allocation7 + $0x68] sm:$0xff]  ;;  %v105_v20 = vld [vmem:[#allocation7 + $0x80] sm:$0xff] }
  0x50   :  { %5945 = vmatpush1.bf16.msra.mxu0 %v5944_v9  ;;  %v5978_v17 = vpack.c.bf16 %v100_v14, %v97_v12  ;;  %v103_v21 = vld [vmem:[#allocation7 + $0x70] sm:$0xff]  ;;  %5977 = vmatpush3.bf16.msra.mxu1 %v5974_v8  ;;  %v5950_v22 = vpack.c.bf16 %v105_v20, %v102_v19  ;;  %v106_v23 = vld [vmem:[#allocation7 + $0x88] sm:$0xff]  ;;  %v101_v24 = vld [vmem:[#allocation7 + $0x60] sm:$0xff] }
  0x51   :  { %5947 = vmatprep.subr.bf16.mxu0 %v5946_v13  ;;  %v104_v25 = vld [vmem:[#allocation7 + $0x78] sm:$0xff]  ;;  %v5982_v26 = vpack.c.bf16 %v106_v23, %v103_v21  ;;  %v111_v28 = vld [vmem:[#allocation7 + $0xb0] sm:$0xff]  ;;  %v109_v29 = vld [vmem:[#allocation7 + $0xa0] sm:$0xff] }
  0x52   :  { %5979 = vmatprep.subr.bf16.mxu1 %v5978_v17  ;;  %v108_v27 = vld [vmem:[#allocation7 + $0x98] sm:$0xff]  ;;  %v5952_v31 = vpack.c.bf16 %v104_v25, %v101_v24  ;;  %v107_v33 = vld [vmem:[#allocation7 + $0x90] sm:$0xff]  ;;  %v110_v34 = vld [vmem:[#allocation7 + $0xa8] sm:$0xff] }
  0x53   :  { %v112_v30 = vld [vmem:[#allocation7 + $0xb8] sm:$0xff]  ;;  %v5954_v32 = vpack.c.bf16 %v111_v28, %v108_v27  ;;  %v114_v36 = vld [vmem:[#allocation7 + $0xc8] sm:$0xff]  ;;  %v117_v37 = vld [vmem:[#allocation7 + $0xe0] sm:$0xff]  ;;  %v5956_v40 = vpack.c.bf16 %v110_v34, %v107_v33 }
  0x54   :  { %5949 = vmatpush1.bf16.msra.mxu0 %v5948_v18  ;;  %5981 = vmatpush3.bf16.msra.mxu1 %v5978_v17  ;;  %v5986_v35 = vpack.c.bf16 %v112_v30, %v109_v29  ;;  %v115_v38 = vld [vmem:[#allocation7 + $0xd0] sm:$0xff]  ;;  %v118_v39 = vld [vmem:[#allocation7 + $0xe8] sm:$0xff]  ;;  %v5958_v41 = vpack.c.bf16 %v117_v37, %v114_v36  ;;  %v113_v42 = vld [vmem:[#allocation7 + $0xc0] sm:$0xff] }
  0x55   :  { %5951 = vmatprep.subr.bf16.mxu0 %v5950_v22  ;;  %5983 = vmatprep.subr.bf16.mxu1 %v5982_v26  ;;  %v116_v43 = vld [vmem:[#allocation7 + $0xd8] sm:$0xff]  ;;  %v5990_v44 = vpack.c.bf16 %v118_v39, %v115_v38  ;;  %v123_v46 = vld [vmem:[#allocation7 + $0x110] sm:$0xff]  ;;  %v121_v47 = vld [vmem:[#allocation7 + $0x100] sm:$0xff] }
  0x56   :  { %v120_v45 = vld [vmem:[#allocation7 + $0xf8] sm:$0xff]  ;;  %v5960_v49 = vpack.c.bf16 %v116_v43, %v113_v42  ;;  %v81_v50 = vld [vmem:[#allocation4] sm:$0xff]  ;;  %v119_v52 = vld [vmem:[#allocation7 + $0xf0] sm:$0xff] }
  0x57   :  { %v124_v48 = vld [vmem:[#allocation7 + $0x118] sm:$0xff]  ;;  %v5962_v51 = vpack.c.bf16 %v123_v46, %v120_v45  ;;  %v122_v53 = vld [vmem:[#allocation7 + $0x108] sm:$0xff]  ;;  %v129_v56 = vld [vmem:[#allocation7 + $0x140] sm:$0xff]  ;;  %5650 = vmatprep.mubr.f32.mxu1 %v81_v50 }
  0x58   :  { %5953 = vmatpush1.bf16.msra.mxu0 %v5952_v31  ;;  %5985 = vmatpush3.bf16.msra.mxu1 %v5982_v26  ;;  %v5994_v54 = vpack.c.bf16 %v124_v48, %v121_v47  ;;  %v126_v55 = vld [vmem:[#allocation7 + $0x128] sm:$0xff]  ;;  %v127_v57 = vld [vmem:[#allocation7 + $0x130] sm:$0xff]  ;;  %v5964_v59 = vpack.c.bf16 %v122_v53, %v119_v52  ;;  %v125_v61 = vld [vmem:[#allocation7 + $0x120] sm:$0xff] }
  0x59   :  { %5955 = vmatprep.subr.bf16.mxu0 %v5954_v32  ;;  %5987 = vmatprep.subr.bf16.mxu1 %v5986_v35  ;;  %v130_v58 = vld [vmem:[#allocation7 + $0x148] sm:$0xff]  ;;  %v5966_v60 = vpack.c.bf16 %v129_v56, %v126_v55  ;;  %v128_v62 = vld [vmem:[#allocation7 + $0x138] sm:$0xff]  ;;  %v135_v2 = vld [vmem:[#allocation7 + $0x170] sm:$0xff] }
  0x5a   :  { %v5998_v63 = vpack.c.bf16 %v130_v58, %v127_v57  ;;  %v132_v1 = vld [vmem:[#allocation7 + $0x158] sm:$0xff]  ;;  %v133_v3 = vld [vmem:[#allocation7 + $0x160] sm:$0xff]  ;;  %v5968_v5 = vpack.c.bf16 %v128_v62, %v125_v61  ;;  %v131_v7 = vld [vmem:[#allocation7 + $0x150] sm:$0xff] }
  0x5b   :  { %v136_v4 = vld [vmem:[#allocation7 + $0x178] sm:$0xff]  ;;  %v5970_v6 = vpack.c.bf16 %v135_v2, %v132_v1  ;;  %v134_v8 = vld [vmem:[#allocation7 + $0x168] sm:$0xff]  ;;  %v412_v14 = vld [vmem:[#allocation9] sm:$0xff] }
  0x5c   :  { %5957 = vmatpush1.bf16.msra.mxu0 %v5956_v40  ;;  %5989 = vmatpush3.bf16.msra.mxu1 %v5986_v35  ;;  %v6002_v9 = vpack.c.bf16 %v136_v4, %v133_v3  ;;  %v413_v10 = vld [vmem:[#allocation9 + $0x8] sm:$0xff]  ;;  %v415_v11 = vld [vmem:[#allocation9 + $0x18] sm:$0xff]  ;;  %v5972_v12 = vpack.c.bf16 %v134_v8, %v131_v7  ;;  %v414_v15 = vld [vmem:[#allocation9 + $0x10] sm:$0xff] }
  0x5d   :  { %5959 = vmatprep.subr.bf16.mxu0 %v5958_v41  ;;  %5991 = vmatprep.subr.bf16.mxu1 %v5990_v44  ;;  %v7071_v13 = vpack.c.bf16 %v415_v11, %v413_v10  ;;  %v417_v16 = vld [vmem:[#allocation9 + $0x28] sm:$0xff]  ;;  %v419_v17 = vld [vmem:[#allocation9 + $0x38] sm:$0xff]  ;;  %v7073_v18 = vpack.c.bf16 %v414_v15, %v412_v14  ;;  %v416_v21 = vld [vmem:[#allocation9 + $0x20] sm:$0xff] }
  0x5e   :  { %v82_v19 = vld [vmem:[#allocation4 + $0x8] sm:$0xff]  ;;  %v7076_v20 = vpack.c.bf16 %v419_v17, %v417_v16  ;;  %v418_v22 = vld [vmem:[#allocation9 + $0x30] sm:$0xff]  ;;  %v423_v24 = vld [vmem:[#allocation9 + $0x58] sm:$0xff] }
  0x5f   :  { %v421_v23 = vld [vmem:[#allocation9 + $0x48] sm:$0xff]  ;;  %v83_v25 = vld [vmem:[#allocation4 + $0x10] sm:$0xff]  ;;  %v7079_v26 = vpack.c.bf16 %v418_v22, %v416_v21  ;;  %v420_v28 = vld [vmem:[#allocation9 + $0x40] sm:$0xff] }
  0x60   :  { %5961 = vmatpush1.bf16.msra.mxu0 %v5960_v49  ;;  %5993 = vmatpush3.bf16.msra.mxu1 %v5990_v44  ;;  %v7083_v27 = vpack.c.bf16 %v423_v24, %v421_v23  ;;  %v422_v29 = vld [vmem:[#allocation9 + $0x50] sm:$0xff]  ;;  %v84_v30 = vld [vmem:[#allocation4 + $0x18] sm:$0xff]  ;;  %v425_v31 = vld [vmem:[#allocation9 + $0x68] sm:$0xff] }
  0x61   :  { %5963 = vmatprep.subr.bf16.mxu0 %v5962_v51  ;;  %5995 = vmatprep.subr.bf16.mxu1 %v5994_v54  ;;  %v427_v32 = vld [vmem:[#allocation9 + $0x78] sm:$0xff]  ;;  %v85_v33 = vld [vmem:[#allocation4 + $0x20] sm:$0xff]  ;;  %v7087_v34 = vpack.c.bf16 %v422_v29, %v420_v28  ;;  %v426_v37 = vld [vmem:[#allocation9 + $0x70] sm:$0xff]  ;;  %v139_v28 = vlaneseq }
  0x62   :  { %v7090_v35 = vpack.c.bf16 %v427_v32, %v425_v31  ;;  %v424_v36 = vld [vmem:[#allocation9 + $0x60] sm:$0xff]  ;;  %v86_v38 = vld [vmem:[#allocation4 + $0x28] sm:$0xff]  ;;  %v431_v40 = vld [vmem:[#allocation9 + $0x98] sm:$0xff] }
  0x63   :  { %v429_v39 = vld [vmem:[#allocation9 + $0x88] sm:$0xff]  ;;  %v87_v41 = vld [vmem:[#allocation4 + $0x30] sm:$0xff]  ;;  %v6020_v42 = vpack.c.bf16 %v426_v37, %v424_v36  ;;  %v428_v44 = vld [vmem:[#allocation9 + $0x80] sm:$0xff]  ;;  %v7144_v29 = vshrl.u32 %v139_v28, 7 }
  0x64   :  { %5965 = vmatpush1.bf16.msra.mxu0 %v5964_v59  ;;  %5997 = vmatpush3.bf16.msra.mxu1 %v5994_v54  ;;  %v6022_v43 = vpack.c.bf16 %v431_v40, %v429_v39  ;;  %v430_v45 = vld [vmem:[#allocation9 + $0x90] sm:$0xff]  ;;  %v433_v46 = vld [vmem:[#allocation9 + $0xa8] sm:$0xff]  ;;  %v435_v47 = vld [vmem:[#allocation9 + $0xb8] sm:$0xff] }
  0x65   :  { %5967 = vmatprep.subr.bf16.mxu0 %v5966_v60  ;;  %5999 = vmatprep.subr.bf16.mxu1 %v5998_v63  ;;  %v88_v48 = vld [vmem:[#allocation4 + $0x38] sm:$0xff]  ;;  %v6024_v49 = vpack.c.bf16 %v430_v45, %v428_v44  ;;  %v432_v51 = vld [vmem:[#allocation9 + $0xa0] sm:$0xff]  ;;  %v434_v52 = vld [vmem:[#allocation9 + $0xb0] sm:$0xff]  ;;  %v145_v32 = vsub.s32 1, %v7144_v29 }
  0x66   :  { %v437_v53 = vld [vmem:[#allocation9 + $0xc8] sm:$0xff]  ;;  %v439_v54 = vld [vmem:[#allocation9 + $0xd8] sm:$0xff]  ;;  %v6028_v55 = vpack.c.bf16 %v434_v52, %v432_v51  ;;  %v436_v57 = vld [vmem:[#allocation9 + $0xc0] sm:$0xff] }
  0x67   :  { %v6030_v56 = vpack.c.bf16 %v439_v54, %v437_v53  ;;  %v438_v58 = vld [vmem:[#allocation9 + $0xd0] sm:$0xff]  ;;  %v441_v59 = vld [vmem:[#allocation9 + $0xe8] sm:$0xff]  ;;  %v443_v60 = vld [vmem:[#allocation9 + $0xf8] sm:$0xff] }
  0x68   :  { %5969 = vmatpush1.bf16.msra.mxu0 %v5968_v5  ;;  %6001 = vmatpush3.bf16.msra.mxu1 %v5998_v63  ;;  %v6032_v61 = vpack.c.bf16 %v438_v58, %v436_v57  ;;  %v6034_v62 = vpack.c.bf16 %v443_v60, %v441_v59  ;;  %v440_v63 = vld [vmem:[#allocation9 + $0xe0] sm:$0xff]  ;;  %v442_v1 = vld [vmem:[#allocation9 + $0xf0] sm:$0xff]  ;;  %v738_v4 = vld [vmem:[#allocation10 + $0x8] sm:$0xff] }
  0x69   :  { %5971 = vmatprep.subr.bf16.mxu0 %v5970_v6  ;;  %6003 = vmatprep.subr.bf16.mxu1 %v6002_v9  ;;  %v6036_v2 = vpack.c.bf16 %v442_v1, %v440_v63  ;;  %v737_v3 = vld [vmem:[#allocation10] sm:$0xff]  ;;  %v6982_v6 = vmov 0.0|0.0   ;;  %v739_v7 = vld [vmem:[#allocation10 + $0x10] sm:$0xff]  ;;  %v740_v8 = vld [vmem:[#allocation10 + $0x18] sm:$0xff] }
  0x6a   :  { %v7109_v5 = vpack.c.bf16 %v738_v4, %v737_v3  ;;  %v741_v10 = vld [vmem:[#allocation10 + $0x20] sm:$0xff]  ;;  %v742_v11 = vld [vmem:[#allocation10 + $0x28] sm:$0xff]  ;;  %v744_v14 = vld [vmem:[#allocation10 + $0x38] sm:$0xff] }
  0x6b   :  { %v745_v16 = vld [vmem:[#allocation10 + $0x40] sm:$0xff]  ;;  %v746_v17 = vld [vmem:[#allocation10 + $0x48] sm:$0xff] }
  0x6c   :  { %5973 = vmatpush1.bf16.msra.mxu0 %v5972_v12  ;;  %6005 = vmatpush3.bf16.msra.mxu1 %v6002_v9  ;;  %v7114_v9 = vpack.c.bf16 %v740_v8, %v739_v7  ;;  %v7118_v12 = vpack.c.bf16 %v742_v11, %v741_v10  ;;  %v749_v22 = vld [vmem:[#allocation10 + $0x60] sm:$0xff]  ;;  %v750_v23 = vld [vmem:[#allocation10 + $0x68] sm:$0xff] }
  0x6d   :  { %6007 = vmatprep.subr.bf16.mxu0 %v7071_v13  ;;  %6038 = vmatprep.subr.bf16.mxu1 %v6982_v6  ;;  %v7135_v24 = vpack.c.bf16 %v750_v23, %v749_v22  ;;  %v137_v31 = vld [vmem:[%s8632_s4] sm:$0x7]  ;;  %s6985_s4 = smov [#allocation12]  }
  0x6e   :  { %s5444_s21 = sshll.u32 %s6985_s4, 4  ;;  %s5445_s21 = int_to_ptr.vmem [resolvable:$true] %s5444_s21 }
  0x6f   :  { %219 = vmatmul.mubr.f32.vlgmr.msra.gmra.mrb[0].mxu0 %v81_v50  ;;  %5651 = vmatmul.mubr.f32.vlgmr.msra.gmra.mrb[0].mxu1 %v82_v19  ;;  %v6026_v50 = vpack.c.bf16 %v435_v47, %v433_v46  ;;  %s6941_s22 = scalar_lea.vmem %s5445_s21, 1024  ;;  %p6946_p5 = scmp.lt.s32.totalorder %s5445_s21, %s5445_s21 }
  0x70   :  { %6009 = vmatpush1.bf16.msra.mxu0 %v7073_v18  ;;  %224 = vmatprep.mubr.f32.mxu0 %v6981_v0  ;;  %p6942_p4 = scmp.ne.s32.totalorder %s5445_s21, %s6941_s22  ;;  %p6947_p6 = scmp.lt.s32.totalorder %s6941_s22, %s6941_s22 }
  0x71   :  { %6011 = vmatprep.subr.bf16.mxu0 %v7076_v20  ;;  %5653 = vmatprep.mubr.f32.mxu1 %v83_v25 }
  0x72   :  { %6040 = vmatpush3.bf16.msra.mxu1 %v7109_v5  ;;  %p6948_p7 = por %p6947_p6, %p6946_p5 }
  0x73   :  { %225 = vmatmul.mubr.f32.gmra.mrb[2].mxu0 %v82_v19  ;;  %5654 = vmatmul.mubr.f32.gmra.mrb[2].mxu1 %v84_v30  ;;  %v747_v19 = vld [vmem:[#allocation10 + $0x50] sm:$0xff] }
  0x74   :  { %6013 = vmatpush1.bf16.msra.mxu0 %v7079_v26  ;;  %230 = vmatprep.mubr.f32.mxu0 %v6981_v0  ;;  %p6949_p8 = pnand %p6948_p7, %p6942_p4 }
  0x75   :  { %6015 = vmatprep.subr.bf16.mxu0 %v7083_v27  ;;  %5656 = vmatprep.mubr.f32.mxu1 %v85_v33 }
  0x76   :  { %6041 = vmatprep.subr.bf16.mxu1 %v6982_v6 }
  0x77   :  { %231 = vmatmul.mubr.f32.gmra.mrb[4].mxu0 %v83_v25  ;;  %5657 = vmatmul.mubr.f32.gmra.mrb[4].mxu1 %v86_v38  ;;  %v751_v25 = vld [vmem:[#allocation10 + $0x70] sm:$0xff] }
  0x78   :  { %6017 = vmatpush1.bf16.msra.mxu0 %v7087_v34  ;;  %236 = vmatprep.mubr.f32.mxu0 %v6981_v0 }
  0x79   :  { %6019 = vmatprep.subr.bf16.mxu0 %v7090_v35  ;;  %5659 = vmatprep.mubr.f32.mxu1 %v87_v41 }
  0x7a   :  { %6043 = vmatpush3.bf16.msra.mxu1 %v7114_v9 }
  0x7b   :  { %237 = vmatmul.mubr.f32.gmra.mrb[6].mxu0 %v84_v30  ;;  %5660 = vmatmul.mubr.f32.gmra.mrb[6].mxu1 %v88_v48  ;;  %v141_v30 = vsub.s32 0, %v7144_v29 }
  0x7c   :  { %6021 = vmatpush1.bf16.msra.mxu0 %v6020_v42  ;;  %242 = vmatprep.mubr.f32.mxu0 %v6981_v0 }
  0x7d   :  { %6023 = vmatprep.subr.bf16.mxu0 %v6022_v43  ;;  %6044 = vmatprep.subr.bf16.mxu1 %v6982_v6 }
  0x7e   :  { %6046 = vmatpush3.bf16.msra.mxu1 %v7118_v12  ;;  %5694 = vmatprep.mubr.msk.f32.mxu1 %vm6983_vm0, %v6981_v0 }
  0x7f   :  { %243 = vmatmul.mubr.f32.gmra.mrb[8].mxu0 %v85_v33  ;;  %6047 = vmatprep.subr.bf16.mxu1 %v6982_v6  ;;  %v149_v33 = vsub.s32 2, %v7144_v29 }
  0x80   :  { %6025 = vmatpush1.bf16.msra.mxu0 %v6024_v49  ;;  %248 = vmatprep.mubr.f32.mxu0 %v6981_v0 }
  0x81   :  { %6027 = vmatprep.subr.bf16.mxu0 %v6026_v50  ;;  %v150_v36 = vrot.slane %v137_v31, %v149_v33 }
  0x83   :  { %249 = vmatmul.mubr.f32.gmra.mrb[10].mxu0 %v86_v38 }
  0x84   :  { %6029 = vmatpush1.bf16.msra.mxu0 %v6028_v55  ;;  %254 = vmatprep.mubr.f32.mxu0 %v6981_v0 }
  0x85   :  { %6031 = vmatprep.subr.bf16.mxu0 %v6030_v56 }
  0x87   :  { %255 = vmatmul.mubr.f32.gmra.mrb[12].mxu0 %v87_v41 }
  0x88   :  { %6033 = vmatpush1.bf16.msra.mxu0 %v6032_v61  ;;  %260 = vmatprep.mubr.f32.mxu0 %v6981_v0 }
  0x89   :  { %6035 = vmatprep.subr.bf16.mxu0 %v6034_v62 }
  0x8b   :  { %261 = vmatmul.mubr.f32.gmra.mrb[14].mxu0 %v88_v48 }
  0x8c   :  { %6037 = vmatpush1.bf16.msra.mxu0 %v6036_v2  ;;  %508 = vmatprep.mubr.f32.mxu0 %v6981_v0 }
  0x8d   :  { %6063 = vmatprep.subr.bf16.mxu0 %v7071_v13  ;;  %v743_v13 = vld [vmem:[#allocation10 + $0x30] sm:$0xff] }
  0x8e   :  { %v7122_v15 = vpack.c.bf16 %v744_v14, %v743_v13 }
  0x8f   :  { %509 = vmatmul.mubr.f32.vlgmr.msra.gmra.mrb[16].mxu0 %v6981_v0 }
  0x90   :  { %6065 = vmatpush1.bf16.msra.mxu0 %v7073_v18  ;;  %1189 = vmatprep.mubr.f32.mxu0 %v6981_v0  ;;  %v7126_v18 = vpack.c.bf16 %v746_v17, %v745_v16 }
  0x91   :  { %6067 = vmatprep.subr.bf16.mxu0 %v7076_v20  ;;  %6049 = vmatpush3.bf16.msra.mxu1 %v7122_v15  ;;  %v748_v20 = vld [vmem:[#allocation10 + $0x58] sm:$0xff] }
  0x92   :  { %6050 = vmatprep.subr.bf16.mxu1 %v6982_v6  ;;  %v7130_v21 = vpack.c.bf16 %v748_v20, %v747_v19  ;;  %v6984_v20 = vmov 1966171168  }
  0x93   :  { %v520_v22 = vunpack.c.l.s4 %v6984_v20  ;;  %v672_v20 = vcombine.high %v6981_v0, %v6981_v0 }
  0x94   :  { %6069 = vmatpush1.bf16.msra.mxu0 %v7079_v26  ;;  %v752_v26 = vld [vmem:[#allocation10 + $0x78] sm:$0xff] }
  0x95   :  { %6071 = vmatprep.subr.bf16.mxu0 %v7083_v27  ;;  %6052 = vmatpush3.bf16.msra.mxu1 %v7126_v18  ;;  %v7139_v27 = vpack.c.bf16 %v752_v26, %v751_v25 }
  0x96   :  { %6053 = vmatprep.subr.bf16.mxu1 %v6982_v6 }
  0x98   :  { %6073 = vmatpush1.bf16.msra.mxu0 %v7087_v34  ;;  %v7152_v34 = vrot.slane %v137_v31, %v141_v30  ;;  %v521_v30 = vunpack.c.0.s8 %v520_v22 }
  0x99   :  { %6075 = vmatprep.subr.bf16.mxu0 %v7090_v35  ;;  %6055 = vmatpush3.bf16.msra.mxu1 %v7130_v21  ;;  %v7154_v35 = vrot.slane %v137_v31, %v145_v32 }
  0x9a   :  { %6056 = vmatprep.subr.bf16.mxu1 %v6982_v6 }
  0x9c   :  { %6077 = vmatpush1.bf16.msra.mxu0 %v6020_v42 }
  0x9d   :  { %6079 = vmatprep.subr.bf16.mxu0 %v6022_v43  ;;  %6058 = vmatpush3.bf16.msra.mxu1 %v7135_v24 }
  0x9e   :  { %6059 = vmatprep.subr.bf16.mxu1 %v6982_v6 }
  0xa0   :  { %6081 = vmatpush1.bf16.msra.mxu0 %v6024_v49 }
  0xa1   :  { %6083 = vmatprep.subr.bf16.mxu0 %v6026_v50  ;;  %6061 = vmatpush3.bf16.msra.mxu1 %v7139_v27 }
  0xa2   :  { %6094 = vmatprep.subr.bf16.mxu1 %v6982_v6 }
  0xa4   :  { %6085 = vmatpush1.bf16.msra.mxu0 %v6028_v55 }
  0xa5   :  { %6087 = vmatprep.subr.bf16.mxu0 %v6030_v56 }
  0xa8   :  { %6089 = vmatpush1.bf16.msra.mxu0 %v6032_v61 }
  0xa9   :  { %6091 = vmatprep.subr.bf16.mxu0 %v6034_v62 }
  0xac   :  { %6093 = vmatpush1.bf16.msra.mxu0 %v6036_v2 }
 0x142   :  { %v220_v37 = vpop.f32.mrb[0].mxu0  ;;  %v5652_v39 = vpop.f32.mrb[0].mxu1 }
 0x143   :  { %v221_v38 = vadd.f32 %v220_v37, %v7152_v34  ;;  %v222_v40 = vpop.f32.mrb[1].mxu0  ;;  %v339_v41 = vadd.f32 %v5652_v39, %v150_v36  ;;  %v333_v43 = vpop.f32.mrb[1].mxu1  ;;  %v7173_v37 = vsub.s32 %v521_v30, %v7144_v29 }
 0x144   :  { %v223_v42 = vadd.f32 %v222_v40, %v7154_v35  ;;  %v334_v44 = vadd.f32 %v333_v43, %v150_v36 }
 0x145   :  { %372 = vst [vmem:[#allocation3] sm:$0xff] %v221_v38  ;;  %377 = vst [vmem:[#allocation3 + $0x28] sm:$0xff] %v339_v41  ;;  %v679_v22 = vrot.slane %v6981_v0, %v7173_v37 }
 0x146   :  { %373 = vst [vmem:[#allocation3 + $0x8] sm:$0xff] %v223_v42  ;;  %v226_v45 = vpop.f32.mrb[2].mxu0  ;;  %374 = vst [vmem:[#allocation3 + $0x10] sm:$0xff] %v334_v44  ;;  %v5655_v49 = vpop.f32.mrb[2].mxu1 }
 0x147   :  { %v227_v46 = vadd.f32 %v226_v45, %v7152_v34  ;;  %v228_v47 = vpop.f32.mrb[3].mxu0  ;;  %v349_v50 = vadd.f32 %v5655_v49, %v150_v36  ;;  %v343_v51 = vpop.f32.mrb[3].mxu1 }
 0x148   :  { %v229_v48 = vadd.f32 %v228_v47, %v7154_v35  ;;  %v344_v53 = vadd.f32 %v343_v51, %v150_v36 }
 0x149   :  { %375 = vst [vmem:[#allocation3 + $0x18] sm:$0xff] %v227_v46  ;;  %383 = vst [vmem:[#allocation3 + $0x58] sm:$0xff] %v349_v50 }
 0x14a   :  { %376 = vst [vmem:[#allocation3 + $0x20] sm:$0xff] %v229_v48  ;;  %v232_v52 = vpop.f32.mrb[4].mxu0  ;;  %380 = vst [vmem:[#allocation3 + $0x40] sm:$0xff] %v344_v53  ;;  %v5658_v57 = vpop.f32.mrb[4].mxu1 }
 0x14b   :  { %v233_v54 = vadd.f32 %v232_v52, %v7152_v34  ;;  %v234_v55 = vpop.f32.mrb[5].mxu0  ;;  %v359_v58 = vadd.f32 %v5658_v57, %v150_v36  ;;  %v353_v59 = vpop.f32.mrb[5].mxu1 }
 0x14c   :  { %v235_v56 = vadd.f32 %v234_v55, %v7154_v35  ;;  %v354_v61 = vadd.f32 %v353_v59, %v150_v36 }
 0x14d   :  { %378 = vst [vmem:[#allocation3 + $0x30] sm:$0xff] %v233_v54  ;;  %389 = vst [vmem:[#allocation3 + $0x88] sm:$0xff] %v359_v58 }
 0x14e   :  { %379 = vst [vmem:[#allocation3 + $0x38] sm:$0xff] %v235_v56  ;;  %v238_v60 = vpop.f32.mrb[6].mxu0  ;;  %386 = vst [vmem:[#allocation3 + $0x70] sm:$0xff] %v354_v61  ;;  %v5661_v2 = vpop.f32.mrb[6].mxu1 }
 0x14f   :  { %v239_v62 = vadd.f32 %v238_v60, %v7152_v34  ;;  %v240_v63 = vpop.f32.mrb[7].mxu0  ;;  %v369_v3 = vadd.f32 %v5661_v2, %v150_v36  ;;  %v363_v4 = vpop.f32.mrb[7].mxu1 }
 0x150   :  { %v241_v1 = vadd.f32 %v240_v63, %v7154_v35  ;;  %v364_v8 = vadd.f32 %v363_v4, %v150_v36 }
 0x151   :  { %381 = vst [vmem:[#allocation3 + $0x48] sm:$0xff] %v239_v62  ;;  %395 = vst [vmem:[#allocation3 + $0xb8] sm:$0xff] %v369_v3  ;;  %v7183_v50 = vld [vmem:[#allocation3 + $0x18] ss:$8 sm:$0x7] }
 0x152   :  { %382 = vst [vmem:[#allocation3 + $0x50] sm:$0xff] %v241_v1  ;;  %v244_v7 = vpop.f32.mrb[8].mxu0  ;;  %392 = vst [vmem:[#allocation3 + $0xa0] sm:$0xff] %v364_v8 }
 0x153   :  { %v245_v10 = vadd.f32 %v244_v7, %v7152_v34  ;;  %v246_v11 = vpop.f32.mrb[9].mxu0 }
 0x154   :  { %v247_v13 = vadd.f32 %v246_v11, %v7154_v35 }
 0x155   :  { %384 = vst [vmem:[#allocation3 + $0x60] sm:$0xff] %v245_v10  ;;  %v7185_v51 = vld [vmem:[#allocation3 + $0x30] ss:$8 sm:$0x7] }
 0x156   :  { %385 = vst [vmem:[#allocation3 + $0x68] sm:$0xff] %v247_v13  ;;  %v250_v14 = vpop.f32.mrb[10].mxu0 }
 0x157   :  { %v251_v16 = vadd.f32 %v250_v14, %v7152_v34  ;;  %v252_v17 = vpop.f32.mrb[11].mxu0 }
 0x158   :  { %v253_v19 = vadd.f32 %v252_v17, %v7154_v35 }
 0x159   :  { %387 = vst [vmem:[#allocation3 + $0x78] sm:$0xff] %v251_v16  ;;  %v7196_v58 = vld [vmem:[#allocation3 + $0x48] ss:$8 sm:$0x7] }
 0x15a   :  { %388 = vst [vmem:[#allocation3 + $0x80] sm:$0xff] %v253_v19  ;;  %v256_v23 = vpop.f32.mrb[12].mxu0 }
 0x15b   :  { %v257_v25 = vadd.f32 %v256_v23, %v7152_v34  ;;  %v258_v26 = vpop.f32.mrb[13].mxu0 }
 0x15c   :  { %v259_v28 = vadd.f32 %v258_v26, %v7154_v35 }
 0x15d   :  { %390 = vst [vmem:[#allocation3 + $0x90] sm:$0xff] %v257_v25  ;;  %v7201_v61 = vld [vmem:[#allocation3 + $0x60] ss:$8 sm:$0x7] }
 0x15e   :  { %391 = vst [vmem:[#allocation3 + $0x98] sm:$0xff] %v259_v28  ;;  %v262_v31 = vpop.f32.mrb[14].mxu0 }
 0x15f   :  { %v263_v32 = vadd.f32 %v262_v31, %v7152_v34  ;;  %v264_v33 = vpop.f32.mrb[15].mxu0 }
 0x160   :  { %v265_v36 = vadd.f32 %v264_v33, %v7154_v35  ;;  %v7179_v35 = vld [vmem:[#allocation3] ss:$8 sm:$0x7]  ;;  %v686_v33 = vrot.slane %v672_v20, %v7173_v37 }
 0x161   :  { %393 = vst [vmem:[#allocation3 + $0xa8] sm:$0xff] %v263_v32  ;;  %v7205_v2 = vld [vmem:[#allocation3 + $0x78] ss:$8 sm:$0x7] }
 0x162   :  { %394 = vst [vmem:[#allocation3 + $0xb0] sm:$0xff] %v265_v36  ;;  %v510_v38 = vpop.f32.mrb[16].mxu0  ;;  %v687_v36 = vcombine.high %v679_v22, %v679_v22 }
 0x163   :  { %v512_v39 = vpop.f32.mrb[17].mxu0 }
 0x164   :  { %v517_v40 = vcombine.low %v510_v38, %v512_v39  ;;  %v518_v41 = vcombine.high %v510_v38, %v512_v39 }
 0x165   :  { %v7190_v53 = vld [vmem:[#allocation3 + $0x90] ss:$8 sm:$0x7] }
 0x166   :  { %v525_v42 = vrot.slane %v517_v40, %v7173_v37  ;;  %v532_v43 = vrot.slane %v518_v41, %v7173_v37  ;;  %v7223_v41 = vrot.slane %v679_v22, %v7173_v37 }
 0x168   :  { %v533_v44 = vcombine.high %v525_v42, %v525_v42  ;;  %v534_v45 = vcombine.high %v532_v43, %v532_v43  ;;  %v541_v34 = vrot.slane %v525_v42, %v7173_v37  ;;  %v548_v46 = vrot.slane %v532_v43, %v7173_v37 }
 0x169   :  { %v7198_v59 = vld [vmem:[#allocation3 + $0xa8] ss:$8 sm:$0x7]  ;;  %v688_v43 = vcombine.high %v686_v33, %v686_v33 }
 0x16a   :  { %v555_v29 = vrot.slane %v533_v44, %v7173_v37  ;;  %v562_v47 = vrot.slane %v534_v45, %v7173_v37  ;;  %v563_v48 = vcombine.high %v541_v34, %v541_v34  ;;  %v564_v49 = vcombine.high %v548_v46, %v548_v46 }
 0x16b   :  { %v7188_v52 = vadd.f32 %v541_v34, %v7179_v35  ;;  %v7208_v3 = vadd.f32 %v548_v46, %v7201_v61  ;;  %v7226_v44 = vrot.slane %v687_v36, %v7173_v37 }
 0x16c   :  { %v565_v54 = vcombine.high %v555_v29, %v555_v29  ;;  %v566_v55 = vcombine.high %v562_v47, %v562_v47  ;;  %v7193_v56 = vadd.f32 %v555_v29, %v7183_v50  ;;  %v577_v57 = vadd.f32 %v563_v48, %v7185_v51 }
 0x16d   :  { %v581_v60 = vadd.f32 %v564_v49, %v7190_v53  ;;  %v623_v4 = vrot.slane %v7188_v52, 1  ;;  %v7212_v7 = vadd.f32 %v562_v47, %v7205_v2  ;;  %v627_v17 = vrot.slane %v7208_v3, 1 }
 0x16e   :  { %v578_v62 = vadd.f32 %v565_v54, %v7196_v58  ;;  %v582_v63 = vadd.f32 %v566_v55, %v7198_v59  ;;  %v585_v1 = vmul.f32 0.5, %v577_v57  ;;  %v624_v10 = vrot.slane %v7193_v56, 1 }
 0x16f   :  { %v589_v11 = vmul.f32 0.5, %v581_v60  ;;  %v625_v13 = vrot.slane %v577_v57, 1  ;;  %v639_v19 = vmul.f32 0.5, %v623_v4  ;;  %v628_v23 = vrot.slane %v7212_v7, 1 }
 0x170   :  { %v586_v8 = vmul.f32 0.5, %v578_v62  ;;  %6469 = vtanh.f32 %v585_v1  ;;  %v590_v14 = vmul.f32 0.5, %v582_v63  ;;  %v626_v16 = vrot.slane %v578_v62, 1 }
 0x171   :  { %v640_v25 = vmul.f32 0.5, %v624_v10  ;;  %v629_v26 = vrot.slane %v581_v60, 1  ;;  %v641_v28 = vmul.f32 0.5, %v625_v13  ;;  %v630_v30 = vrot.slane %v582_v63, 1 }
 0x172   :  { %6471 = vtanh.f32 %v586_v8  ;;  %v642_v31 = vmul.f32 0.5, %v626_v16  ;;  %v643_v32 = vmul.f32 0.5, %v627_v17  ;;  %v644_v38 = vmul.f32 0.5, %v628_v23 }
 0x173   :  { %6473 = vtanh.f32 %v589_v11  ;;  %v645_v39 = vmul.f32 0.5, %v629_v26  ;;  %v646_v40 = vmul.f32 0.5, %v630_v30  ;;  %v7231_v47 = vrot.slane %v686_v33, %v7173_v37 }
 0x174   :  { %6475 = vtanh.f32 %v590_v14  ;;  %v717_v48 = vcombine.high %v7223_v41, %v7223_v41  ;;  %v7238_v55 = vrot.slane %v688_v43, %v7173_v37  ;;  %v719_v57 = vcombine.high %v7226_v44, %v7226_v44 }
 0x175   :  { %6477 = vtanh.f32 %v639_v19  ;;  %v718_v14 = vcombine.high %v7231_v47, %v7231_v47 }
 0x176   :  { %6479 = vtanh.f32 %v640_v25  ;;  %v720_v22 = vcombine.high %v7238_v55, %v7238_v55 }
 0x177   :  { %6481 = vtanh.f32 %v641_v28 }
 0x178   :  { %6483 = vtanh.f32 %v642_v31 }
 0x179   :  { %6485 = vtanh.f32 %v643_v32 }
 0x17a   :  { %v6470_v42 = vpop.eup %6469  ;;  %6487 = vtanh.f32 %v644_v38 }
 0x17b   :  { %v601_v34 = vadd.f32 1.0, %v6470_v42  ;;  %6489 = vtanh.f32 %v645_v39 }
 0x17c   :  { %v6472_v45 = vpop.eup %6471  ;;  %6491 = vtanh.f32 %v646_v40 }
 0x17d   :  { %v602_v46 = vadd.f32 1.0, %v6472_v45  ;;  %v7228_v29 = vmul.f32 0.5, %v601_v34  ;;  %v6474_v49 = vpop.eup %6473 }
 0x17e   :  { %v6476_v60 = vpop.eup %6475  ;;  %v605_v62 = vadd.f32 1.0, %v6474_v49 }
 0x17f   :  { %v7235_v54 = vmul.f32 0.5, %v602_v46  ;;  %v981_v63 = vsub.f32 1.0, %v7228_v29  ;;  %v6478_v1 = vpop.eup %6477  ;;  %v606_v4 = vadd.f32 1.0, %v6476_v60 }
 0x180   :  { %v6480_v10 = vpop.eup %6479  ;;  %v7244_v11 = vmul.f32 0.5, %v605_v62  ;;  %v655_v13 = vadd.f32 1.0, %v6478_v1 }
 0x181   :  { %v982_v8 = vsub.f32 1.0, %v7235_v54  ;;  %v7248_v16 = vmul.f32 %v981_v63, %v717_v48  ;;  %v6482_v17 = vpop.eup %6481  ;;  %v7250_v19 = vmul.f32 0.5, %v606_v4  ;;  %v656_v20 = vadd.f32 1.0, %v6480_v10 }
 0x182   :  { %v6484_v25 = vpop.eup %6483  ;;  %v657_v26 = vadd.f32 1.0, %v6482_v17  ;;  %v663_v28 = vmul.f32 0.5, %v655_v13  ;;  %v985_v30 = vsub.f32 1.0, %v7244_v11 }
 0x183   :  { %v7254_v23 = vmul.f32 %v982_v8, %v719_v57  ;;  %v6486_v31 = vpop.eup %6485  ;;  %v658_v32 = vadd.f32 1.0, %v6484_v25  ;;  %v664_v33 = vmul.f32 0.5, %v656_v20  ;;  %v986_v36 = vsub.f32 1.0, %v7250_v19 }
 0x184   :  { %v6488_v38 = vpop.eup %6487  ;;  %v659_v39 = vadd.f32 1.0, %v6486_v31  ;;  %v665_v40 = vmul.f32 0.5, %v657_v26  ;;  %v729_v42 = vmul.f32 %v7223_v41, %v663_v28  ;;  %v7259_v43 = vmul.f32 %v985_v30, %v718_v14 }
 0x185   :  { %v6490_v45 = vpop.eup %6489  ;;  %v660_v34 = vadd.f32 1.0, %v6488_v38  ;;  %v666_v46 = vmul.f32 0.5, %v658_v32  ;;  %v730_v49 = vmul.f32 %v7226_v44, %v664_v33  ;;  %v7262_v60 = vmul.f32 %v986_v36, %v720_v22 }
 0x186   :  { %v6492_v62 = vpop.eup %6491  ;;  %v661_v63 = vadd.f32 1.0, %v6490_v45  ;;  %v667_v1 = vmul.f32 0.5, %v659_v39  ;;  %v731_v4 = vmul.f32 %v717_v48, %v665_v40 }
 0x187   :  { %v662_v8 = vadd.f32 1.0, %v6492_v62  ;;  %v668_v10 = vmul.f32 0.5, %v660_v34  ;;  %v732_v13 = vmul.f32 %v719_v57, %v666_v46  ;;  %v761_v17 = vcombine.low %v729_v42, %v730_v49 }
 0x188   :  { %v669_v20 = vmul.f32 0.5, %v661_v63  ;;  %v733_v26 = vmul.f32 %v7231_v47, %v667_v1  ;;  %v891_v62 = vrot.slane %v7185_v51, 2  ;;  %v893_v63 = vrot.slane %v7201_v61, 2 }
 0x189   :  { %v670_v25 = vmul.f32 0.5, %v662_v8  ;;  %v734_v28 = vmul.f32 %v7238_v55, %v668_v10  ;;  %v762_v30 = vcombine.low %v731_v4, %v732_v13  ;;  %v771_v31 = vrot.slane %v761_v17, %v7173_v37 }
 0x18a   :  { %v735_v32 = vmul.f32 %v718_v14, %v669_v20  ;;  %v894_v1 = vrot.slane %v7205_v2, 2  ;;  %v895_v17 = vrot.slane %v7190_v53, 2  ;;  %v896_v20 = vrot.slane %v7198_v59, 2 }
 0x18b   :  { %v736_v33 = vmul.f32 %v720_v22, %v670_v25  ;;  %v763_v36 = vcombine.low %v733_v26, %v734_v28  ;;  %v778_v38 = vrot.slane %v762_v30, %v7173_v37 }
 0x18d   :  { %v764_v39 = vcombine.low %v735_v32, %v736_v33  ;;  %v793_v48 = vcombine.low %v771_v31, %v778_v38  ;;  %v785_v40 = vrot.slane %v763_v36, %v7173_v37 }
 0x18f   :  { %v792_v57 = vrot.slane %v764_v39, %v7173_v37  ;;  %v801_v45 = vrot.slane %v793_v48, %v7173_v37 }
 0x191   :  { %v794_v42 = vcombine.low %v785_v40, %v792_v57 }
 0x193   :  { %v808_v34 = vrot.slane %v794_v42, %v7173_v37 }
 0x195   :  { %v809_v46 = vcombine.low %v801_v45, %v808_v34 }
 0x197   :  { %5695 = vmatmul.mubr.f32.vlgmr.msra.gmra.mrb[8].mxu1 %v809_v46 }
 0x198   :  { %6096 = vmatpush3.bf16.msra.mxu1 %v7109_v5  ;;  %5729 = vmatprep.mubr.msk.f32.mxu1 %vm6983_vm0, %v6981_v0  ;;  %v583_v5 = vmul.f32 0.5, %v7188_v52  ;;  %v890_v52 = vrot.slane %v7183_v50, 2 }
 0x199   :  { %6097 = vmatprep.subr.bf16.mxu1 %v6982_v6 }
 0x19a   :  { %6493 = vtanh.f32 %v583_v5 }
 0x19c   :  { %6099 = vmatpush3.bf16.msra.mxu1 %v7114_v9  ;;  %v584_v9 = vmul.f32 0.5, %v7193_v56 }
 0x19d   :  { %6100 = vmatprep.subr.bf16.mxu1 %v6982_v6 }
 0x19e   :  { %6495 = vtanh.f32 %v584_v9 }
 0x1a0   :  { %6102 = vmatpush3.bf16.msra.mxu1 %v7118_v12  ;;  %v587_v12 = vmul.f32 0.5, %v7208_v3 }
 0x1a1   :  { %6103 = vmatprep.subr.bf16.mxu1 %v6982_v6 }
 0x1a2   :  { %6497 = vtanh.f32 %v587_v12 }
 0x1a4   :  { %6105 = vmatpush3.bf16.msra.mxu1 %v7122_v15  ;;  %v588_v15 = vmul.f32 0.5, %v7212_v7  ;;  %v6494_v22 = vpop.eup %6493  ;;  %v892_v7 = vrot.slane %v7196_v58, 2 }
 0x1a5   :  { %6106 = vmatprep.subr.bf16.mxu1 %v6982_v6  ;;  %v599_v13 = vadd.f32 1.0, %v6494_v22 }
 0x1a6   :  { %6499 = vtanh.f32 %v588_v15 }
 0x1a7   :  { %v607_v53 = vmul.f32 0.5, %v599_v13 }
 0x1a8   :  { %6108 = vmatpush3.bf16.msra.mxu1 %v7126_v18  ;;  %v6496_v4 = vpop.eup %6495 }
 0x1a9   :  { %6109 = vmatprep.subr.bf16.mxu1 %v6982_v6  ;;  %v600_v28 = vadd.f32 1.0, %v6496_v4  ;;  %v979_v42 = vsub.f32 1.0, %v607_v53 }
 0x1ab   :  { %v608_v57 = vmul.f32 0.5, %v600_v28  ;;  %v987_v9 = vmul.f32 %v979_v42, %v7223_v41  ;;  %v7367_v42 = vld [vmem:[#allocation3 + $0x19] ss:$8 sm:$0x7] }
 0x1ac   :  { %6111 = vmatpush3.bf16.msra.mxu1 %v7130_v21  ;;  %v6498_v31 = vpop.eup %6497 }
 0x1ad   :  { %6112 = vmatprep.subr.bf16.mxu1 %v6982_v6  ;;  %v603_v59 = vadd.f32 1.0, %v6498_v31  ;;  %v980_v46 = vsub.f32 1.0, %v608_v57 }
 0x1af   :  { %v611_v45 = vmul.f32 0.5, %v603_v59 }
 0x1b0   :  { %6114 = vmatpush3.bf16.msra.mxu1 %v7135_v24  ;;  %v6500_v39 = vpop.eup %6499 }
 0x1b1   :  { %6115 = vmatprep.subr.bf16.mxu1 %v6982_v6  ;;  %v604_v40 = vadd.f32 1.0, %v6500_v39 }
 0x1b3   :  { %v612_v34 = vmul.f32 0.5, %v604_v40 }
 0x1b4   :  { %6117 = vmatpush3.bf16.msra.mxu1 %v7139_v27  ;;  %v889_v27 = vrot.slane %v7179_v35, 2 }
 0x1b5   :  { %6150 = vmatprep.subr.bf16.mxu1 %v6982_v6 }
 0x26a   :  { %v877_v18 = vpop.f32.mrb[8].mxu1 }
 0x26b   :  { %v906_v21 = vcombine.high %v877_v18, %v877_v18  ;;  %v913_v24 = vrot.slane %v877_v18, %v7173_v37  ;;  %v5696_v14 = vpop.f32.mrb[9].mxu1  ;;  %v983_v18 = vsub.f32 1.0, %v611_v45 }
 0x26c   :  { %v988_v14 = vmul.f32 %v980_v46, %v7226_v44 }
 0x26d   :  { %v920_v56 = vrot.slane %v906_v21, %v7173_v37  ;;  %v921_v49 = vcombine.high %v913_v24, %v913_v24  ;;  %v929_v3 = vrot.slane %v913_v24, %v7173_v37  ;;  %v984_v24 = vsub.f32 1.0, %v612_v34 }
 0x26f   :  { %v922_v8 = vcombine.high %v920_v56, %v920_v56  ;;  %v936_v35 = vrot.slane %v920_v56, %v7173_v37  ;;  %v943_v10 = vrot.slane %v921_v49, %v7173_v37  ;;  %v951_v50 = vcombine.high %v929_v3, %v929_v3 }
 0x270   :  { %v963_v25 = vadd.f32 %v929_v3, %v889_v27  ;;  %v992_v4 = vmul.f32 %v984_v24, %v7238_v55 }
 0x271   :  { %v950_v51 = vrot.slane %v922_v8, %v7173_v37  ;;  %v952_v58 = vcombine.high %v936_v35, %v936_v35  ;;  %v953_v26 = vcombine.high %v943_v10, %v943_v10  ;;  %v964_v61 = vadd.f32 %v943_v10, %v890_v52 }
 0x272   :  { %v965_v2 = vadd.f32 %v951_v50, %v891_v62  ;;  %v967_v30 = vadd.f32 %v936_v35, %v893_v63  ;;  %6501 = vtanh.f32 %v963_v25 }
 0x273   :  { %v954_v32 = vcombine.high %v950_v51, %v950_v51  ;;  %v966_v33 = vadd.f32 %v953_v26, %v892_v7  ;;  %v968_v36 = vadd.f32 %v950_v51, %v894_v1  ;;  %v969_v38 = vadd.f32 %v952_v58, %v895_v17 }
 0x274   :  { %6503 = vtanh.f32 %v964_v61  ;;  %v991_v7 = vmul.f32 %v983_v18, %v7231_v47  ;;  %v7382_v18 = vld [vmem:[#allocation3 + $0x61] ss:$8 sm:$0x7] }
 0x275   :  { %v970_v48 = vadd.f32 %v954_v32, %v896_v20  ;;  %6505 = vtanh.f32 %v965_v2 }
 0x276   :  { %6507 = vtanh.f32 %v966_v33 }
 0x277   :  { %6509 = vtanh.f32 %v967_v30 }
 0x278   :  { %6511 = vtanh.f32 %v968_v36 }
 0x279   :  { %6513 = vtanh.f32 %v969_v38 }
 0x27a   :  { %6515 = vtanh.f32 %v970_v48  ;;  %v7363_v48 = vld [vmem:[#allocation3 + $0x1] ss:$8 sm:$0x7] }
 0x27c   :  { %v6502_v5 = vpop.eup %6501 }
 0x27d   :  { %v995_v12 = vmul.f32 %v6502_v5, %v607_v53 }
 0x27e   :  { %v6504_v15 = vpop.eup %6503 }
 0x27f   :  { %v6506_v21 = vpop.eup %6505  ;;  %v996_v27 = vmul.f32 %v6504_v15, %v608_v57  ;;  %v7310_v22 = vadd.f32 %v995_v12, %v987_v9  ;;  %v7377_v9 = vld [vmem:[#allocation3 + $0x49] ss:$8 sm:$0x7] }
 0x280   :  { %v6508_v52 = vpop.eup %6507  ;;  %v997_v56 = vmul.f32 %v6506_v21, %v7228_v29 }
 0x281   :  { %v6510_v49 = vpop.eup %6509  ;;  %v998_v3 = vmul.f32 %v6508_v52, %v7235_v54  ;;  %v7314_v62 = vadd.f32 %v996_v27, %v988_v14  ;;  %1011 = vst [vmem:[#allocation12] sm:$0x1] %v7310_v22  ;;  %v7387_v14 = vld [vmem:[#allocation3 + $0x79] ss:$8 sm:$0x7] }
 0x282   :  { %v6512_v41 = vpop.eup %6511  ;;  %v999_v63 = vmul.f32 %v6510_v49, %v611_v45  ;;  %v7319_v1 = vadd.f32 %v997_v56, %v7248_v16  ;;  %v7393_v56 = vld [vmem:[#allocation3 + $0x91] ss:$8 sm:$0x7] }
 0x283   :  { %v6514_v44 = vpop.eup %6513  ;;  %v1000_v8 = vmul.f32 %v6512_v41, %v612_v34  ;;  %v7323_v29 = vadd.f32 %v998_v3, %v7254_v23  ;;  %1012 = vst [vmem:[#allocation12 + $0x8] sm:$0x1] %v7314_v62  ;;  %v1075_v55 = vcombine.low %v7310_v22, %v7314_v62  ;;  %v7372_v34 = vld [vmem:[#allocation3 + $0x31] ss:$8 sm:$0x7] }
 0x284   :  { %v6516_v54 = vpop.eup %6515  ;;  %v1001_v35 = vmul.f32 %v6514_v44, %v7244_v11  ;;  %v7327_v10 = vadd.f32 %v999_v63, %v991_v7  ;;  %1013 = vst [vmem:[#allocation12 + $0x10] sm:$0x1] %v7319_v1  ;;  %v7399_v41 = vld [vmem:[#allocation3 + $0xa9] ss:$8 sm:$0x7] }
 0x285   :  { %v1002_v47 = vmul.f32 %v6516_v54, %v7250_v19  ;;  %v7331_v16 = vadd.f32 %v1000_v8, %v992_v4  ;;  %1014 = vst [vmem:[#allocation12 + $0x18] sm:$0x1] %v7323_v29  ;;  %v1076_v23 = vcombine.low %v7319_v1, %v7323_v29  ;;  %v1085_v17 = vrot.slane %v1075_v55, %v7173_v37 }
 0x286   :  { %v7339_v50 = vadd.f32 %v1001_v35, %v7259_v43  ;;  %1015 = vst [vmem:[#allocation12 + $0x20] sm:$0x1] %v7327_v10 }
 0x287   :  { %1016 = vst [vmem:[#allocation12 + $0x28] sm:$0x1] %v7331_v16  ;;  %v7344_v11 = vadd.f32 %v1002_v47, %v7262_v60  ;;  %v1077_v19 = vcombine.low %v7327_v10, %v7331_v16  ;;  %v1092_v13 = vrot.slane %v1076_v23, %v7173_v37 }
 0x288   :  { %1017 = vst [vmem:[#allocation12 + $0x30] sm:$0x1] %v7339_v50 }
 0x289   :  { %1018 = vst [vmem:[#allocation12 + $0x38] sm:$0x1] %v7344_v11  ;;  %v1078_v43 = vcombine.low %v7339_v50, %v7344_v11  ;;  %v1099_v20 = vrot.slane %v1077_v19, %v7173_v37  ;;  %v1107_v60 = vcombine.low %v1085_v17, %v1092_v13 }
 0x28b   :  { %v1106_v25 = vrot.slane %v1078_v43, %v7173_v37  ;;  %v1115_v58 = vrot.slane %v1107_v60, %v7173_v37 }
 0x28d   :  { %v1108_v51 = vcombine.low %v1099_v20, %v1106_v25 }
 0x28f   :  { %v1122_v26 = vrot.slane %v1108_v51, %v7173_v37 }
 0x291   :  { %v1123_v61 = vcombine.low %v1115_v58, %v1122_v26 }
 0x293   :  { %1190 = vmatmul.mubr.f32.vlgmr.msra.gmra.mrb[18].mxu0 %v1123_v61 }
 0x294   :  { %1812 = vmatprep.mubr.f32.mxu0 %v6981_v0 }
 0x366   :  { %v1191_v28 = vpop.f32.mrb[18].mxu0 }
 0x367   :  { %v1193_v2 = vpop.f32.mrb[19].mxu0 }
 0x368   :  { %v1198_v30 = vcombine.low %v1191_v28, %v1193_v2  ;;  %v1199_v31 = vcombine.high %v1191_v28, %v1193_v2 }
 0x36a   :  { %v1206_v32 = vrot.slane %v1198_v30, %v7173_v37  ;;  %v1213_v33 = vrot.slane %v1199_v31, %v7173_v37 }
 0x36c   :  { %v1214_v36 = vcombine.high %v1206_v32, %v1206_v32  ;;  %v1215_v38 = vcombine.high %v1213_v33, %v1213_v33  ;;  %v1222_v39 = vrot.slane %v1206_v32, %v7173_v37  ;;  %v1229_v53 = vrot.slane %v1213_v33, %v7173_v37 }
 0x36e   :  { %v1236_v59 = vrot.slane %v1214_v36, %v7173_v37  ;;  %v1243_v40 = vrot.slane %v1215_v38, %v7173_v37  ;;  %v1244_v57 = vcombine.high %v1222_v39, %v1222_v39  ;;  %v7370_v45 = vadd.f32 %v1222_v39, %v7363_v48 }
 0x36f   :  { %v1245_v12 = vcombine.high %v1229_v53, %v1229_v53  ;;  %v7390_v27 = vadd.f32 %v1229_v53, %v7382_v18 }
 0x370   :  { %v1246_v46 = vcombine.high %v1236_v59, %v1236_v59  ;;  %v7375_v5 = vadd.f32 %v1236_v59, %v7367_v42  ;;  %v7380_v15 = vadd.f32 %v1244_v57, %v7372_v34  ;;  %v1247_v21 = vcombine.high %v1243_v40, %v1243_v40 }
 0x371   :  { %v1304_v52 = vrot.slane %v7370_v45, 1  ;;  %v7396_v49 = vadd.f32 %v1243_v40, %v7387_v14  ;;  %v7402_v7 = vadd.f32 %v1245_v12, %v7393_v56  ;;  %v1308_v8 = vrot.slane %v7390_v27, 1 }
 0x372   :  { %v7385_v24 = vadd.f32 %v1246_v46, %v7377_v9  ;;  %v1305_v3 = vrot.slane %v7375_v5, 1  ;;  %v1306_v63 = vrot.slane %v7380_v15, 1  ;;  %v7406_v44 = vadd.f32 %v1247_v21, %v7399_v41 }
 0x373   :  { %v1320_v54 = vmul.f32 0.5, %v1304_v52  ;;  %v1309_v35 = vrot.slane %v7396_v49, 1  ;;  %v1310_v55 = vrot.slane %v7402_v7, 1  ;;  %v1324_v43 = vmul.f32 0.5, %v1308_v8 }
 0x374   :  { %v1307_v4 = vrot.slane %v7385_v24, 1  ;;  %v1321_v47 = vmul.f32 0.5, %v1305_v3  ;;  %v1322_v23 = vmul.f32 0.5, %v1306_v63  ;;  %v1311_v19 = vrot.slane %v7406_v44, 1 }
 0x375   :  { %6517 = vtanh.f32 %v1320_v54  ;;  %v1325_v17 = vmul.f32 0.5, %v1309_v35  ;;  %v1326_v20 = vmul.f32 0.5, %v1310_v55 }
 0x376   :  { %v1323_v13 = vmul.f32 0.5, %v1307_v4  ;;  %6519 = vtanh.f32 %v1321_v47  ;;  %v1327_v25 = vmul.f32 0.5, %v1311_v19 }
 0x377   :  { %6521 = vtanh.f32 %v1322_v23 }
 0x378   :  { %6523 = vtanh.f32 %v1323_v13 }
 0x379   :  { %6525 = vtanh.f32 %v1324_v43 }
 0x37a   :  { %6527 = vtanh.f32 %v1325_v17 }
 0x37b   :  { %6529 = vtanh.f32 %v1326_v20 }
 0x37c   :  { %6531 = vtanh.f32 %v1327_v25 }
 0x37f   :  { %v6518_v60 = vpop.eup %6517 }
 0x380   :  { %v6520_v51 = vpop.eup %6519  ;;  %v1336_v58 = vadd.f32 1.0, %v6518_v60 }
 0x381   :  { %v6522_v26 = vpop.eup %6521  ;;  %v1337_v61 = vadd.f32 1.0, %v6520_v51 }
 0x382   :  { %v6524_v28 = vpop.eup %6523  ;;  %v1338_v2 = vadd.f32 1.0, %v6522_v26  ;;  %v1344_v30 = vmul.f32 0.5, %v1336_v58 }
 0x383   :  { %v6526_v31 = vpop.eup %6525  ;;  %v1339_v32 = vadd.f32 1.0, %v6524_v28  ;;  %v1345_v33 = vmul.f32 0.5, %v1337_v61 }
 0x384   :  { %v6528_v36 = vpop.eup %6527  ;;  %v1340_v38 = vadd.f32 1.0, %v6526_v31  ;;  %v1346_v39 = vmul.f32 0.5, %v1338_v2  ;;  %v1352_v57 = vmul.f32 %v1344_v30, %v7310_v22  ;;  %v1659_v31 = vld [vmem:[#allocation9 + $0x8] sm:$0xff] }
 0x385   :  { %v6530_v53 = vpop.eup %6529  ;;  %v1341_v59 = vadd.f32 1.0, %v6528_v36  ;;  %v1347_v40 = vmul.f32 0.5, %v1339_v32  ;;  %v1353_v46 = vmul.f32 %v1345_v33, %v7314_v62  ;;  %v1661_v32 = vld [vmem:[#allocation9 + $0x18] sm:$0xff]  ;;  %v1658_v36 = vld [vmem:[#allocation9] sm:$0xff] }
 0x386   :  { %v6532_v12 = vpop.eup %6531  ;;  %v1342_v21 = vadd.f32 1.0, %v6530_v53  ;;  %v1348_v52 = vmul.f32 0.5, %v1340_v38  ;;  %v1354_v3 = vmul.f32 %v1346_v39, %v7319_v1  ;;  %v6118_v33 = vpack.c.bf16 %v1661_v32, %v1659_v31  ;;  %v1660_v38 = vld [vmem:[#allocation9 + $0x10] sm:$0xff]  ;;  %v1663_v53 = vld [vmem:[#allocation9 + $0x28] sm:$0xff]  ;;  %v1685_v31 = vld [vmem:[#allocation9 + $0xd8] sm:$0xff] }
 0x387   :  { %v1343_v63 = vadd.f32 1.0, %v6532_v12  ;;  %v1349_v4 = vmul.f32 0.5, %v1341_v59  ;;  %v1355_v8 = vmul.f32 %v1347_v40, %v7323_v29  ;;  %v1384_v54 = vcombine.low %v1352_v57, %v1353_v46  ;;  %v1665_v59 = vld [vmem:[#allocation9 + $0x38] sm:$0xff]  ;;  %v1662_v57 = vld [vmem:[#allocation9 + $0x20] sm:$0xff]  ;;  %v1664_v46 = vld [vmem:[#allocation9 + $0x30] sm:$0xff] }
 0x388   :  { %v1350_v35 = vmul.f32 0.5, %v1342_v21  ;;  %v1356_v55 = vmul.f32 %v1348_v52, %v7327_v10  ;;  %v7429_v39 = vpack.c.bf16 %v1660_v38, %v1658_v36  ;;  %6119 = vmatprep.subr.bf16.mxu0 %v6118_v33  ;;  %v7432_v40 = vpack.c.bf16 %v1665_v59, %v1663_v53  ;;  %v1667_v21 = vld [vmem:[#allocation9 + $0x48] sm:$0xff]  ;;  %v1669_v52 = vld [vmem:[#allocation9 + $0x58] sm:$0xff]  ;;  %v1682_v32 = vld [vmem:[#allocation9 + $0xc0] sm:$0xff] }
 0x389   :  { %v1351_v47 = vmul.f32 0.5, %v1343_v63  ;;  %v1357_v23 = vmul.f32 %v1349_v4, %v7331_v16  ;;  %v1385_v19 = vcombine.low %v1354_v3, %v1355_v8  ;;  %v1394_v13 = vrot.slane %v1384_v54, %v7173_v37  ;;  %v1666_v63 = vld [vmem:[#allocation9 + $0x40] sm:$0xff]  ;;  %v1668_v4 = vld [vmem:[#allocation9 + $0x50] sm:$0xff]  ;;  %v1671_v54 = vld [vmem:[#allocation9 + $0x68] sm:$0xff] }
 0x38a   :  { %v1358_v43 = vmul.f32 %v1350_v35, %v7339_v50  ;;  %6121 = vmatpush1.bf16.msra.mxu0 %v7429_v39  ;;  %v7434_v12 = vpack.c.bf16 %v1664_v46, %v1662_v57  ;;  %v7438_v3 = vpack.c.bf16 %v1669_v52, %v1667_v21  ;;  %v7440_v8 = vpack.c.bf16 %v1668_v4, %v1666_v63  ;;  %v1673_v35 = vld [vmem:[#allocation9 + $0x78] sm:$0xff]  ;;  %v1684_v38 = vld [vmem:[#allocation9 + $0xd0] sm:$0xff]  ;;  %v1687_v53 = vld [vmem:[#allocation9 + $0xe8] sm:$0xff] }
 0x38b   :  { %v1359_v17 = vmul.f32 %v1351_v47, %v7344_v11  ;;  %v1386_v20 = vcombine.low %v1356_v55, %v1357_v23  ;;  %v1401_v25 = vrot.slane %v1385_v19, %v7173_v37  ;;  %6123 = vmatprep.subr.bf16.mxu0 %v7432_v40  ;;  %v7444_v47 = vpack.c.bf16 %v1673_v35, %v1671_v54  ;;  %v1670_v55 = vld [vmem:[#allocation9 + $0x60] sm:$0xff]  ;;  %v1672_v23 = vld [vmem:[#allocation9 + $0x70] sm:$0xff]  ;;  %v1689_v59 = vld [vmem:[#allocation9 + $0xf8] sm:$0xff] }
 0x38c   :  { %v7446_v19 = vpack.c.bf16 %v1672_v23, %v1670_v55  ;;  %v7464_v57 = vpack.c.bf16 %v1684_v38, %v1682_v32  ;;  %v7466_v46 = vpack.c.bf16 %v1689_v59, %v1687_v53  ;;  %v1686_v21 = vld [vmem:[#allocation9 + $0xe0] sm:$0xff]  ;;  %v1688_v52 = vld [vmem:[#allocation9 + $0xf0] sm:$0xff]  ;;  %v1264_v4 = vmul.f32 0.5, %v7370_v45 }
 0x38d   :  { %v1387_v60 = vcombine.low %v1358_v43, %v1359_v17  ;;  %v1416_v51 = vcombine.low %v1394_v13, %v1401_v25  ;;  %v1408_v58 = vrot.slane %v1386_v20, %v7173_v37  ;;  %v1675_v13 = vld [vmem:[#allocation9 + $0x88] sm:$0xff]  ;;  %v1677_v43 = vld [vmem:[#allocation9 + $0x98] sm:$0xff]  ;;  %v1674_v20 = vld [vmem:[#allocation9 + $0x80] sm:$0xff]  ;;  %v7470_v63 = vpack.c.bf16 %v1688_v52, %v1686_v21 }
 0x38e   :  { %6125 = vmatpush1.bf16.msra.mxu0 %v7434_v12  ;;  %v7450_v17 = vpack.c.bf16 %v1677_v43, %v1675_v13  ;;  %v1676_v25 = vld [vmem:[#allocation9 + $0x90] sm:$0xff]  ;;  %v1265_v54 = vmul.f32 0.5, %v7375_v5  ;;  %v1266_v35 = vmul.f32 0.5, %v7380_v15  ;;  %v1267_v55 = vmul.f32 0.5, %v7385_v24 }
 0x38f   :  { %v1415_v26 = vrot.slane %v1387_v60, %v7173_v37  ;;  %v1424_v28 = vrot.slane %v1416_v51, %v7173_v37  ;;  %6127 = vmatprep.subr.bf16.mxu0 %v7438_v3  ;;  %v7452_v60 = vpack.c.bf16 %v1676_v25, %v1674_v20  ;;  %v1679_v51 = vld [vmem:[#allocation9 + $0xa8] sm:$0xff]  ;;  %6533 = vtanh.f32 %v1264_v4 }
 0x390   :  { %v1268_v23 = vmul.f32 0.5, %v7390_v27  ;;  %v1269_v13 = vmul.f32 0.5, %v7396_v49  ;;  %6535 = vtanh.f32 %v1265_v54  ;;  %v1270_v43 = vmul.f32 0.5, %v7402_v7 }
 0x391   :  { %v1417_v61 = vcombine.low %v1408_v58, %v1415_v26  ;;  %v1681_v58 = vld [vmem:[#allocation9 + $0xb8] sm:$0xff]  ;;  %6537 = vtanh.f32 %v1266_v35  ;;  %v1271_v20 = vmul.f32 0.5, %v7406_v44  ;;  %v1512_v7 = vrot.slane %v7363_v48, 2 }
 0x392   :  { %6129 = vmatpush1.bf16.msra.mxu0 %v7440_v8  ;;  %v7456_v26 = vpack.c.bf16 %v1681_v58, %v1679_v51  ;;  %6539 = vtanh.f32 %v1267_v55  ;;  %v1513_v44 = vrot.slane %v7367_v42, 2  ;;  %v1514_v51 = vrot.slane %v7372_v34, 2 }
 0x393   :  { %v1431_v2 = vrot.slane %v1417_v61, %v7173_v37  ;;  %6131 = vmatprep.subr.bf16.mxu0 %v7444_v47  ;;  %v1678_v61 = vld [vmem:[#allocation9 + $0xa0] sm:$0xff]  ;;  %6541 = vtanh.f32 %v1268_v23  ;;  %v1515_v53 = vrot.slane %v7377_v9, 2  ;;  %v1516_v59 = vrot.slane %v7382_v18, 2 }
 0x394   :  { %6543 = vtanh.f32 %v1269_v13  ;;  %v1517_v35 = vrot.slane %v7387_v14, 2  ;;  %v1518_v55 = vrot.slane %v7393_v56, 2 }
 0x395   :  { %v1432_v30 = vcombine.low %v1424_v28, %v1431_v2  ;;  %v1680_v28 = vld [vmem:[#allocation9 + $0xb0] sm:$0xff]  ;;  %6545 = vtanh.f32 %v1270_v43 }
 0x396   :  { %6133 = vmatpush1.bf16.msra.mxu0 %v7446_v19  ;;  %v7458_v2 = vpack.c.bf16 %v1680_v28, %v1678_v61  ;;  %6547 = vtanh.f32 %v1271_v20 }
 0x397   :  { %5730 = vmatmul.mubr.f32.vlgmr.msra.gmra.mrb[10].mxu1 %v1432_v30  ;;  %6135 = vmatprep.subr.bf16.mxu0 %v7450_v17  ;;  %v1683_v30 = vld [vmem:[#allocation9 + $0xc8] sm:$0xff] }
 0x398   :  { %5764 = vmatprep.mubr.msk.f32.mxu1 %vm6983_vm0, %v6981_v0  ;;  %v7462_v36 = vpack.c.bf16 %v1685_v31, %v1683_v30 }
 0x39a   :  { %6137 = vmatpush1.bf16.msra.mxu0 %v7452_v60 }
 0x39b   :  { %6139 = vmatprep.subr.bf16.mxu0 %v7456_v26 }
 0x39e   :  { %6141 = vmatpush1.bf16.msra.mxu0 %v7458_v2 }
 0x39f   :  { %6143 = vmatprep.subr.bf16.mxu0 %v7462_v36 }
 0x3a2   :  { %6145 = vmatpush1.bf16.msra.mxu0 %v7464_v57 }
 0x3a3   :  { %6147 = vmatprep.subr.bf16.mxu0 %v7466_v46 }
 0x3a6   :  { %6149 = vmatpush1.bf16.msra.mxu0 %v7470_v63 }
 0x3a7   :  { %6175 = vmatprep.subr.bf16.mxu0 %v6118_v33  ;;  %v6534_v33 = vpop.eup %6533 }
 0x3a8   :  { %v6536_v58 = vpop.eup %6535  ;;  %v1280_v38 = vadd.f32 1.0, %v6534_v33 }
 0x3a9   :  { %v6538_v32 = vpop.eup %6537  ;;  %v1281_v43 = vadd.f32 1.0, %v6536_v58 }
 0x3aa   :  { %v6540_v52 = vpop.eup %6539 }
 0x3ab   :  { %v6542_v54 = vpop.eup %6541 }
 0x3ac   :  { %v6544_v13 = vpop.eup %6543  ;;  %v1284_v14 = vadd.f32 1.0, %v6542_v54 }
 0x3ad   :  { %v6546_v18 = vpop.eup %6545 }
 0x3ae   :  { %v6548_v33 = vpop.eup %6547 }
 0x3af   :  { %v1287_v58 = vadd.f32 1.0, %v6548_v33 }
 0x46a   :  { %v1500_v45 = vpop.f32.mrb[10].mxu1 }
 0x46b   :  { %v1529_v5 = vcombine.high %v1500_v45, %v1500_v45  ;;  %v1536_v15 = vrot.slane %v1500_v45, %v7173_v37  ;;  %v5731_v24 = vpop.f32.mrb[11].mxu1 }
 0x46d   :  { %v1543_v27 = vrot.slane %v1529_v5, %v7173_v37  ;;  %v1544_v49 = vcombine.high %v1536_v15, %v1536_v15  ;;  %v1552_v25 = vrot.slane %v1536_v15, %v7173_v37  ;;  %v1282_v5 = vadd.f32 1.0, %v6538_v32 }
 0x46e   :  { %v1519_v15 = vrot.slane %v7399_v41, 2  ;;  %v1292_v41 = vmul.f32 0.5, %v1284_v14 }
 0x46f   :  { %v1545_v61 = vcombine.high %v1543_v27, %v1543_v27  ;;  %v1559_v28 = vrot.slane %v1543_v27, %v7173_v37  ;;  %v1566_v30 = vrot.slane %v1544_v49, %v7173_v37  ;;  %v1574_v31 = vcombine.high %v1552_v25, %v1552_v25 }
 0x470   :  { %v1586_v21 = vadd.f32 %v1552_v25, %v1512_v7  ;;  %v1283_v27 = vadd.f32 1.0, %v6540_v52  ;;  %v1288_v49 = vmul.f32 0.5, %v1280_v38  ;;  %v1285_v7 = vadd.f32 1.0, %v6544_v13 }
 0x471   :  { %v1573_v48 = vrot.slane %v1545_v61, %v7173_v37  ;;  %v1575_v42 = vcombine.high %v1559_v28, %v1559_v28  ;;  %v1576_v4 = vcombine.high %v1566_v30, %v1566_v30  ;;  %v1587_v34 = vadd.f32 %v1566_v30, %v1513_v44 }
 0x472   :  { %v1588_v23 = vadd.f32 %v1574_v31, %v1514_v51  ;;  %6549 = vtanh.f32 %v1586_v21  ;;  %v1590_v45 = vadd.f32 %v1559_v28, %v1516_v59  ;;  %v1289_v44 = vmul.f32 0.5, %v1281_v43 }
 0x473   :  { %v1577_v20 = vcombine.high %v1573_v48, %v1573_v48  ;;  %v1589_v9 = vadd.f32 %v1576_v4, %v1515_v53  ;;  %v1591_v24 = vadd.f32 %v1573_v48, %v1517_v35  ;;  %6551 = vtanh.f32 %v1587_v34 }
 0x474   :  { %v1592_v25 = vadd.f32 %v1575_v42, %v1518_v55  ;;  %6553 = vtanh.f32 %v1588_v23  ;;  %v1286_v51 = vadd.f32 1.0, %v6546_v18  ;;  %v1290_v61 = vmul.f32 0.5, %v1282_v5 }
 0x475   :  { %v1593_v56 = vadd.f32 %v1577_v20, %v1519_v15  ;;  %6555 = vtanh.f32 %v1589_v9  ;;  %v1291_v28 = vmul.f32 0.5, %v1283_v27  ;;  %v1602_v30 = vsub.f32 1.0, %v1288_v49 }
 0x476   :  { %6557 = vtanh.f32 %v1590_v45  ;;  %v1293_v31 = vmul.f32 0.5, %v1285_v7  ;;  %v1603_v32 = vsub.f32 1.0, %v1289_v44  ;;  %v1294_v53 = vmul.f32 0.5, %v1286_v51 }
 0x477   :  { %6559 = vtanh.f32 %v1591_v24  ;;  %v1295_v59 = vmul.f32 0.5, %v1287_v58  ;;  %v1604_v21 = vsub.f32 1.0, %v1290_v61  ;;  %v1605_v52 = vsub.f32 1.0, %v1291_v28 }
 0x478   :  { %6561 = vtanh.f32 %v1592_v25  ;;  %v1610_v48 = vmul.f32 %v1602_v30, %v7310_v22  ;;  %v1606_v34 = vsub.f32 1.0, %v1292_v41  ;;  %v1607_v35 = vsub.f32 1.0, %v1293_v31 }
 0x479   :  { %6563 = vtanh.f32 %v1593_v56  ;;  %v1611_v55 = vmul.f32 %v1603_v32, %v7314_v62  ;;  %v1608_v20 = vsub.f32 1.0, %v1294_v53  ;;  %v1609_v9 = vsub.f32 1.0, %v1295_v59 }
 0x47a   :  { %v1612_v45 = vmul.f32 %v1604_v21, %v7319_v1  ;;  %v1613_v15 = vmul.f32 %v1605_v52, %v7323_v29  ;;  %v1614_v62 = vmul.f32 %v1606_v34, %v7327_v10  ;;  %v1615_v14 = vmul.f32 %v1607_v35, %v7331_v16  ;;  %v1994_v34 = vld [vmem:[#allocation10 + $0x58] sm:$0xff]  ;;  %v1995_v35 = vld [vmem:[#allocation10 + $0x60] sm:$0xff] }
 0x47b   :  { %v1616_v7 = vmul.f32 %v1608_v20, %v7339_v50  ;;  %v1998_v20 = vld [vmem:[#allocation10 + $0x78] sm:$0xff] }
 0x47c   :  { %v6550_v38 = vpop.eup %6549 }
 0x47d   :  { %v1618_v42 = vmul.f32 %v6550_v38, %v1288_v49  ;;  %v6552_v4 = vpop.eup %6551 }
 0x47e   :  { %v6554_v54 = vpop.eup %6553  ;;  %v1619_v23 = vmul.f32 %v6552_v4, %v1289_v44  ;;  %v1617_v44 = vmul.f32 %v1609_v9, %v7344_v11  ;;  %v1993_v4 = vld [vmem:[#allocation10 + $0x50] sm:$0xff] }
 0x47f   :  { %v7498_v13 = vadd.f32 %v1618_v42, %v1610_v48  ;;  %v6556_v43 = vpop.eup %6555  ;;  %v1620_v18 = vmul.f32 %v6554_v54, %v1290_v61  ;;  %v7578_v54 = vpack.c.bf16 %v1994_v34, %v1993_v4 }
 0x480   :  { %v6558_v5 = vpop.eup %6557  ;;  %v1621_v22 = vmul.f32 %v6556_v43, %v1291_v28  ;;  %v7502_v24 = vadd.f32 %v1619_v23, %v1611_v55  ;;  %v1996_v55 = vld [vmem:[#allocation10 + $0x68] sm:$0xff]  ;;  %v1997_v43 = vld [vmem:[#allocation10 + $0x70] sm:$0xff] }
 0x481   :  { %1634 = vst [vmem:[#allocation12 + $0x1] sm:$0x1] %v7498_v13  ;;  %v6560_v33 = vpop.eup %6559  ;;  %v1622_v27 = vmul.f32 %v6558_v5, %v1292_v41  ;;  %v7506_v49 = vadd.f32 %v1620_v18, %v1612_v45  ;;  %v7581_v23 = vpack.c.bf16 %v1996_v55, %v1995_v35  ;;  %v7585_v9 = vpack.c.bf16 %v1998_v20, %v1997_v43 }
 0x482   :  { %v6562_v25 = vpop.eup %6561  ;;  %v1623_v56 = vmul.f32 %v6560_v33, %v1293_v31  ;;  %v7509_v1 = vadd.f32 %v1621_v22, %v1613_v15  ;;  %1635 = vst [vmem:[#allocation12 + $0x9] sm:$0x1] %v7502_v24  ;;  %v1698_v16 = vcombine.low %v7498_v13, %v7502_v24 }
 0x483   :  { %v6564_v29 = vpop.eup %6563  ;;  %v1624_v51 = vmul.f32 %v6562_v25, %v1294_v53  ;;  %v7514_v58 = vadd.f32 %v1622_v27, %v1614_v62  ;;  %1636 = vst [vmem:[#allocation12 + $0x11] sm:$0x1] %v7506_v49 }
 0x484   :  { %v1625_v10 = vmul.f32 %v6564_v29, %v1295_v59  ;;  %v7517_v61 = vadd.f32 %v1623_v56, %v1615_v14  ;;  %1637 = vst [vmem:[#allocation12 + $0x19] sm:$0x1] %v7509_v1  ;;  %v1699_v28 = vcombine.low %v7506_v49, %v7509_v1  ;;  %v1708_v32 = vrot.slane %v1698_v16, %v7173_v37  ;;  %v7594_v56 = vld [vmem:[#allocation3 + $0x2] ss:$8 sm:$0x7] }
 0x485   :  { %v7524_v30 = vadd.f32 %v1624_v51, %v1616_v7  ;;  %1638 = vst [vmem:[#allocation12 + $0x21] sm:$0x1] %v7514_v58  ;;  %v7598_v51 = vld [vmem:[#allocation3 + $0x1a] ss:$8 sm:$0x7] }
 0x486   :  { %1639 = vst [vmem:[#allocation12 + $0x29] sm:$0x1] %v7517_v61  ;;  %v7528_v50 = vadd.f32 %v1625_v10, %v1617_v44  ;;  %v1700_v11 = vcombine.low %v7514_v58, %v7517_v61  ;;  %v1715_v41 = vrot.slane %v1699_v28, %v7173_v37  ;;  %v7603_v16 = vld [vmem:[#allocation3 + $0x32] ss:$8 sm:$0x7] }
 0x487   :  { %1640 = vst [vmem:[#allocation12 + $0x31] sm:$0x1] %v7524_v30 }
 0x488   :  { %1641 = vst [vmem:[#allocation12 + $0x39] sm:$0x1] %v7528_v50  ;;  %v1701_v31 = vcombine.low %v7524_v30, %v7528_v50  ;;  %v1722_v38 = vrot.slane %v1700_v11, %v7173_v37  ;;  %v1730_v59 = vcombine.low %v1708_v32, %v1715_v41  ;;  %v7608_v41 = vld [vmem:[#allocation3 + $0x4a] ss:$8 sm:$0x7] }
 0x48a   :  { %v1729_v53 = vrot.slane %v1701_v31, %v7173_v37  ;;  %v1738_v52 = vrot.slane %v1730_v59, %v7173_v37 }
 0x48c   :  { %v1731_v21 = vcombine.low %v1722_v38, %v1729_v53  ;;  %v7613_v38 = vld [vmem:[#allocation3 + $0x62] ss:$8 sm:$0x7] }
 0x48e   :  { %v1745_v48 = vrot.slane %v1731_v21, %v7173_v37  ;;  %v7618_v21 = vld [vmem:[#allocation3 + $0x7a] ss:$8 sm:$0x7] }
 0x490   :  { %v1746_v42 = vcombine.low %v1738_v52, %v1745_v48 }
 0x492   :  { %1813 = vmatmul.mubr.f32.vlgmr.msra.gmra.mrb[20].mxu0 %v1746_v42  ;;  %v7624_v42 = vld [vmem:[#allocation3 + $0x92] ss:$8 sm:$0x7] }
 0x493   :  { %6177 = vmatpush1.bf16.msra.mxu0 %v7429_v39  ;;  %2435 = vmatprep.mubr.f32.mxu0 %v6981_v0  ;;  %v1983_v39 = vld [vmem:[#allocation10] sm:$0xff] }
 0x494   :  { %6179 = vmatprep.subr.bf16.mxu0 %v7432_v40  ;;  %v1984_v40 = vld [vmem:[#allocation10 + $0x8] sm:$0xff] }
 0x497   :  { %6181 = vmatpush1.bf16.msra.mxu0 %v7434_v12  ;;  %v7558_v12 = vpack.c.bf16 %v1984_v40, %v1983_v39 }
 0x498   :  { %6183 = vmatprep.subr.bf16.mxu0 %v7438_v3  ;;  %v1985_v3 = vld [vmem:[#allocation10 + $0x10] sm:$0xff] }
 0x499   :  { %6152 = vmatpush3.bf16.msra.mxu1 %v7558_v12 }
 0x49a   :  { %6153 = vmatprep.subr.bf16.mxu1 %v6982_v6 }
 0x49b   :  { %6185 = vmatpush1.bf16.msra.mxu0 %v7440_v8  ;;  %v1986_v8 = vld [vmem:[#allocation10 + $0x18] sm:$0xff] }
 0x49c   :  { %6187 = vmatprep.subr.bf16.mxu0 %v7444_v47  ;;  %v7562_v47 = vpack.c.bf16 %v1986_v8, %v1985_v3  ;;  %v7630_v3 = vld [vmem:[#allocation3 + $0xaa] ss:$8 sm:$0x7] }
 0x49e   :  { %6155 = vmatpush3.bf16.msra.mxu1 %v7562_v47 }
 0x49f   :  { %6189 = vmatpush1.bf16.msra.mxu0 %v7446_v19  ;;  %6156 = vmatprep.subr.bf16.mxu1 %v6982_v6  ;;  %v1987_v19 = vld [vmem:[#allocation10 + $0x20] sm:$0xff] }
 0x4a0   :  { %6191 = vmatprep.subr.bf16.mxu0 %v7450_v17  ;;  %v1988_v17 = vld [vmem:[#allocation10 + $0x28] sm:$0xff] }
 0x4a3   :  { %6193 = vmatpush1.bf16.msra.mxu0 %v7452_v60  ;;  %v7566_v60 = vpack.c.bf16 %v1988_v17, %v1987_v19 }
 0x4a4   :  { %6195 = vmatprep.subr.bf16.mxu0 %v7456_v26  ;;  %v1989_v26 = vld [vmem:[#allocation10 + $0x30] sm:$0xff] }
 0x4a5   :  { %6158 = vmatpush3.bf16.msra.mxu1 %v7566_v60 }
 0x4a6   :  { %6159 = vmatprep.subr.bf16.mxu1 %v6982_v6 }
 0x4a7   :  { %6197 = vmatpush1.bf16.msra.mxu0 %v7458_v2  ;;  %v1990_v2 = vld [vmem:[#allocation10 + $0x38] sm:$0xff] }
 0x4a8   :  { %6199 = vmatprep.subr.bf16.mxu0 %v7462_v36  ;;  %v7570_v36 = vpack.c.bf16 %v1990_v2, %v1989_v26 }
 0x4aa   :  { %6161 = vmatpush3.bf16.msra.mxu1 %v7570_v36 }
 0x4ab   :  { %6201 = vmatpush1.bf16.msra.mxu0 %v7464_v57  ;;  %6162 = vmatprep.subr.bf16.mxu1 %v6982_v6  ;;  %v1991_v57 = vld [vmem:[#allocation10 + $0x40] sm:$0xff] }
 0x4ac   :  { %6203 = vmatprep.subr.bf16.mxu0 %v7466_v46  ;;  %v1992_v46 = vld [vmem:[#allocation10 + $0x48] sm:$0xff] }
 0x4af   :  { %6205 = vmatpush1.bf16.msra.mxu0 %v7470_v63  ;;  %v7574_v63 = vpack.c.bf16 %v1992_v46, %v1991_v57 }
 0x4b1   :  { %6164 = vmatpush3.bf16.msra.mxu1 %v7574_v63 }
 0x4b2   :  { %6165 = vmatprep.subr.bf16.mxu1 %v6982_v6 }
 0x4b5   :  { %6167 = vmatpush3.bf16.msra.mxu1 %v7578_v54 }
 0x4b6   :  { %6168 = vmatprep.subr.bf16.mxu1 %v6982_v6 }
 0x4b9   :  { %6170 = vmatpush3.bf16.msra.mxu1 %v7581_v23 }
 0x4ba   :  { %6171 = vmatprep.subr.bf16.mxu1 %v6982_v6 }
 0x4bd   :  { %6173 = vmatpush3.bf16.msra.mxu1 %v7585_v9 }
 0x4be   :  { %6206 = vmatprep.subr.bf16.mxu1 %v6982_v6 }
 0x565   :  { %v1814_v45 = vpop.f32.mrb[20].mxu0 }
 0x566   :  { %v1816_v18 = vpop.f32.mrb[21].mxu0 }
 0x567   :  { %v1821_v5 = vcombine.low %v1814_v45, %v1816_v18  ;;  %v1822_v15 = vcombine.high %v1814_v45, %v1816_v18 }
 0x569   :  { %v1829_v22 = vrot.slane %v1821_v5, %v7173_v37  ;;  %v1836_v33 = vrot.slane %v1822_v15, %v7173_v37 }
 0x56b   :  { %v1837_v62 = vcombine.high %v1829_v22, %v1829_v22  ;;  %v1838_v27 = vcombine.high %v1836_v33, %v1836_v33  ;;  %v1845_v25 = vrot.slane %v1829_v22, %v7173_v37  ;;  %v1852_v14 = vrot.slane %v1836_v33, %v7173_v37 }
 0x56d   :  { %v1859_v29 = vrot.slane %v1837_v62, %v7173_v37  ;;  %v1866_v7 = vrot.slane %v1838_v27, %v7173_v37  ;;  %v1867_v44 = vcombine.high %v1845_v25, %v1845_v25  ;;  %v7601_v10 = vadd.f32 %v1845_v25, %v7594_v56 }
 0x56e   :  { %v1868_v31 = vcombine.high %v1852_v14, %v1852_v14  ;;  %v7621_v52 = vadd.f32 %v1852_v14, %v7613_v38 }
 0x56f   :  { %v1869_v28 = vcombine.high %v1859_v29, %v1859_v29  ;;  %v7606_v11 = vadd.f32 %v1859_v29, %v7598_v51  ;;  %v7611_v32 = vadd.f32 %v1867_v44, %v7603_v16  ;;  %v1870_v53 = vcombine.high %v1866_v7, %v1866_v7 }
 0x570   :  { %v1927_v48 = vrot.slane %v7601_v10, 1  ;;  %v7627_v39 = vadd.f32 %v1866_v7, %v7618_v21  ;;  %v7633_v8 = vadd.f32 %v1868_v31, %v7624_v42  ;;  %v1931_v2 = vrot.slane %v7621_v52, 1 }
 0x571   :  { %v7616_v59 = vadd.f32 %v1869_v28, %v7608_v41  ;;  %v1928_v40 = vrot.slane %v7606_v11, 1  ;;  %v1929_v19 = vrot.slane %v7611_v32, 1  ;;  %v7637_v17 = vadd.f32 %v1870_v53, %v7630_v3 }
 0x572   :  { %v1943_v57 = vmul.f32 0.5, %v1927_v48  ;;  %v1932_v46 = vrot.slane %v7627_v39, 1  ;;  %v1933_v34 = vrot.slane %v7633_v8, 1  ;;  %v1947_v20 = vmul.f32 0.5, %v1931_v2 }
 0x573   :  { %v1930_v26 = vrot.slane %v7616_v59, 1  ;;  %v1944_v4 = vmul.f32 0.5, %v1928_v40  ;;  %v1945_v35 = vmul.f32 0.5, %v1929_v19  ;;  %v1934_v55 = vrot.slane %v7637_v17, 1 }
 0x574   :  { %6565 = vtanh.f32 %v1943_v57  ;;  %v1948_v45 = vmul.f32 0.5, %v1932_v46  ;;  %v1949_v18 = vmul.f32 0.5, %v1933_v34 }
 0x575   :  { %v1946_v43 = vmul.f32 0.5, %v1930_v26  ;;  %6567 = vtanh.f32 %v1944_v4  ;;  %v1950_v5 = vmul.f32 0.5, %v1934_v55 }
 0x576   :  { %6569 = vtanh.f32 %v1945_v35 }
 0x577   :  { %6571 = vtanh.f32 %v1946_v43 }
 0x578   :  { %6573 = vtanh.f32 %v1947_v20 }
 0x579   :  { %6575 = vtanh.f32 %v1948_v45 }
 0x57a   :  { %6577 = vtanh.f32 %v1949_v18 }
 0x57b   :  { %6579 = vtanh.f32 %v1950_v5 }
 0x57e   :  { %v6566_v15 = vpop.eup %6565 }
 0x57f   :  { %v6568_v22 = vpop.eup %6567  ;;  %v1959_v33 = vadd.f32 1.0, %v6566_v15 }
 0x580   :  { %v6570_v62 = vpop.eup %6569  ;;  %v1960_v27 = vadd.f32 1.0, %v6568_v22 }
 0x581   :  { %v6572_v25 = vpop.eup %6571  ;;  %v1961_v14 = vadd.f32 1.0, %v6570_v62  ;;  %v1967_v29 = vmul.f32 0.5, %v1959_v33 }
 0x582   :  { %v6574_v7 = vpop.eup %6573  ;;  %v1962_v44 = vadd.f32 1.0, %v6572_v25  ;;  %v1968_v28 = vmul.f32 0.5, %v1960_v27 }
 0x583   :  { %v6576_v31 = vpop.eup %6575  ;;  %v1963_v53 = vadd.f32 1.0, %v6574_v7  ;;  %v1969_v48 = vmul.f32 0.5, %v1961_v14  ;;  %v1975_v2 = vmul.f32 %v1967_v29, %v7498_v13 }
 0x584   :  { %v6578_v40 = vpop.eup %6577  ;;  %v1964_v19 = vadd.f32 1.0, %v6576_v31  ;;  %v1970_v26 = vmul.f32 0.5, %v1962_v44  ;;  %v1976_v57 = vmul.f32 %v1968_v28, %v7502_v24 }
 0x585   :  { %v6580_v46 = vpop.eup %6579  ;;  %v1965_v4 = vadd.f32 1.0, %v6578_v40  ;;  %v1971_v34 = vmul.f32 0.5, %v1963_v53  ;;  %v1977_v35 = vmul.f32 %v1969_v48, %v7506_v49 }
 0x586   :  { %v1966_v55 = vadd.f32 1.0, %v6580_v46  ;;  %v1972_v43 = vmul.f32 0.5, %v1964_v19  ;;  %v1978_v20 = vmul.f32 %v1970_v26, %v7509_v1  ;;  %v2007_v45 = vcombine.low %v1975_v2, %v1976_v57 }
 0x587   :  { %v1973_v18 = vmul.f32 0.5, %v1965_v4  ;;  %v1979_v15 = vmul.f32 %v1971_v34, %v7514_v58  ;;  %v2137_v57 = vrot.slane %v7603_v16, 2 }
 0x588   :  { %v1974_v5 = vmul.f32 0.5, %v1966_v55  ;;  %v1980_v22 = vmul.f32 %v1972_v43, %v7517_v61  ;;  %v2008_v33 = vcombine.low %v1977_v35, %v1978_v20  ;;  %v2017_v62 = vrot.slane %v2007_v45, %v7173_v37 }
 0x589   :  { %v1981_v27 = vmul.f32 %v1973_v18, %v7524_v30  ;;  %v2138_v45 = vrot.slane %v7608_v41, 2  ;;  %v2139_v18 = vrot.slane %v7613_v38, 2 }
 0x58a   :  { %v1982_v25 = vmul.f32 %v1974_v5, %v7528_v50  ;;  %v2009_v14 = vcombine.low %v1979_v15, %v1980_v22  ;;  %v2024_v29 = vrot.slane %v2008_v33, %v7173_v37 }
 0x58c   :  { %v2010_v7 = vcombine.low %v1981_v27, %v1982_v25  ;;  %v2039_v44 = vcombine.low %v2017_v62, %v2024_v29  ;;  %v2031_v28 = vrot.slane %v2009_v14, %v7173_v37  ;;  %v2140_v62 = vrot.slane %v7618_v21, 2 }
 0x58d   :  { %v2141_v27 = vrot.slane %v7624_v42, 2 }
 0x58e   :  { %v2038_v31 = vrot.slane %v2010_v7, %v7173_v37  ;;  %v2047_v48 = vrot.slane %v2039_v44, %v7173_v37 }
 0x590   :  { %v2040_v53 = vcombine.low %v2031_v28, %v2038_v31  ;;  %v2142_v31 = vrot.slane %v7630_v3, 2 }
 0x592   :  { %v2054_v40 = vrot.slane %v2040_v53, %v7173_v37 }
 0x594   :  { %v2055_v19 = vcombine.low %v2047_v48, %v2054_v40 }
 0x596   :  { %5765 = vmatmul.mubr.f32.vlgmr.msra.gmra.mrb[12].mxu1 %v2055_v19 }
 0x597   :  { %6208 = vmatpush3.bf16.msra.mxu1 %v7558_v12  ;;  %5799 = vmatprep.mubr.msk.f32.mxu1 %vm6983_vm0, %v6981_v0  ;;  %v1887_v12 = vmul.f32 0.5, %v7601_v10 }
 0x598   :  { %6209 = vmatprep.subr.bf16.mxu1 %v6982_v6 }
 0x599   :  { %6581 = vtanh.f32 %v1887_v12 }
 0x59b   :  { %6211 = vmatpush3.bf16.msra.mxu1 %v7562_v47  ;;  %v1888_v47 = vmul.f32 0.5, %v7606_v11 }
 0x59c   :  { %6212 = vmatprep.subr.bf16.mxu1 %v6982_v6 }
 0x59d   :  { %6583 = vtanh.f32 %v1888_v47 }
 0x59f   :  { %6214 = vmatpush3.bf16.msra.mxu1 %v7566_v60  ;;  %v1889_v60 = vmul.f32 0.5, %v7611_v32 }
 0x5a0   :  { %6215 = vmatprep.subr.bf16.mxu1 %v6982_v6 }
 0x5a1   :  { %6585 = vtanh.f32 %v1889_v60 }
 0x5a3   :  { %6217 = vmatpush3.bf16.msra.mxu1 %v7570_v36  ;;  %v1890_v36 = vmul.f32 0.5, %v7616_v59  ;;  %v6582_v26 = vpop.eup %6581 }
 0x5a4   :  { %6218 = vmatprep.subr.bf16.mxu1 %v6982_v6  ;;  %v1903_v20 = vadd.f32 1.0, %v6582_v26 }
 0x5a5   :  { %6587 = vtanh.f32 %v1890_v36 }
 0x5a6   :  { %v1911_v19 = vmul.f32 0.5, %v1903_v20 }
 0x5a7   :  { %6220 = vmatpush3.bf16.msra.mxu1 %v7574_v63  ;;  %v1891_v63 = vmul.f32 0.5, %v7621_v52  ;;  %v6584_v46 = vpop.eup %6583 }
 0x5a8   :  { %6221 = vmatprep.subr.bf16.mxu1 %v6982_v6  ;;  %v1904_v29 = vadd.f32 1.0, %v6584_v46 }
 0x5a9   :  { %6589 = vtanh.f32 %v1891_v63 }
 0x5aa   :  { %v1912_v60 = vmul.f32 0.5, %v1904_v29 }
 0x5ab   :  { %6223 = vmatpush3.bf16.msra.mxu1 %v7578_v54  ;;  %v1892_v54 = vmul.f32 0.5, %v7627_v39  ;;  %v6586_v43 = vpop.eup %6585 }
 0x5ac   :  { %6224 = vmatprep.subr.bf16.mxu1 %v6982_v6  ;;  %v1905_v28 = vadd.f32 1.0, %v6586_v43 }
 0x5ad   :  { %6591 = vtanh.f32 %v1892_v54 }
 0x5ae   :  { %v1913_v54 = vmul.f32 0.5, %v1905_v28 }
 0x5af   :  { %6226 = vmatpush3.bf16.msra.mxu1 %v7581_v23  ;;  %v1893_v23 = vmul.f32 0.5, %v7633_v8  ;;  %v2135_v8 = vrot.slane %v7594_v56, 2  ;;  %v6588_v15 = vpop.eup %6587 }
 0x5b0   :  { %6227 = vmatprep.subr.bf16.mxu1 %v6982_v6  ;;  %v1906_v40 = vadd.f32 1.0, %v6588_v15 }
 0x5b1   :  { %6593 = vtanh.f32 %v1893_v23 }
 0x5b2   :  { %v1914_v23 = vmul.f32 0.5, %v1906_v40 }
 0x5b3   :  { %6229 = vmatpush3.bf16.msra.mxu1 %v7585_v9  ;;  %v1894_v9 = vmul.f32 0.5, %v7637_v17  ;;  %v2136_v17 = vrot.slane %v7598_v51, 2  ;;  %v6590_v33 = vpop.eup %6589 }
 0x5b4   :  { %6262 = vmatprep.subr.bf16.mxu1 %v6982_v6  ;;  %v1907_v21 = vadd.f32 1.0, %v6590_v33 }
 0x5b5   :  { %6595 = vtanh.f32 %v1894_v9  ;;  %v2225_v9 = vsub.f32 1.0, %v1911_v19 }
 0x5b6   :  { %v1915_v3 = vmul.f32 0.5, %v1907_v21 }
 0x5b7   :  { %v6592_v14 = vpop.eup %6591 }
 0x5b8   :  { %v1908_v47 = vadd.f32 1.0, %v6592_v14 }
 0x5bb   :  { %v6594_v38 = vpop.eup %6593 }
 0x5bc   :  { %v1909_v36 = vadd.f32 1.0, %v6594_v38 }
 0x5bf   :  { %v6596_v48 = vpop.eup %6595 }
 0x5c0   :  { %v1910_v63 = vadd.f32 1.0, %v6596_v48 }
 0x5c2   :  { %v1918_v26 = vmul.f32 0.5, %v1910_v63 }
 0x669   :  { %v2123_v10 = vpop.f32.mrb[12].mxu1 }
 0x66a   :  { %v2152_v11 = vcombine.high %v2123_v10, %v2123_v10  ;;  %v2159_v32 = vrot.slane %v2123_v10, %v7173_v37  ;;  %v5766_v59 = vpop.f32.mrb[13].mxu1  ;;  %v1916_v10 = vmul.f32 0.5, %v1908_v47 }
 0x66b   :  { %v1917_v59 = vmul.f32 0.5, %v1909_v36 }
 0x66c   :  { %v2166_v52 = vrot.slane %v2152_v11, %v7173_v37  ;;  %v2167_v39 = vcombine.high %v2159_v32, %v2159_v32  ;;  %v2175_v2 = vrot.slane %v2159_v32, %v7173_v37  ;;  %v2226_v11 = vsub.f32 1.0, %v1912_v60 }
 0x66d   :  { %v2231_v20 = vsub.f32 1.0, %v1917_v59 }
 0x66e   :  { %v2168_v4 = vcombine.high %v2166_v52, %v2166_v52  ;;  %v2182_v34 = vrot.slane %v2166_v52, %v7173_v37  ;;  %v2189_v35 = vrot.slane %v2167_v39, %v7173_v37  ;;  %v2197_v55 = vcombine.high %v2175_v2, %v2175_v2 }
 0x66f   :  { %v2209_v5 = vadd.f32 %v2175_v2, %v2135_v8  ;;  %v2227_v52 = vsub.f32 1.0, %v1913_v54  ;;  %v2228_v39 = vsub.f32 1.0, %v1914_v23  ;;  %v2233_v2 = vmul.f32 %v2225_v9, %v7498_v13 }
 0x670   :  { %v2196_v56 = vrot.slane %v2168_v4, %v7173_v37  ;;  %v2198_v51 = vcombine.high %v2182_v34, %v2182_v34  ;;  %v2199_v22 = vcombine.high %v2189_v35, %v2189_v35  ;;  %v2210_v16 = vadd.f32 %v2189_v35, %v2136_v17 }
 0x671   :  { %v2211_v25 = vadd.f32 %v2197_v55, %v2137_v57  ;;  %6597 = vtanh.f32 %v2209_v5  ;;  %v2213_v44 = vadd.f32 %v2182_v34, %v2139_v18  ;;  %v2229_v57 = vsub.f32 1.0, %v1915_v3 }
 0x672   :  { %v2200_v7 = vcombine.high %v2196_v56, %v2196_v56  ;;  %v2212_v41 = vadd.f32 %v2199_v22, %v2138_v45  ;;  %v2214_v53 = vadd.f32 %v2196_v56, %v2140_v62  ;;  %6599 = vtanh.f32 %v2210_v16 }
 0x673   :  { %v2215_v12 = vadd.f32 %v2198_v51, %v2141_v27  ;;  %6601 = vtanh.f32 %v2211_v25  ;;  %v2230_v4 = vsub.f32 1.0, %v1916_v10  ;;  %v2234_v34 = vmul.f32 %v2226_v11, %v7502_v24 }
 0x674   :  { %v2216_v42 = vadd.f32 %v2200_v7, %v2142_v31  ;;  %6603 = vtanh.f32 %v2212_v41  ;;  %v2232_v45 = vsub.f32 1.0, %v1918_v26  ;;  %v2235_v18 = vmul.f32 %v2227_v52, %v7506_v49 }
 0x675   :  { %6605 = vtanh.f32 %v2213_v44  ;;  %v2236_v56 = vmul.f32 %v2228_v39, %v7509_v1  ;;  %v2237_v24 = vmul.f32 %v2229_v57, %v7514_v58  ;;  %v2238_v27 = vmul.f32 %v2230_v4, %v7517_v61  ;;  %v7758_v57 = vld [vmem:[#allocation3 + $0x33] ss:$8 sm:$0x7] }
 0x676   :  { %6607 = vtanh.f32 %v2214_v53  ;;  %v2239_v14 = vmul.f32 %v2231_v20, %v7524_v30  ;;  %v2240_v29 = vmul.f32 %v2232_v45, %v7528_v50  ;;  %v7768_v20 = vld [vmem:[#allocation3 + $0x63] ss:$8 sm:$0x7] }
 0x677   :  { %6609 = vtanh.f32 %v2215_v12 }
 0x678   :  { %6611 = vtanh.f32 %v2216_v42 }
 0x67b   :  { %v6598_v32 = vpop.eup %6597 }
 0x67c   :  { %v2241_v8 = vmul.f32 %v6598_v32, %v1911_v19  ;;  %v6600_v17 = vpop.eup %6599 }
 0x67d   :  { %v6602_v46 = vpop.eup %6601  ;;  %v2242_v35 = vmul.f32 %v6600_v17, %v1912_v60 }
 0x67e   :  { %v7700_v55 = vadd.f32 %v2241_v8, %v2233_v2  ;;  %v6604_v43 = vpop.eup %6603  ;;  %v2243_v5 = vmul.f32 %v6602_v46, %v1913_v54  ;;  %v7753_v8 = vld [vmem:[#allocation3 + $0x1b] ss:$8 sm:$0x7] }
 0x67f   :  { %v6606_v15 = vpop.eup %6605  ;;  %v2244_v13 = vmul.f32 %v6604_v43, %v1914_v23  ;;  %v7704_v51 = vadd.f32 %v2242_v35, %v2234_v34  ;;  %v7763_v34 = vld [vmem:[#allocation3 + $0x4b] ss:$8 sm:$0x7] }
 0x680   :  { %2257 = vst [vmem:[#allocation12 + $0x2] sm:$0x1] %v7700_v55  ;;  %v6608_v22 = vpop.eup %6607  ;;  %v2245_v16 = vmul.f32 %v6606_v15, %v1915_v3  ;;  %v7708_v33 = vadd.f32 %v2243_v5, %v2235_v18  ;;  %v7773_v5 = vld [vmem:[#allocation3 + $0x7b] ss:$8 sm:$0x7] }
 0x681   :  { %v6610_v62 = vpop.eup %6609  ;;  %v2246_v25 = vmul.f32 %v6608_v22, %v1916_v10  ;;  %v7711_v49 = vadd.f32 %v2244_v13, %v2236_v56  ;;  %2258 = vst [vmem:[#allocation12 + $0xa] sm:$0x1] %v7704_v51  ;;  %v2321_v61 = vcombine.low %v7700_v55, %v7704_v51  ;;  %v7779_v13 = vld [vmem:[#allocation3 + $0x93] ss:$8 sm:$0x7] }
 0x682   :  { %v6612_v1 = vpop.eup %6611  ;;  %v2247_v7 = vmul.f32 %v6610_v62, %v1917_v59  ;;  %v7716_v41 = vadd.f32 %v2245_v16, %v2237_v24  ;;  %2259 = vst [vmem:[#allocation12 + $0x12] sm:$0x1] %v7708_v33  ;;  %v7785_v16 = vld [vmem:[#allocation3 + $0xab] ss:$8 sm:$0x7] }
 0x683   :  { %v2248_v58 = vmul.f32 %v6612_v1, %v1918_v26  ;;  %v7719_v44 = vadd.f32 %v2246_v25, %v2238_v27  ;;  %2260 = vst [vmem:[#allocation12 + $0x1a] sm:$0x1] %v7711_v49  ;;  %v2322_v38 = vcombine.low %v7708_v33, %v7711_v49  ;;  %v2331_v48 = vrot.slane %v2321_v61, %v7173_v37  ;;  %v7749_v26 = vld [vmem:[#allocation3 + $0x3] ss:$8 sm:$0x7] }
 0x684   :  { %v7726_v28 = vadd.f32 %v2247_v7, %v2239_v14  ;;  %2261 = vst [vmem:[#allocation12 + $0x22] sm:$0x1] %v7716_v41 }
 0x685   :  { %2262 = vst [vmem:[#allocation12 + $0x2a] sm:$0x1] %v7719_v44  ;;  %v7730_v30 = vadd.f32 %v2248_v58, %v2240_v29  ;;  %v2323_v50 = vcombine.low %v7716_v41, %v7719_v44  ;;  %v2338_v31 = vrot.slane %v2322_v38, %v7173_v37 }
 0x686   :  { %2263 = vst [vmem:[#allocation12 + $0x32] sm:$0x1] %v7726_v28 }
 0x687   :  { %2264 = vst [vmem:[#allocation12 + $0x3a] sm:$0x1] %v7730_v30  ;;  %v2324_v53 = vcombine.low %v7726_v28, %v7730_v30  ;;  %v2345_v40 = vrot.slane %v2323_v50, %v7173_v37  ;;  %v2353_v12 = vcombine.low %v2331_v48, %v2338_v31 }
 0x689   :  { %v2352_v19 = vrot.slane %v2324_v53, %v7173_v37  ;;  %v2361_v42 = vrot.slane %v2353_v12, %v7173_v37 }
 0x68b   :  { %v2354_v21 = vcombine.low %v2345_v40, %v2352_v19 }
 0x68d   :  { %v2368_v47 = vrot.slane %v2354_v21, %v7173_v37 }
 0x68f   :  { %v2369_v60 = vcombine.low %v2361_v42, %v2368_v47 }
 0x691   :  { %2436 = vmatmul.mubr.f32.vlgmr.msra.gmra.mrb[22].mxu0 %v2369_v60 }
 0x692   :  { %3058 = vmatprep.mubr.f32.mxu0 %v6981_v0 }
 0x764   :  { %v2437_v36 = vpop.f32.mrb[22].mxu0 }
 0x765   :  { %v2439_v63 = vpop.f32.mrb[23].mxu0 }
 0x766   :  { %v2444_v54 = vcombine.low %v2437_v36, %v2439_v63  ;;  %v2445_v23 = vcombine.high %v2437_v36, %v2439_v63 }
 0x768   :  { %v2452_v9 = vrot.slane %v2444_v54, %v7173_v37  ;;  %v2459_v3 = vrot.slane %v2445_v23, %v7173_v37 }
 0x76a   :  { %v2460_v10 = vcombine.high %v2452_v9, %v2452_v9  ;;  %v2461_v11 = vcombine.high %v2459_v3, %v2459_v3  ;;  %v2468_v32 = vrot.slane %v2452_v9, %v7173_v37  ;;  %v2475_v59 = vrot.slane %v2459_v3, %v7173_v37 }
 0x76c   :  { %v2482_v52 = vrot.slane %v2460_v10, %v7173_v37  ;;  %v2489_v39 = vrot.slane %v2461_v11, %v7173_v37  ;;  %v2490_v2 = vcombine.high %v2468_v32, %v2468_v32  ;;  %v7756_v17 = vadd.f32 %v2468_v32, %v7749_v26 }
 0x76d   :  { %v2491_v35 = vcombine.high %v2475_v59, %v2475_v59  ;;  %v7776_v15 = vadd.f32 %v2475_v59, %v7768_v20 }
 0x76e   :  { %v2492_v46 = vcombine.high %v2482_v52, %v2482_v52  ;;  %v7761_v4 = vadd.f32 %v2482_v52, %v7753_v8  ;;  %v7766_v43 = vadd.f32 %v2490_v2, %v7758_v57  ;;  %v2493_v45 = vcombine.high %v2489_v39, %v2489_v39 }
 0x76f   :  { %v2550_v56 = vrot.slane %v7756_v17, 1  ;;  %v7782_v22 = vadd.f32 %v2489_v39, %v7773_v5  ;;  %v7788_v62 = vadd.f32 %v2491_v35, %v7779_v13  ;;  %v2554_v14 = vrot.slane %v7776_v15, 1 }
 0x770   :  { %v7771_v18 = vadd.f32 %v2492_v46, %v7763_v34  ;;  %v2551_v24 = vrot.slane %v7761_v4, 1  ;;  %v2552_v27 = vrot.slane %v7766_v43, 1  ;;  %v7792_v25 = vadd.f32 %v2493_v45, %v7785_v16 }
 0x771   :  { %v2566_v29 = vmul.f32 0.5, %v2550_v56  ;;  %v2555_v7 = vrot.slane %v7782_v22, 1  ;;  %v2556_v61 = vrot.slane %v7788_v62, 1  ;;  %v2570_v53 = vmul.f32 0.5, %v2554_v14 }
 0x772   :  { %v2553_v1 = vrot.slane %v7771_v18, 1  ;;  %v2567_v58 = vmul.f32 0.5, %v2551_v24  ;;  %v2568_v38 = vmul.f32 0.5, %v2552_v27  ;;  %v2557_v50 = vrot.slane %v7792_v25, 1 }
 0x773   :  { %6613 = vtanh.f32 %v2566_v29  ;;  %v2571_v48 = vmul.f32 0.5, %v2555_v7  ;;  %v2572_v40 = vmul.f32 0.5, %v2556_v61 }
 0x774   :  { %v2569_v31 = vmul.f32 0.5, %v2553_v1  ;;  %6615 = vtanh.f32 %v2567_v58  ;;  %v2573_v19 = vmul.f32 0.5, %v2557_v50 }
 0x775   :  { %6617 = vtanh.f32 %v2568_v38 }
 0x776   :  { %6619 = vtanh.f32 %v2569_v31 }
 0x777   :  { %6621 = vtanh.f32 %v2570_v53 }
 0x778   :  { %6623 = vtanh.f32 %v2571_v48 }
 0x779   :  { %6625 = vtanh.f32 %v2572_v40 }
 0x77a   :  { %6627 = vtanh.f32 %v2573_v19 }
 0x77d   :  { %v6614_v12 = vpop.eup %6613 }
 0x77e   :  { %v6616_v21 = vpop.eup %6615  ;;  %v2582_v42 = vadd.f32 1.0, %v6614_v12 }
 0x77f   :  { %v6618_v47 = vpop.eup %6617  ;;  %v2583_v60 = vadd.f32 1.0, %v6616_v21 }
 0x780   :  { %v6620_v36 = vpop.eup %6619  ;;  %v2584_v63 = vadd.f32 1.0, %v6618_v47  ;;  %v2590_v54 = vmul.f32 0.5, %v2582_v42 }
 0x781   :  { %v6622_v23 = vpop.eup %6621  ;;  %v2585_v9 = vadd.f32 1.0, %v6620_v36  ;;  %v2591_v3 = vmul.f32 0.5, %v2583_v60 }
 0x782   :  { %v6624_v10 = vpop.eup %6623  ;;  %v2586_v11 = vadd.f32 1.0, %v6622_v23  ;;  %v2592_v32 = vmul.f32 0.5, %v2584_v63  ;;  %v2598_v2 = vmul.f32 %v2590_v54, %v7700_v55  ;;  %v2905_v23 = vld [vmem:[#allocation9 + $0x8] sm:$0xff] }
 0x783   :  { %v6626_v59 = vpop.eup %6625  ;;  %v2587_v52 = vadd.f32 1.0, %v6624_v10  ;;  %v2593_v39 = vmul.f32 0.5, %v2585_v9  ;;  %v2599_v46 = vmul.f32 %v2591_v3, %v7704_v51  ;;  %v2907_v9 = vld [vmem:[#allocation9 + $0x18] sm:$0xff]  ;;  %v2904_v10 = vld [vmem:[#allocation9] sm:$0xff] }
 0x784   :  { %v6628_v35 = vpop.eup %6627  ;;  %v2588_v45 = vadd.f32 1.0, %v6626_v59  ;;  %v2594_v56 = vmul.f32 0.5, %v2586_v11  ;;  %v2600_v24 = vmul.f32 %v2592_v32, %v7708_v33  ;;  %v6230_v3 = vpack.c.bf16 %v2907_v9, %v2905_v23  ;;  %v2906_v11 = vld [vmem:[#allocation9 + $0x10] sm:$0xff]  ;;  %v2909_v59 = vld [vmem:[#allocation9 + $0x28] sm:$0xff]  ;;  %v2931_v23 = vld [vmem:[#allocation9 + $0xd8] sm:$0xff] }
 0x785   :  { %v2589_v27 = vadd.f32 1.0, %v6628_v35  ;;  %v2595_v1 = vmul.f32 0.5, %v2587_v52  ;;  %v2601_v14 = vmul.f32 %v2593_v39, %v7711_v49  ;;  %v2630_v29 = vcombine.low %v2598_v2, %v2599_v46  ;;  %v2911_v52 = vld [vmem:[#allocation9 + $0x38] sm:$0xff]  ;;  %v2908_v2 = vld [vmem:[#allocation9 + $0x20] sm:$0xff]  ;;  %v2910_v46 = vld [vmem:[#allocation9 + $0x30] sm:$0xff] }
 0x786   :  { %v2596_v7 = vmul.f32 0.5, %v2588_v45  ;;  %v2602_v61 = vmul.f32 %v2594_v56, %v7716_v41  ;;  %v7815_v32 = vpack.c.bf16 %v2906_v11, %v2904_v10  ;;  %6231 = vmatprep.subr.bf16.mxu0 %v6230_v3  ;;  %v7818_v39 = vpack.c.bf16 %v2911_v52, %v2909_v59  ;;  %v2913_v45 = vld [vmem:[#allocation9 + $0x48] sm:$0xff]  ;;  %v2915_v56 = vld [vmem:[#allocation9 + $0x58] sm:$0xff]  ;;  %v2928_v9 = vld [vmem:[#allocation9 + $0xc0] sm:$0xff] }
 0x787   :  { %v2597_v58 = vmul.f32 0.5, %v2589_v27  ;;  %v2603_v38 = vmul.f32 %v2595_v1, %v7719_v44  ;;  %v2631_v50 = vcombine.low %v2600_v24, %v2601_v14  ;;  %v2640_v31 = vrot.slane %v2630_v29, %v7173_v37  ;;  %v2912_v27 = vld [vmem:[#allocation9 + $0x40] sm:$0xff]  ;;  %v2914_v1 = vld [vmem:[#allocation9 + $0x50] sm:$0xff]  ;;  %v2917_v29 = vld [vmem:[#allocation9 + $0x68] sm:$0xff] }
 0x788   :  { %v2604_v53 = vmul.f32 %v2596_v7, %v7726_v28  ;;  %6233 = vmatpush1.bf16.msra.mxu0 %v7815_v32  ;;  %v7820_v35 = vpack.c.bf16 %v2910_v46, %v2908_v2  ;;  %v7824_v24 = vpack.c.bf16 %v2915_v56, %v2913_v45  ;;  %v7826_v14 = vpack.c.bf16 %v2914_v1, %v2912_v27  ;;  %v2919_v7 = vld [vmem:[#allocation9 + $0x78] sm:$0xff]  ;;  %v2930_v11 = vld [vmem:[#allocation9 + $0xd0] sm:$0xff]  ;;  %v2933_v59 = vld [vmem:[#allocation9 + $0xe8] sm:$0xff] }
 0x789   :  { %v2605_v48 = vmul.f32 %v2597_v58, %v7730_v30  ;;  %v2632_v40 = vcombine.low %v2602_v61, %v2603_v38  ;;  %v2647_v19 = vrot.slane %v2631_v50, %v7173_v37  ;;  %6235 = vmatprep.subr.bf16.mxu0 %v7818_v39  ;;  %v7830_v58 = vpack.c.bf16 %v2919_v7, %v2917_v29  ;;  %v2916_v61 = vld [vmem:[#allocation9 + $0x60] sm:$0xff]  ;;  %v2918_v38 = vld [vmem:[#allocation9 + $0x70] sm:$0xff]  ;;  %v2935_v52 = vld [vmem:[#allocation9 + $0xf8] sm:$0xff] }
 0x78a   :  { %v7832_v50 = vpack.c.bf16 %v2918_v38, %v2916_v61  ;;  %v7850_v2 = vpack.c.bf16 %v2930_v11, %v2928_v9  ;;  %v7852_v46 = vpack.c.bf16 %v2935_v52, %v2933_v59  ;;  %v2932_v45 = vld [vmem:[#allocation9 + $0xe0] sm:$0xff]  ;;  %v2934_v56 = vld [vmem:[#allocation9 + $0xf0] sm:$0xff]  ;;  %v2510_v1 = vmul.f32 0.5, %v7756_v17 }
 0x78b   :  { %v2633_v12 = vcombine.low %v2604_v53, %v2605_v48  ;;  %v2662_v21 = vcombine.low %v2640_v31, %v2647_v19  ;;  %v2654_v42 = vrot.slane %v2632_v40, %v7173_v37  ;;  %v2921_v31 = vld [vmem:[#allocation9 + $0x88] sm:$0xff]  ;;  %v2923_v53 = vld [vmem:[#allocation9 + $0x98] sm:$0xff]  ;;  %v2920_v40 = vld [vmem:[#allocation9 + $0x80] sm:$0xff]  ;;  %v7856_v27 = vpack.c.bf16 %v2934_v56, %v2932_v45 }
 0x78c   :  { %6237 = vmatpush1.bf16.msra.mxu0 %v7820_v35  ;;  %v7836_v48 = vpack.c.bf16 %v2923_v53, %v2921_v31  ;;  %v2922_v19 = vld [vmem:[#allocation9 + $0x90] sm:$0xff]  ;;  %v2511_v29 = vmul.f32 0.5, %v7761_v4  ;;  %v2512_v7 = vmul.f32 0.5, %v7766_v43  ;;  %v2513_v61 = vmul.f32 0.5, %v7771_v18 }
 0x78d   :  { %v2661_v47 = vrot.slane %v2633_v12, %v7173_v37  ;;  %v2670_v36 = vrot.slane %v2662_v21, %v7173_v37  ;;  %6239 = vmatprep.subr.bf16.mxu0 %v7824_v24  ;;  %v7838_v12 = vpack.c.bf16 %v2922_v19, %v2920_v40  ;;  %v2925_v21 = vld [vmem:[#allocation9 + $0xa8] sm:$0xff]  ;;  %6629 = vtanh.f32 %v2510_v1 }
 0x78e   :  { %v2514_v38 = vmul.f32 0.5, %v7776_v15  ;;  %v2515_v31 = vmul.f32 0.5, %v7782_v22  ;;  %6631 = vtanh.f32 %v2511_v29  ;;  %v2516_v53 = vmul.f32 0.5, %v7788_v62 }
 0x78f   :  { %v2663_v60 = vcombine.low %v2654_v42, %v2661_v47  ;;  %v2927_v42 = vld [vmem:[#allocation9 + $0xb8] sm:$0xff]  ;;  %6633 = vtanh.f32 %v2512_v7  ;;  %v2517_v40 = vmul.f32 0.5, %v7792_v25  ;;  %v2758_v62 = vrot.slane %v7749_v26, 2 }
 0x790   :  { %6241 = vmatpush1.bf16.msra.mxu0 %v7826_v14  ;;  %v7842_v47 = vpack.c.bf16 %v2927_v42, %v2925_v21  ;;  %6635 = vtanh.f32 %v2513_v61  ;;  %v2759_v25 = vrot.slane %v7753_v8, 2  ;;  %v2760_v21 = vrot.slane %v7758_v57, 2 }
 0x791   :  { %v2677_v63 = vrot.slane %v2663_v60, %v7173_v37  ;;  %6243 = vmatprep.subr.bf16.mxu0 %v7830_v58  ;;  %v2924_v60 = vld [vmem:[#allocation9 + $0xa0] sm:$0xff]  ;;  %6637 = vtanh.f32 %v2514_v38  ;;  %v2761_v59 = vrot.slane %v7763_v34, 2  ;;  %v2762_v52 = vrot.slane %v7768_v20, 2 }
 0x792   :  { %6639 = vtanh.f32 %v2515_v31  ;;  %v2763_v7 = vrot.slane %v7773_v5, 2  ;;  %v2764_v61 = vrot.slane %v7779_v13, 2 }
 0x793   :  { %v2678_v54 = vcombine.low %v2670_v36, %v2677_v63  ;;  %v2926_v36 = vld [vmem:[#allocation9 + $0xb0] sm:$0xff]  ;;  %6641 = vtanh.f32 %v2516_v53 }
 0x794   :  { %6245 = vmatpush1.bf16.msra.mxu0 %v7832_v50  ;;  %v7844_v63 = vpack.c.bf16 %v2926_v36, %v2924_v60  ;;  %6643 = vtanh.f32 %v2517_v40 }
 0x795   :  { %5800 = vmatmul.mubr.f32.vlgmr.msra.gmra.mrb[14].mxu1 %v2678_v54  ;;  %6247 = vmatprep.subr.bf16.mxu0 %v7836_v48  ;;  %v2929_v54 = vld [vmem:[#allocation9 + $0xc8] sm:$0xff] }
 0x796   :  { %5834 = vmatprep.mubr.msk.f32.mxu1 %vm6983_vm0, %v6981_v0  ;;  %v7848_v10 = vpack.c.bf16 %v2931_v23, %v2929_v54 }
 0x798   :  { %6249 = vmatpush1.bf16.msra.mxu0 %v7838_v12 }
 0x799   :  { %6251 = vmatprep.subr.bf16.mxu0 %v7842_v47 }
 0x79c   :  { %6253 = vmatpush1.bf16.msra.mxu0 %v7844_v63 }
 0x79d   :  { %6255 = vmatprep.subr.bf16.mxu0 %v7848_v10 }
 0x7a0   :  { %6257 = vmatpush1.bf16.msra.mxu0 %v7850_v2 }
 0x7a1   :  { %6259 = vmatprep.subr.bf16.mxu0 %v7852_v46 }
 0x7a4   :  { %6261 = vmatpush1.bf16.msra.mxu0 %v7856_v27 }
 0x7a5   :  { %6287 = vmatprep.subr.bf16.mxu0 %v6230_v3  ;;  %v6630_v3 = vpop.eup %6629 }
 0x7a6   :  { %v6632_v42 = vpop.eup %6631  ;;  %v2526_v11 = vadd.f32 1.0, %v6630_v3 }
 0x7a7   :  { %v6634_v9 = vpop.eup %6633  ;;  %v2527_v53 = vadd.f32 1.0, %v6632_v42 }
 0x7a8   :  { %v6636_v56 = vpop.eup %6635 }
 0x7a9   :  { %v6638_v29 = vpop.eup %6637 }
 0x7aa   :  { %v6640_v31 = vpop.eup %6639  ;;  %v2530_v5 = vadd.f32 1.0, %v6638_v29 }
 0x7ab   :  { %v6642_v20 = vpop.eup %6641 }
 0x7ac   :  { %v6644_v3 = vpop.eup %6643 }
 0x7ad   :  { %v2533_v42 = vadd.f32 1.0, %v6644_v3 }
 0x868   :  { %v2746_v17 = vpop.f32.mrb[14].mxu1 }
 0x869   :  { %v2775_v4 = vcombine.high %v2746_v17, %v2746_v17  ;;  %v2782_v43 = vrot.slane %v2746_v17, %v7173_v37  ;;  %v5801_v18 = vpop.f32.mrb[15].mxu1 }
 0x86b   :  { %v2789_v15 = vrot.slane %v2775_v4, %v7173_v37  ;;  %v2790_v22 = vcombine.high %v2782_v43, %v2782_v43  ;;  %v2798_v19 = vrot.slane %v2782_v43, %v7173_v37  ;;  %v2528_v4 = vadd.f32 1.0, %v6634_v9 }
 0x86c   :  { %v2765_v43 = vrot.slane %v7785_v16, 2  ;;  %v2538_v16 = vmul.f32 0.5, %v2530_v5 }
 0x86d   :  { %v2791_v60 = vcombine.high %v2789_v15, %v2789_v15  ;;  %v2805_v36 = vrot.slane %v2789_v15, %v7173_v37  ;;  %v2812_v54 = vrot.slane %v2790_v22, %v7173_v37  ;;  %v2820_v23 = vcombine.high %v2798_v19, %v2798_v19 }
 0x86e   :  { %v2832_v45 = vadd.f32 %v2798_v19, %v2758_v62  ;;  %v2529_v15 = vadd.f32 1.0, %v6636_v56  ;;  %v2534_v22 = vmul.f32 0.5, %v2526_v11  ;;  %v2531_v62 = vadd.f32 1.0, %v6640_v31 }
 0x86f   :  { %v2819_v26 = vrot.slane %v2791_v60, %v7173_v37  ;;  %v2821_v8 = vcombine.high %v2805_v36, %v2805_v36  ;;  %v2822_v1 = vcombine.high %v2812_v54, %v2812_v54  ;;  %v2833_v57 = vadd.f32 %v2812_v54, %v2759_v25 }
 0x870   :  { %v2834_v38 = vadd.f32 %v2820_v23, %v2760_v21  ;;  %6645 = vtanh.f32 %v2832_v45  ;;  %v2836_v17 = vadd.f32 %v2805_v36, %v2762_v52  ;;  %v2535_v25 = vmul.f32 0.5, %v2527_v53 }
 0x871   :  { %v2823_v40 = vcombine.high %v2819_v26, %v2819_v26  ;;  %v2835_v34 = vadd.f32 %v2822_v1, %v2761_v59  ;;  %v2837_v18 = vadd.f32 %v2819_v26, %v2763_v7  ;;  %6647 = vtanh.f32 %v2833_v57 }
 0x872   :  { %v2838_v19 = vadd.f32 %v2821_v8, %v2764_v61  ;;  %6649 = vtanh.f32 %v2834_v38  ;;  %v2532_v21 = vadd.f32 1.0, %v6642_v20  ;;  %v2536_v60 = vmul.f32 0.5, %v2528_v4 }
 0x873   :  { %v2839_v13 = vadd.f32 %v2823_v40, %v2765_v43  ;;  %6651 = vtanh.f32 %v2835_v34  ;;  %v2537_v36 = vmul.f32 0.5, %v2529_v15  ;;  %v2848_v54 = vsub.f32 1.0, %v2534_v22 }
 0x874   :  { %6653 = vtanh.f32 %v2836_v17  ;;  %v2539_v23 = vmul.f32 0.5, %v2531_v62  ;;  %v2849_v9 = vsub.f32 1.0, %v2535_v25  ;;  %v2540_v59 = vmul.f32 0.5, %v2532_v21 }
 0x875   :  { %6655 = vtanh.f32 %v2837_v18  ;;  %v2541_v52 = vmul.f32 0.5, %v2533_v42  ;;  %v2850_v45 = vsub.f32 1.0, %v2536_v60  ;;  %v2851_v56 = vsub.f32 1.0, %v2537_v36 }
 0x876   :  { %6657 = vtanh.f32 %v2838_v19  ;;  %v2856_v26 = vmul.f32 %v2848_v54, %v7700_v55  ;;  %v2852_v57 = vsub.f32 1.0, %v2538_v16  ;;  %v2853_v7 = vsub.f32 1.0, %v2539_v23 }
 0x877   :  { %6659 = vtanh.f32 %v2839_v13  ;;  %v2857_v61 = vmul.f32 %v2849_v9, %v7704_v51  ;;  %v2854_v40 = vsub.f32 1.0, %v2540_v59  ;;  %v2855_v34 = vsub.f32 1.0, %v2541_v52 }
 0x878   :  { %v2858_v17 = vmul.f32 %v2850_v45, %v7708_v33  ;;  %v2859_v43 = vmul.f32 %v2851_v56, %v7711_v49  ;;  %v2860_v51 = vmul.f32 %v2852_v57, %v7716_v41  ;;  %v2861_v5 = vmul.f32 %v2853_v7, %v7719_v44  ;;  %v3240_v57 = vld [vmem:[#allocation10 + $0x58] sm:$0xff]  ;;  %v3241_v7 = vld [vmem:[#allocation10 + $0x60] sm:$0xff] }
 0x879   :  { %v2862_v62 = vmul.f32 %v2854_v40, %v7726_v28  ;;  %v3244_v40 = vld [vmem:[#allocation10 + $0x78] sm:$0xff] }
 0x87a   :  { %v6646_v11 = vpop.eup %6645 }
 0x87b   :  { %v2864_v8 = vmul.f32 %v6646_v11, %v2534_v22  ;;  %v6648_v1 = vpop.eup %6647 }
 0x87c   :  { %v6650_v29 = vpop.eup %6649  ;;  %v2865_v38 = vmul.f32 %v6648_v1, %v2535_v25  ;;  %v2863_v25 = vmul.f32 %v2855_v34, %v7730_v30  ;;  %v3239_v1 = vld [vmem:[#allocation10 + $0x50] sm:$0xff] }
 0x87d   :  { %v7884_v31 = vadd.f32 %v2864_v8, %v2856_v26  ;;  %v6652_v53 = vpop.eup %6651  ;;  %v2866_v20 = vmul.f32 %v6650_v29, %v2536_v60  ;;  %v7964_v29 = vpack.c.bf16 %v3240_v57, %v3239_v1 }
 0x87e   :  { %v6654_v4 = vpop.eup %6653  ;;  %v2867_v55 = vmul.f32 %v6652_v53, %v2537_v36  ;;  %v7888_v18 = vadd.f32 %v2865_v38, %v2857_v61  ;;  %v3242_v61 = vld [vmem:[#allocation10 + $0x68] sm:$0xff]  ;;  %v3243_v53 = vld [vmem:[#allocation10 + $0x70] sm:$0xff] }
 0x87f   :  { %2880 = vst [vmem:[#allocation12 + $0x3] sm:$0x1] %v7884_v31  ;;  %v6656_v3 = vpop.eup %6655  ;;  %v2868_v15 = vmul.f32 %v6654_v4, %v2538_v16  ;;  %v7892_v22 = vadd.f32 %v2866_v20, %v2858_v17  ;;  %v7967_v38 = vpack.c.bf16 %v3242_v61, %v3241_v7  ;;  %v7971_v34 = vpack.c.bf16 %v3244_v40, %v3243_v53 }
 0x880   :  { %v6658_v19 = vpop.eup %6657  ;;  %v2869_v13 = vmul.f32 %v6656_v3, %v2539_v23  ;;  %v7895_v33 = vadd.f32 %v2867_v55, %v2859_v43  ;;  %2881 = vst [vmem:[#allocation12 + $0xb] sm:$0x1] %v7888_v18  ;;  %v2944_v44 = vcombine.low %v7884_v31, %v7888_v18 }
 0x881   :  { %v6660_v49 = vpop.eup %6659  ;;  %v2870_v21 = vmul.f32 %v6658_v19, %v2540_v59  ;;  %v7900_v42 = vadd.f32 %v2868_v15, %v2860_v51  ;;  %2882 = vst [vmem:[#allocation12 + $0x13] sm:$0x1] %v7892_v22 }
 0x882   :  { %v2871_v41 = vmul.f32 %v6660_v49, %v2541_v52  ;;  %v7903_v60 = vadd.f32 %v2869_v13, %v2861_v5  ;;  %2883 = vst [vmem:[#allocation12 + $0x1b] sm:$0x1] %v7895_v33  ;;  %v2945_v36 = vcombine.low %v7892_v22, %v7895_v33  ;;  %v2954_v9 = vrot.slane %v2944_v44, %v7173_v37  ;;  %v7980_v13 = vld [vmem:[#allocation3 + $0x4] ss:$8 sm:$0x7] }
 0x883   :  { %v7910_v54 = vadd.f32 %v2870_v21, %v2862_v62  ;;  %2884 = vst [vmem:[#allocation12 + $0x23] sm:$0x1] %v7900_v42  ;;  %v7984_v21 = vld [vmem:[#allocation3 + $0x1c] ss:$8 sm:$0x7] }
 0x884   :  { %2885 = vst [vmem:[#allocation12 + $0x2b] sm:$0x1] %v7903_v60  ;;  %v7914_v28 = vadd.f32 %v2871_v41, %v2863_v25  ;;  %v2946_v30 = vcombine.low %v7900_v42, %v7903_v60  ;;  %v2961_v16 = vrot.slane %v2945_v36, %v7173_v37  ;;  %v7989_v44 = vld [vmem:[#allocation3 + $0x34] ss:$8 sm:$0x7] }
 0x885   :  { %2886 = vst [vmem:[#allocation12 + $0x33] sm:$0x1] %v7910_v54 }
 0x886   :  { %2887 = vst [vmem:[#allocation12 + $0x3b] sm:$0x1] %v7914_v28  ;;  %v2947_v23 = vcombine.low %v7910_v54, %v7914_v28  ;;  %v2968_v11 = vrot.slane %v2946_v30, %v7173_v37  ;;  %v2976_v52 = vcombine.low %v2954_v9, %v2961_v16  ;;  %v7994_v16 = vld [vmem:[#allocation3 + $0x4c] ss:$8 sm:$0x7] }
 0x888   :  { %v2975_v59 = vrot.slane %v2947_v23, %v7173_v37  ;;  %v2984_v56 = vrot.slane %v2976_v52, %v7173_v37 }
 0x88a   :  { %v2977_v45 = vcombine.low %v2968_v11, %v2975_v59  ;;  %v7999_v11 = vld [vmem:[#allocation3 + $0x64] ss:$8 sm:$0x7] }
 0x88c   :  { %v2991_v26 = vrot.slane %v2977_v45, %v7173_v37  ;;  %v8004_v45 = vld [vmem:[#allocation3 + $0x7c] ss:$8 sm:$0x7] }
 0x88e   :  { %v2992_v8 = vcombine.low %v2984_v56, %v2991_v26 }
 0x890   :  { %3059 = vmatmul.mubr.f32.vlgmr.msra.gmra.mrb[24].mxu0 %v2992_v8  ;;  %v8010_v8 = vld [vmem:[#allocation3 + $0x94] ss:$8 sm:$0x7] }
 0x891   :  { %6289 = vmatpush1.bf16.msra.mxu0 %v7815_v32  ;;  %3681 = vmatprep.mubr.f32.mxu0 %v6981_v0  ;;  %v3229_v32 = vld [vmem:[#allocation10] sm:$0xff] }
 0x892   :  { %6291 = vmatprep.subr.bf16.mxu0 %v7818_v39  ;;  %v3230_v39 = vld [vmem:[#allocation10 + $0x8] sm:$0xff] }
 0x895   :  { %6293 = vmatpush1.bf16.msra.mxu0 %v7820_v35  ;;  %v7944_v35 = vpack.c.bf16 %v3230_v39, %v3229_v32 }
 0x896   :  { %6295 = vmatprep.subr.bf16.mxu0 %v7824_v24  ;;  %v3231_v24 = vld [vmem:[#allocation10 + $0x10] sm:$0xff] }
 0x897   :  { %6264 = vmatpush3.bf16.msra.mxu1 %v7944_v35 }
 0x898   :  { %6265 = vmatprep.subr.bf16.mxu1 %v6982_v6 }
 0x899   :  { %6297 = vmatpush1.bf16.msra.mxu0 %v7826_v14  ;;  %v3232_v14 = vld [vmem:[#allocation10 + $0x18] sm:$0xff] }
 0x89a   :  { %6299 = vmatprep.subr.bf16.mxu0 %v7830_v58  ;;  %v7948_v58 = vpack.c.bf16 %v3232_v14, %v3231_v24  ;;  %v8016_v24 = vld [vmem:[#allocation3 + $0xac] ss:$8 sm:$0x7] }
 0x89c   :  { %6267 = vmatpush3.bf16.msra.mxu1 %v7948_v58 }
 0x89d   :  { %6301 = vmatpush1.bf16.msra.mxu0 %v7832_v50  ;;  %6268 = vmatprep.subr.bf16.mxu1 %v6982_v6  ;;  %v3233_v50 = vld [vmem:[#allocation10 + $0x20] sm:$0xff] }
 0x89e   :  { %6303 = vmatprep.subr.bf16.mxu0 %v7836_v48  ;;  %v3234_v48 = vld [vmem:[#allocation10 + $0x28] sm:$0xff] }
 0x8a1   :  { %6305 = vmatpush1.bf16.msra.mxu0 %v7838_v12  ;;  %v7952_v12 = vpack.c.bf16 %v3234_v48, %v3233_v50 }
 0x8a2   :  { %6307 = vmatprep.subr.bf16.mxu0 %v7842_v47  ;;  %v3235_v47 = vld [vmem:[#allocation10 + $0x30] sm:$0xff] }
 0x8a3   :  { %6270 = vmatpush3.bf16.msra.mxu1 %v7952_v12 }
 0x8a4   :  { %6271 = vmatprep.subr.bf16.mxu1 %v6982_v6 }
 0x8a5   :  { %6309 = vmatpush1.bf16.msra.mxu0 %v7844_v63  ;;  %v3236_v63 = vld [vmem:[#allocation10 + $0x38] sm:$0xff] }
 0x8a6   :  { %6311 = vmatprep.subr.bf16.mxu0 %v7848_v10  ;;  %v7956_v10 = vpack.c.bf16 %v3236_v63, %v3235_v47 }
 0x8a8   :  { %6273 = vmatpush3.bf16.msra.mxu1 %v7956_v10 }
 0x8a9   :  { %6313 = vmatpush1.bf16.msra.mxu0 %v7850_v2  ;;  %6274 = vmatprep.subr.bf16.mxu1 %v6982_v6  ;;  %v3237_v2 = vld [vmem:[#allocation10 + $0x40] sm:$0xff] }
 0x8aa   :  { %6315 = vmatprep.subr.bf16.mxu0 %v7852_v46  ;;  %v3238_v46 = vld [vmem:[#allocation10 + $0x48] sm:$0xff] }
 0x8ad   :  { %6317 = vmatpush1.bf16.msra.mxu0 %v7856_v27  ;;  %v7960_v27 = vpack.c.bf16 %v3238_v46, %v3237_v2 }
 0x8af   :  { %6276 = vmatpush3.bf16.msra.mxu1 %v7960_v27 }
 0x8b0   :  { %6277 = vmatprep.subr.bf16.mxu1 %v6982_v6 }
 0x8b3   :  { %6279 = vmatpush3.bf16.msra.mxu1 %v7964_v29 }
 0x8b4   :  { %6280 = vmatprep.subr.bf16.mxu1 %v6982_v6 }
 0x8b7   :  { %6282 = vmatpush3.bf16.msra.mxu1 %v7967_v38 }
 0x8b8   :  { %6283 = vmatprep.subr.bf16.mxu1 %v6982_v6 }
 0x8bb   :  { %6285 = vmatpush3.bf16.msra.mxu1 %v7971_v34 }
 0x8bc   :  { %6318 = vmatprep.subr.bf16.mxu1 %v6982_v6 }
 0x963   :  { %v3060_v17 = vpop.f32.mrb[24].mxu0 }
 0x964   :  { %v3062_v20 = vpop.f32.mrb[25].mxu0 }
 0x965   :  { %v3067_v4 = vcombine.low %v3060_v17, %v3062_v20  ;;  %v3068_v43 = vcombine.high %v3060_v17, %v3062_v20 }
 0x967   :  { %v3075_v55 = vrot.slane %v3067_v4, %v7173_v37  ;;  %v3082_v3 = vrot.slane %v3068_v43, %v7173_v37 }
 0x969   :  { %v3083_v51 = vcombine.high %v3075_v55, %v3075_v55  ;;  %v3084_v15 = vcombine.high %v3082_v3, %v3082_v3  ;;  %v3091_v19 = vrot.slane %v3075_v55, %v7173_v37  ;;  %v3098_v5 = vrot.slane %v3082_v3, %v7173_v37 }
 0x96b   :  { %v3105_v49 = vrot.slane %v3083_v51, %v7173_v37  ;;  %v3112_v62 = vrot.slane %v3084_v15, %v7173_v37  ;;  %v3113_v25 = vcombine.high %v3091_v19, %v3091_v19  ;;  %v7987_v41 = vadd.f32 %v3091_v19, %v7980_v13 }
 0x96c   :  { %v3114_v23 = vcombine.high %v3098_v5, %v3098_v5  ;;  %v8007_v56 = vadd.f32 %v3098_v5, %v7999_v11 }
 0x96d   :  { %v3115_v36 = vcombine.high %v3105_v49, %v3105_v49  ;;  %v7992_v30 = vadd.f32 %v3105_v49, %v7984_v21  ;;  %v7997_v9 = vadd.f32 %v3113_v25, %v7989_v44  ;;  %v3116_v59 = vcombine.high %v3112_v62, %v3112_v62 }
 0x96e   :  { %v3173_v26 = vrot.slane %v7987_v41, 1  ;;  %v8013_v32 = vadd.f32 %v3112_v62, %v8004_v45  ;;  %v8019_v14 = vadd.f32 %v3114_v23, %v8010_v8  ;;  %v3177_v63 = vrot.slane %v8007_v56, 1 }
 0x96f   :  { %v8002_v52 = vadd.f32 %v3115_v36, %v7994_v16  ;;  %v3174_v39 = vrot.slane %v7992_v30, 1  ;;  %v3175_v50 = vrot.slane %v7997_v9, 1  ;;  %v8023_v48 = vadd.f32 %v3116_v59, %v8016_v24 }
 0x970   :  { %v3189_v2 = vmul.f32 0.5, %v3173_v26  ;;  %v3178_v46 = vrot.slane %v8013_v32, 1  ;;  %v3179_v57 = vrot.slane %v8019_v14, 1  ;;  %v3193_v40 = vmul.f32 0.5, %v3177_v63 }
 0x971   :  { %v3176_v47 = vrot.slane %v8002_v52, 1  ;;  %v3190_v1 = vmul.f32 0.5, %v3174_v39  ;;  %v3191_v7 = vmul.f32 0.5, %v3175_v50  ;;  %v3180_v61 = vrot.slane %v8023_v48, 1 }
 0x972   :  { %6661 = vtanh.f32 %v3189_v2  ;;  %v3194_v17 = vmul.f32 0.5, %v3178_v46  ;;  %v3195_v20 = vmul.f32 0.5, %v3179_v57 }
 0x973   :  { %v3192_v53 = vmul.f32 0.5, %v3176_v47  ;;  %6663 = vtanh.f32 %v3190_v1  ;;  %v3196_v4 = vmul.f32 0.5, %v3180_v61 }
 0x974   :  { %6665 = vtanh.f32 %v3191_v7 }
 0x975   :  { %6667 = vtanh.f32 %v3192_v53 }
 0x976   :  { %6669 = vtanh.f32 %v3193_v40 }
 0x977   :  { %6671 = vtanh.f32 %v3194_v17 }
 0x978   :  { %6673 = vtanh.f32 %v3195_v20 }
 0x979   :  { %6675 = vtanh.f32 %v3196_v4 }
 0x97c   :  { %v6662_v43 = vpop.eup %6661 }
 0x97d   :  { %v6664_v55 = vpop.eup %6663  ;;  %v3205_v3 = vadd.f32 1.0, %v6662_v43 }
 0x97e   :  { %v6666_v51 = vpop.eup %6665  ;;  %v3206_v15 = vadd.f32 1.0, %v6664_v55 }
 0x97f   :  { %v6668_v19 = vpop.eup %6667  ;;  %v3207_v5 = vadd.f32 1.0, %v6666_v51  ;;  %v3213_v49 = vmul.f32 0.5, %v3205_v3 }
 0x980   :  { %v6670_v62 = vpop.eup %6669  ;;  %v3208_v25 = vadd.f32 1.0, %v6668_v19  ;;  %v3214_v36 = vmul.f32 0.5, %v3206_v15 }
 0x981   :  { %v6672_v23 = vpop.eup %6671  ;;  %v3209_v59 = vadd.f32 1.0, %v6670_v62  ;;  %v3215_v26 = vmul.f32 0.5, %v3207_v5  ;;  %v3221_v63 = vmul.f32 %v3213_v49, %v7884_v31 }
 0x982   :  { %v6674_v39 = vpop.eup %6673  ;;  %v3210_v50 = vadd.f32 1.0, %v6672_v23  ;;  %v3216_v47 = vmul.f32 0.5, %v3208_v25  ;;  %v3222_v2 = vmul.f32 %v3214_v36, %v7888_v18 }
 0x983   :  { %v6676_v46 = vpop.eup %6675  ;;  %v3211_v1 = vadd.f32 1.0, %v6674_v39  ;;  %v3217_v57 = vmul.f32 0.5, %v3209_v59  ;;  %v3223_v7 = vmul.f32 %v3215_v26, %v7892_v22 }
 0x984   :  { %v3212_v61 = vadd.f32 1.0, %v6676_v46  ;;  %v3218_v53 = vmul.f32 0.5, %v3210_v50  ;;  %v3224_v40 = vmul.f32 %v3216_v47, %v7895_v33  ;;  %v3253_v17 = vcombine.low %v3221_v63, %v3222_v2 }
 0x985   :  { %v3219_v20 = vmul.f32 0.5, %v3211_v1  ;;  %v3225_v43 = vmul.f32 %v3217_v57, %v7900_v42  ;;  %v3383_v2 = vrot.slane %v7989_v44, 2 }
 0x986   :  { %v3220_v4 = vmul.f32 0.5, %v3212_v61  ;;  %v3226_v55 = vmul.f32 %v3218_v53, %v7903_v60  ;;  %v3254_v3 = vcombine.low %v3223_v7, %v3224_v40  ;;  %v3263_v51 = vrot.slane %v3253_v17, %v7173_v37 }
 0x987   :  { %v3227_v15 = vmul.f32 %v3219_v20, %v7910_v54  ;;  %v3384_v17 = vrot.slane %v7994_v16, 2  ;;  %v3385_v20 = vrot.slane %v7999_v11, 2 }
 0x988   :  { %v3228_v19 = vmul.f32 %v3220_v4, %v7914_v28  ;;  %v3255_v5 = vcombine.low %v3225_v43, %v3226_v55  ;;  %v3270_v49 = vrot.slane %v3254_v3, %v7173_v37 }
 0x98a   :  { %v3256_v62 = vcombine.low %v3227_v15, %v3228_v19  ;;  %v3285_v25 = vcombine.low %v3263_v51, %v3270_v49  ;;  %v3277_v36 = vrot.slane %v3255_v5, %v7173_v37  ;;  %v3386_v51 = vrot.slane %v8004_v45, 2 }
 0x98b   :  { %v3387_v15 = vrot.slane %v8010_v8, 2 }
 0x98c   :  { %v3284_v23 = vrot.slane %v3256_v62, %v7173_v37  ;;  %v3293_v26 = vrot.slane %v3285_v25, %v7173_v37 }
 0x98e   :  { %v3286_v59 = vcombine.low %v3277_v36, %v3284_v23  ;;  %v3388_v23 = vrot.slane %v8016_v24, 2 }
 0x990   :  { %v3300_v39 = vrot.slane %v3286_v59, %v7173_v37 }
 0x992   :  { %v3301_v50 = vcombine.low %v3293_v26, %v3300_v39 }
 0x994   :  { %5835 = vmatmul.mubr.f32.vlgmr.msra.gmra.mrb[16].mxu1 %v3301_v50 }
 0x995   :  { %6320 = vmatpush3.bf16.msra.mxu1 %v7944_v35  ;;  %5869 = vmatprep.mubr.msk.f32.mxu1 %vm6983_vm0, %v6981_v0  ;;  %v3133_v35 = vmul.f32 0.5, %v7987_v41 }
 0x996   :  { %6321 = vmatprep.subr.bf16.mxu1 %v6982_v6 }
 0x997   :  { %6677 = vtanh.f32 %v3133_v35 }
 0x999   :  { %6323 = vmatpush3.bf16.msra.mxu1 %v7948_v58  ;;  %v3134_v58 = vmul.f32 0.5, %v7992_v30 }
 0x99a   :  { %6324 = vmatprep.subr.bf16.mxu1 %v6982_v6 }
 0x99b   :  { %6679 = vtanh.f32 %v3134_v58 }
 0x99d   :  { %6326 = vmatpush3.bf16.msra.mxu1 %v7952_v12  ;;  %v3135_v12 = vmul.f32 0.5, %v7997_v9 }
 0x99e   :  { %6327 = vmatprep.subr.bf16.mxu1 %v6982_v6 }
 0x99f   :  { %6681 = vtanh.f32 %v3135_v12 }
 0x9a1   :  { %6329 = vmatpush3.bf16.msra.mxu1 %v7956_v10  ;;  %v3136_v10 = vmul.f32 0.5, %v8002_v52  ;;  %v6678_v47 = vpop.eup %6677 }
 0x9a2   :  { %6330 = vmatprep.subr.bf16.mxu1 %v6982_v6  ;;  %v3149_v40 = vadd.f32 1.0, %v6678_v47 }
 0x9a3   :  { %6683 = vtanh.f32 %v3136_v10 }
 0x9a4   :  { %v3157_v50 = vmul.f32 0.5, %v3149_v40 }
 0x9a5   :  { %6332 = vmatpush3.bf16.msra.mxu1 %v7960_v27  ;;  %v3137_v27 = vmul.f32 0.5, %v8007_v56  ;;  %v6680_v46 = vpop.eup %6679 }
 0x9a6   :  { %6333 = vmatprep.subr.bf16.mxu1 %v6982_v6  ;;  %v3150_v49 = vadd.f32 1.0, %v6680_v46 }
 0x9a7   :  { %6685 = vtanh.f32 %v3137_v27 }
 0x9a8   :  { %v3158_v12 = vmul.f32 0.5, %v3150_v49 }
 0x9a9   :  { %6335 = vmatpush3.bf16.msra.mxu1 %v7964_v29  ;;  %v3138_v29 = vmul.f32 0.5, %v8013_v32  ;;  %v6682_v53 = vpop.eup %6681 }
 0x9aa   :  { %6336 = vmatprep.subr.bf16.mxu1 %v6982_v6  ;;  %v3151_v36 = vadd.f32 1.0, %v6682_v53 }
 0x9ab   :  { %6687 = vtanh.f32 %v3138_v29 }
 0x9ac   :  { %v3159_v29 = vmul.f32 0.5, %v3151_v36 }
 0x9ad   :  { %6338 = vmatpush3.bf16.msra.mxu1 %v7967_v38  ;;  %v3139_v38 = vmul.f32 0.5, %v8019_v14  ;;  %v3381_v14 = vrot.slane %v7980_v13, 2  ;;  %v6684_v43 = vpop.eup %6683 }
 0x9ae   :  { %6339 = vmatprep.subr.bf16.mxu1 %v6982_v6  ;;  %v3152_v39 = vadd.f32 1.0, %v6684_v43 }
 0x9af   :  { %6689 = vtanh.f32 %v3139_v38 }
 0x9b0   :  { %v3160_v38 = vmul.f32 0.5, %v3152_v39 }
 0x9b1   :  { %6341 = vmatpush3.bf16.msra.mxu1 %v7971_v34  ;;  %v3140_v34 = vmul.f32 0.5, %v8023_v48  ;;  %v3382_v48 = vrot.slane %v7984_v21, 2  ;;  %v6686_v3 = vpop.eup %6685 }
 0x9b2   :  { %6374 = vmatprep.subr.bf16.mxu1 %v6982_v6  ;;  %v3153_v45 = vadd.f32 1.0, %v6686_v3 }
 0x9b3   :  { %6691 = vtanh.f32 %v3140_v34  ;;  %v3471_v34 = vsub.f32 1.0, %v3157_v50 }
 0x9b4   :  { %v3161_v24 = vmul.f32 0.5, %v3153_v45 }
 0x9b5   :  { %v6688_v5 = vpop.eup %6687 }
 0x9b6   :  { %v3154_v58 = vadd.f32 1.0, %v6688_v5 }
 0x9b9   :  { %v6690_v11 = vpop.eup %6689 }
 0x9ba   :  { %v3155_v10 = vadd.f32 1.0, %v6690_v11 }
 0x9bd   :  { %v6692_v26 = vpop.eup %6691 }
 0x9be   :  { %v3156_v27 = vadd.f32 1.0, %v6692_v26 }
 0x9c0   :  { %v3164_v47 = vmul.f32 0.5, %v3156_v27 }
 0xa67   :  { %v3369_v41 = vpop.f32.mrb[16].mxu1 }
 0xa68   :  { %v3398_v30 = vcombine.high %v3369_v41, %v3369_v41  ;;  %v3405_v9 = vrot.slane %v3369_v41, %v7173_v37  ;;  %v5836_v52 = vpop.f32.mrb[17].mxu1  ;;  %v3162_v41 = vmul.f32 0.5, %v3154_v58 }
 0xa69   :  { %v3163_v52 = vmul.f32 0.5, %v3155_v10 }
 0xa6a   :  { %v3412_v56 = vrot.slane %v3398_v30, %v7173_v37  ;;  %v3413_v32 = vcombine.high %v3405_v9, %v3405_v9  ;;  %v3421_v63 = vrot.slane %v3405_v9, %v7173_v37  ;;  %v3472_v30 = vsub.f32 1.0, %v3158_v12 }
 0xa6b   :  { %v3477_v40 = vsub.f32 1.0, %v3163_v52 }
 0xa6c   :  { %v3414_v1 = vcombine.high %v3412_v56, %v3412_v56  ;;  %v3428_v57 = vrot.slane %v3412_v56, %v7173_v37  ;;  %v3435_v7 = vrot.slane %v3413_v32, %v7173_v37  ;;  %v3443_v61 = vcombine.high %v3421_v63, %v3421_v63 }
 0xa6d   :  { %v3455_v4 = vadd.f32 %v3421_v63, %v3381_v14  ;;  %v3473_v56 = vsub.f32 1.0, %v3159_v29  ;;  %v3474_v32 = vsub.f32 1.0, %v3160_v38  ;;  %v3479_v63 = vmul.f32 %v3471_v34, %v7884_v31 }
 0xa6e   :  { %v3442_v13 = vrot.slane %v3414_v1, %v7173_v37  ;;  %v3444_v21 = vcombine.high %v3428_v57, %v3428_v57  ;;  %v3445_v55 = vcombine.high %v3435_v7, %v3435_v7  ;;  %v3456_v44 = vadd.f32 %v3435_v7, %v3382_v48 }
 0xa6f   :  { %v3457_v19 = vadd.f32 %v3443_v61, %v3383_v2  ;;  %6693 = vtanh.f32 %v3455_v4  ;;  %v3459_v25 = vadd.f32 %v3428_v57, %v3385_v20  ;;  %v3475_v2 = vsub.f32 1.0, %v3161_v24 }
 0xa70   :  { %v3446_v62 = vcombine.high %v3442_v13, %v3442_v13  ;;  %v3458_v16 = vadd.f32 %v3445_v55, %v3384_v17  ;;  %v3460_v59 = vadd.f32 %v3442_v13, %v3386_v51  ;;  %6695 = vtanh.f32 %v3456_v44 }
 0xa71   :  { %v3461_v35 = vadd.f32 %v3444_v21, %v3387_v15  ;;  %6697 = vtanh.f32 %v3457_v19  ;;  %v3476_v1 = vsub.f32 1.0, %v3162_v41  ;;  %v3480_v57 = vmul.f32 %v3472_v30, %v7888_v18 }
 0xa72   :  { %v3462_v8 = vadd.f32 %v3446_v62, %v3388_v23  ;;  %6699 = vtanh.f32 %v3458_v16  ;;  %v3478_v17 = vsub.f32 1.0, %v3164_v47  ;;  %v3481_v20 = vmul.f32 %v3473_v56, %v7892_v22 }
 0xa73   :  { %6701 = vtanh.f32 %v3459_v25  ;;  %v3482_v13 = vmul.f32 %v3474_v32, %v7895_v33  ;;  %v3483_v18 = vmul.f32 %v3475_v2, %v7900_v42  ;;  %v3484_v15 = vmul.f32 %v3476_v1, %v7903_v60  ;;  %v8144_v2 = vld [vmem:[#allocation3 + $0x35] ss:$8 sm:$0x7] }
 0xa74   :  { %6703 = vtanh.f32 %v3460_v59  ;;  %v3485_v5 = vmul.f32 %v3477_v40, %v7910_v54  ;;  %v3486_v49 = vmul.f32 %v3478_v17, %v7914_v28  ;;  %v8154_v40 = vld [vmem:[#allocation3 + $0x65] ss:$8 sm:$0x7] }
 0xa75   :  { %6705 = vtanh.f32 %v3461_v35 }
 0xa76   :  { %6707 = vtanh.f32 %v3462_v8 }
 0xa79   :  { %v6694_v9 = vpop.eup %6693 }
 0xa7a   :  { %v3487_v14 = vmul.f32 %v6694_v9, %v3157_v50  ;;  %v6696_v48 = vpop.eup %6695 }
 0xa7b   :  { %v6698_v46 = vpop.eup %6697  ;;  %v3488_v7 = vmul.f32 %v6696_v48, %v3158_v12 }
 0xa7c   :  { %v8086_v61 = vadd.f32 %v3487_v14, %v3479_v63  ;;  %v6700_v53 = vpop.eup %6699  ;;  %v3489_v4 = vmul.f32 %v6698_v46, %v3159_v29  ;;  %v8139_v14 = vld [vmem:[#allocation3 + $0x1d] ss:$8 sm:$0x7] }
 0xa7d   :  { %v6702_v43 = vpop.eup %6701  ;;  %v3490_v31 = vmul.f32 %v6700_v53, %v3160_v38  ;;  %v8090_v21 = vadd.f32 %v3488_v7, %v3480_v57  ;;  %v8149_v57 = vld [vmem:[#allocation3 + $0x4d] ss:$8 sm:$0x7] }
 0xa7e   :  { %3503 = vst [vmem:[#allocation12 + $0x4] sm:$0x1] %v8086_v61  ;;  %v6704_v55 = vpop.eup %6703  ;;  %v3491_v44 = vmul.f32 %v6702_v43, %v3161_v24  ;;  %v8094_v3 = vadd.f32 %v3489_v4, %v3481_v20  ;;  %v8159_v4 = vld [vmem:[#allocation3 + $0x7d] ss:$8 sm:$0x7] }
 0xa7f   :  { %v6706_v51 = vpop.eup %6705  ;;  %v3492_v19 = vmul.f32 %v6704_v55, %v3162_v41  ;;  %v8097_v22 = vadd.f32 %v3490_v31, %v3482_v13  ;;  %3504 = vst [vmem:[#allocation12 + $0xc] sm:$0x1] %v8090_v21  ;;  %v3567_v60 = vcombine.low %v8086_v61, %v8090_v21  ;;  %v8165_v31 = vld [vmem:[#allocation3 + $0x95] ss:$8 sm:$0x7] }
 0xa80   :  { %v6708_v33 = vpop.eup %6707  ;;  %v3493_v62 = vmul.f32 %v6706_v51, %v3163_v52  ;;  %v8102_v16 = vadd.f32 %v3491_v44, %v3483_v18  ;;  %3505 = vst [vmem:[#allocation12 + $0x14] sm:$0x1] %v8094_v3  ;;  %v8171_v44 = vld [vmem:[#allocation3 + $0xad] ss:$8 sm:$0x7] }
 0xa81   :  { %v3494_v42 = vmul.f32 %v6708_v33, %v3164_v47  ;;  %v8105_v25 = vadd.f32 %v3492_v19, %v3484_v15  ;;  %3506 = vst [vmem:[#allocation12 + $0x1c] sm:$0x1] %v8097_v22  ;;  %v3568_v11 = vcombine.low %v8094_v3, %v8097_v22  ;;  %v3577_v26 = vrot.slane %v3567_v60, %v7173_v37  ;;  %v8135_v47 = vld [vmem:[#allocation3 + $0x5] ss:$8 sm:$0x7] }
 0xa82   :  { %v8112_v36 = vadd.f32 %v3493_v62, %v3485_v5  ;;  %3507 = vst [vmem:[#allocation12 + $0x24] sm:$0x1] %v8102_v16 }
 0xa83   :  { %3508 = vst [vmem:[#allocation12 + $0x2c] sm:$0x1] %v8105_v25  ;;  %v8116_v54 = vadd.f32 %v3494_v42, %v3486_v49  ;;  %v3569_v28 = vcombine.low %v8102_v16, %v8105_v25  ;;  %v3584_v23 = vrot.slane %v3568_v11, %v7173_v37 }
 0xa84   :  { %3509 = vst [vmem:[#allocation12 + $0x34] sm:$0x1] %v8112_v36 }
 0xa85   :  { %3510 = vst [vmem:[#allocation12 + $0x3c] sm:$0x1] %v8116_v54  ;;  %v3570_v59 = vcombine.low %v8112_v36, %v8116_v54  ;;  %v3591_v39 = vrot.slane %v3569_v28, %v7173_v37  ;;  %v3599_v35 = vcombine.low %v3577_v26, %v3584_v23 }
 0xa87   :  { %v3598_v50 = vrot.slane %v3570_v59, %v7173_v37  ;;  %v3607_v8 = vrot.slane %v3599_v35, %v7173_v37 }
 0xa89   :  { %v3600_v45 = vcombine.low %v3591_v39, %v3598_v50 }
 0xa8b   :  { %v3614_v58 = vrot.slane %v3600_v45, %v7173_v37 }
 0xa8d   :  { %v3615_v12 = vcombine.low %v3607_v8, %v3614_v58 }
 0xa8f   :  { %3682 = vmatmul.mubr.f32.vlgmr.msra.gmra.mrb[26].mxu0 %v3615_v12 }
 0xa90   :  { %4304 = vmatprep.mubr.f32.mxu0 %v6981_v0 }
 0xb62   :  { %v3683_v10 = vpop.f32.mrb[26].mxu0 }
 0xb63   :  { %v3685_v27 = vpop.f32.mrb[27].mxu0 }
 0xb64   :  { %v3690_v29 = vcombine.low %v3683_v10, %v3685_v27  ;;  %v3691_v38 = vcombine.high %v3683_v10, %v3685_v27 }
 0xb66   :  { %v3698_v34 = vrot.slane %v3690_v29, %v7173_v37  ;;  %v3705_v24 = vrot.slane %v3691_v38, %v7173_v37 }
 0xb68   :  { %v3706_v41 = vcombine.high %v3698_v34, %v3698_v34  ;;  %v3707_v30 = vcombine.high %v3705_v24, %v3705_v24  ;;  %v3714_v9 = vrot.slane %v3698_v34, %v7173_v37  ;;  %v3721_v52 = vrot.slane %v3705_v24, %v7173_v37 }
 0xb6a   :  { %v3728_v56 = vrot.slane %v3706_v41, %v7173_v37  ;;  %v3735_v32 = vrot.slane %v3707_v30, %v7173_v37  ;;  %v3736_v63 = vcombine.high %v3714_v9, %v3714_v9  ;;  %v8142_v48 = vadd.f32 %v3714_v9, %v8135_v47 }
 0xb6b   :  { %v3737_v7 = vcombine.high %v3721_v52, %v3721_v52  ;;  %v8162_v43 = vadd.f32 %v3721_v52, %v8154_v40 }
 0xb6c   :  { %v3738_v46 = vcombine.high %v3728_v56, %v3728_v56  ;;  %v8147_v1 = vadd.f32 %v3728_v56, %v8139_v14  ;;  %v8152_v53 = vadd.f32 %v3736_v63, %v8144_v2  ;;  %v3739_v17 = vcombine.high %v3735_v32, %v3735_v32 }
 0xb6d   :  { %v3796_v13 = vrot.slane %v8142_v48, 1  ;;  %v8168_v55 = vadd.f32 %v3735_v32, %v8159_v4  ;;  %v8174_v51 = vadd.f32 %v3737_v7, %v8165_v31  ;;  %v3800_v5 = vrot.slane %v8162_v43, 1 }
 0xb6e   :  { %v8157_v20 = vadd.f32 %v3738_v46, %v8149_v57  ;;  %v3797_v18 = vrot.slane %v8147_v1, 1  ;;  %v3798_v15 = vrot.slane %v8152_v53, 1  ;;  %v8178_v19 = vadd.f32 %v3739_v17, %v8171_v44 }
 0xb6f   :  { %v3812_v49 = vmul.f32 0.5, %v3796_v13  ;;  %v3801_v62 = vrot.slane %v8168_v55, 1  ;;  %v3802_v60 = vrot.slane %v8174_v51, 1  ;;  %v3816_v59 = vmul.f32 0.5, %v3800_v5 }
 0xb70   :  { %v3799_v33 = vrot.slane %v8157_v20, 1  ;;  %v3813_v42 = vmul.f32 0.5, %v3797_v18  ;;  %v3814_v11 = vmul.f32 0.5, %v3798_v15  ;;  %v3803_v28 = vrot.slane %v8178_v19, 1 }
 0xb71   :  { %6709 = vtanh.f32 %v3812_v49  ;;  %v3817_v26 = vmul.f32 0.5, %v3801_v62  ;;  %v3818_v39 = vmul.f32 0.5, %v3802_v60 }
 0xb72   :  { %v3815_v23 = vmul.f32 0.5, %v3799_v33  ;;  %6711 = vtanh.f32 %v3813_v42  ;;  %v3819_v50 = vmul.f32 0.5, %v3803_v28 }
 0xb73   :  { %6713 = vtanh.f32 %v3814_v11 }
 0xb74   :  { %6715 = vtanh.f32 %v3815_v23 }
 0xb75   :  { %6717 = vtanh.f32 %v3816_v59 }
 0xb76   :  { %6719 = vtanh.f32 %v3817_v26 }
 0xb77   :  { %6721 = vtanh.f32 %v3818_v39 }
 0xb78   :  { %6723 = vtanh.f32 %v3819_v50 }
 0xb7b   :  { %v6710_v35 = vpop.eup %6709 }
 0xb7c   :  { %v6712_v45 = vpop.eup %6711  ;;  %v3828_v8 = vadd.f32 1.0, %v6710_v35 }
 0xb7d   :  { %v6714_v58 = vpop.eup %6713  ;;  %v3829_v12 = vadd.f32 1.0, %v6712_v45 }
 0xb7e   :  { %v6716_v10 = vpop.eup %6715  ;;  %v3830_v27 = vadd.f32 1.0, %v6714_v58  ;;  %v3836_v29 = vmul.f32 0.5, %v3828_v8 }
 0xb7f   :  { %v6718_v38 = vpop.eup %6717  ;;  %v3831_v34 = vadd.f32 1.0, %v6716_v10  ;;  %v3837_v24 = vmul.f32 0.5, %v3829_v12 }
 0xb80   :  { %v6720_v41 = vpop.eup %6719  ;;  %v3832_v30 = vadd.f32 1.0, %v6718_v38  ;;  %v3838_v9 = vmul.f32 0.5, %v3830_v27  ;;  %v3844_v63 = vmul.f32 %v3836_v29, %v8086_v61  ;;  %v4151_v38 = vld [vmem:[#allocation9 + $0x8] sm:$0xff] }
 0xb81   :  { %v6722_v52 = vpop.eup %6721  ;;  %v3833_v56 = vadd.f32 1.0, %v6720_v41  ;;  %v3839_v32 = vmul.f32 0.5, %v3831_v34  ;;  %v3845_v46 = vmul.f32 %v3837_v24, %v8090_v21  ;;  %v4153_v34 = vld [vmem:[#allocation9 + $0x18] sm:$0xff]  ;;  %v4150_v41 = vld [vmem:[#allocation9] sm:$0xff] }
 0xb82   :  { %v6724_v7 = vpop.eup %6723  ;;  %v3834_v17 = vadd.f32 1.0, %v6722_v52  ;;  %v3840_v13 = vmul.f32 0.5, %v3832_v30  ;;  %v3846_v18 = vmul.f32 %v3838_v9, %v8094_v3  ;;  %v6342_v24 = vpack.c.bf16 %v4153_v34, %v4151_v38  ;;  %v4152_v30 = vld [vmem:[#allocation9 + $0x10] sm:$0xff]  ;;  %v4155_v52 = vld [vmem:[#allocation9 + $0x28] sm:$0xff]  ;;  %v4177_v38 = vld [vmem:[#allocation9 + $0xd8] sm:$0xff] }
 0xb83   :  { %v3835_v15 = vadd.f32 1.0, %v6724_v7  ;;  %v3841_v33 = vmul.f32 0.5, %v3833_v56  ;;  %v3847_v5 = vmul.f32 %v3839_v32, %v8097_v22  ;;  %v3876_v49 = vcombine.low %v3844_v63, %v3845_v46  ;;  %v4157_v56 = vld [vmem:[#allocation9 + $0x38] sm:$0xff]  ;;  %v4154_v63 = vld [vmem:[#allocation9 + $0x20] sm:$0xff]  ;;  %v4156_v46 = vld [vmem:[#allocation9 + $0x30] sm:$0xff] }
 0xb84   :  { %v3842_v62 = vmul.f32 0.5, %v3834_v17  ;;  %v3848_v60 = vmul.f32 %v3840_v13, %v8102_v16  ;;  %v8201_v9 = vpack.c.bf16 %v4152_v30, %v4150_v41  ;;  %6343 = vmatprep.subr.bf16.mxu0 %v6342_v24  ;;  %v8204_v32 = vpack.c.bf16 %v4157_v56, %v4155_v52  ;;  %v4159_v17 = vld [vmem:[#allocation9 + $0x48] sm:$0xff]  ;;  %v4161_v13 = vld [vmem:[#allocation9 + $0x58] sm:$0xff]  ;;  %v4174_v34 = vld [vmem:[#allocation9 + $0xc0] sm:$0xff] }
 0xb85   :  { %v3843_v42 = vmul.f32 0.5, %v3835_v15  ;;  %v3849_v11 = vmul.f32 %v3841_v33, %v8105_v25  ;;  %v3877_v28 = vcombine.low %v3846_v18, %v3847_v5  ;;  %v3886_v23 = vrot.slane %v3876_v49, %v7173_v37  ;;  %v4158_v15 = vld [vmem:[#allocation9 + $0x40] sm:$0xff]  ;;  %v4160_v33 = vld [vmem:[#allocation9 + $0x50] sm:$0xff]  ;;  %v4163_v49 = vld [vmem:[#allocation9 + $0x68] sm:$0xff] }
 0xb86   :  { %v3850_v59 = vmul.f32 %v3842_v62, %v8112_v36  ;;  %6345 = vmatpush1.bf16.msra.mxu0 %v8201_v9  ;;  %v8206_v7 = vpack.c.bf16 %v4156_v46, %v4154_v63  ;;  %v8210_v18 = vpack.c.bf16 %v4161_v13, %v4159_v17  ;;  %v8212_v5 = vpack.c.bf16 %v4160_v33, %v4158_v15  ;;  %v4165_v62 = vld [vmem:[#allocation9 + $0x78] sm:$0xff]  ;;  %v4176_v30 = vld [vmem:[#allocation9 + $0xd0] sm:$0xff]  ;;  %v4179_v52 = vld [vmem:[#allocation9 + $0xe8] sm:$0xff] }
 0xb87   :  { %v3851_v26 = vmul.f32 %v3843_v42, %v8116_v54  ;;  %v3878_v39 = vcombine.low %v3848_v60, %v3849_v11  ;;  %v3893_v50 = vrot.slane %v3877_v28, %v7173_v37  ;;  %6347 = vmatprep.subr.bf16.mxu0 %v8204_v32  ;;  %v8216_v42 = vpack.c.bf16 %v4165_v62, %v4163_v49  ;;  %v4162_v60 = vld [vmem:[#allocation9 + $0x60] sm:$0xff]  ;;  %v4164_v11 = vld [vmem:[#allocation9 + $0x70] sm:$0xff]  ;;  %v4181_v56 = vld [vmem:[#allocation9 + $0xf8] sm:$0xff] }
 0xb88   :  { %v8218_v28 = vpack.c.bf16 %v4164_v11, %v4162_v60  ;;  %v8236_v63 = vpack.c.bf16 %v4176_v30, %v4174_v34  ;;  %v8238_v46 = vpack.c.bf16 %v4181_v56, %v4179_v52  ;;  %v4178_v17 = vld [vmem:[#allocation9 + $0xe0] sm:$0xff]  ;;  %v4180_v13 = vld [vmem:[#allocation9 + $0xf0] sm:$0xff]  ;;  %v3756_v33 = vmul.f32 0.5, %v8142_v48 }
 0xb89   :  { %v3879_v35 = vcombine.low %v3850_v59, %v3851_v26  ;;  %v3908_v45 = vcombine.low %v3886_v23, %v3893_v50  ;;  %v3900_v8 = vrot.slane %v3878_v39, %v7173_v37  ;;  %v4167_v23 = vld [vmem:[#allocation9 + $0x88] sm:$0xff]  ;;  %v4169_v59 = vld [vmem:[#allocation9 + $0x98] sm:$0xff]  ;;  %v4166_v39 = vld [vmem:[#allocation9 + $0x80] sm:$0xff]  ;;  %v8242_v15 = vpack.c.bf16 %v4180_v13, %v4178_v17 }
 0xb8a   :  { %6349 = vmatpush1.bf16.msra.mxu0 %v8206_v7  ;;  %v8222_v26 = vpack.c.bf16 %v4169_v59, %v4167_v23  ;;  %v4168_v50 = vld [vmem:[#allocation9 + $0x90] sm:$0xff]  ;;  %v3757_v49 = vmul.f32 0.5, %v8147_v1  ;;  %v3758_v62 = vmul.f32 0.5, %v8152_v53  ;;  %v3759_v60 = vmul.f32 0.5, %v8157_v20 }
 0xb8b   :  { %v3907_v58 = vrot.slane %v3879_v35, %v7173_v37  ;;  %v3916_v10 = vrot.slane %v3908_v45, %v7173_v37  ;;  %6351 = vmatprep.subr.bf16.mxu0 %v8210_v18  ;;  %v8224_v35 = vpack.c.bf16 %v4168_v50, %v4166_v39  ;;  %v4171_v45 = vld [vmem:[#allocation9 + $0xa8] sm:$0xff]  ;;  %6725 = vtanh.f32 %v3756_v33 }
 0xb8c   :  { %v3760_v11 = vmul.f32 0.5, %v8162_v43  ;;  %v3761_v23 = vmul.f32 0.5, %v8168_v55  ;;  %6727 = vtanh.f32 %v3757_v49  ;;  %v3762_v59 = vmul.f32 0.5, %v8174_v51 }
 0xb8d   :  { %v3909_v12 = vcombine.low %v3900_v8, %v3907_v58  ;;  %v4173_v8 = vld [vmem:[#allocation9 + $0xb8] sm:$0xff]  ;;  %6729 = vtanh.f32 %v3758_v62  ;;  %v3763_v39 = vmul.f32 0.5, %v8178_v19  ;;  %v4004_v51 = vrot.slane %v8135_v47, 2 }
 0xb8e   :  { %6353 = vmatpush1.bf16.msra.mxu0 %v8212_v5  ;;  %v8228_v58 = vpack.c.bf16 %v4173_v8, %v4171_v45  ;;  %6731 = vtanh.f32 %v3759_v60  ;;  %v4005_v19 = vrot.slane %v8139_v14, 2  ;;  %v4006_v45 = vrot.slane %v8144_v2, 2 }
 0xb8f   :  { %v3923_v27 = vrot.slane %v3909_v12, %v7173_v37  ;;  %6355 = vmatprep.subr.bf16.mxu0 %v8216_v42  ;;  %v4170_v12 = vld [vmem:[#allocation9 + $0xa0] sm:$0xff]  ;;  %6733 = vtanh.f32 %v3760_v11  ;;  %v4007_v52 = vrot.slane %v8149_v57, 2  ;;  %v4008_v56 = vrot.slane %v8154_v40, 2 }
 0xb90   :  { %6735 = vtanh.f32 %v3761_v23  ;;  %v4009_v62 = vrot.slane %v8159_v4, 2  ;;  %v4010_v60 = vrot.slane %v8165_v31, 2 }
 0xb91   :  { %v3924_v29 = vcombine.low %v3916_v10, %v3923_v27  ;;  %v4172_v10 = vld [vmem:[#allocation9 + $0xb0] sm:$0xff]  ;;  %6737 = vtanh.f32 %v3762_v59 }
 0xb92   :  { %6357 = vmatpush1.bf16.msra.mxu0 %v8218_v28  ;;  %v8230_v27 = vpack.c.bf16 %v4172_v10, %v4170_v12  ;;  %6739 = vtanh.f32 %v3763_v39 }
 0xb93   :  { %5870 = vmatmul.mubr.f32.vlgmr.msra.gmra.mrb[18].mxu1 %v3924_v29  ;;  %6359 = vmatprep.subr.bf16.mxu0 %v8222_v26  ;;  %v4175_v29 = vld [vmem:[#allocation9 + $0xc8] sm:$0xff] }
 0xb94   :  { %5904 = vmatprep.mubr.msk.f32.mxu1 %vm6983_vm0, %v6981_v0  ;;  %v8234_v41 = vpack.c.bf16 %v4177_v38, %v4175_v29 }
 0xb96   :  { %6361 = vmatpush1.bf16.msra.mxu0 %v8224_v35 }
 0xb97   :  { %6363 = vmatprep.subr.bf16.mxu0 %v8228_v58 }
 0xb9a   :  { %6365 = vmatpush1.bf16.msra.mxu0 %v8230_v27 }
 0xb9b   :  { %6367 = vmatprep.subr.bf16.mxu0 %v8234_v41 }
 0xb9e   :  { %6369 = vmatpush1.bf16.msra.mxu0 %v8236_v63 }
 0xb9f   :  { %6371 = vmatprep.subr.bf16.mxu0 %v8238_v46 }
 0xba2   :  { %6373 = vmatpush1.bf16.msra.mxu0 %v8242_v15 }
 0xba3   :  { %6399 = vmatprep.subr.bf16.mxu0 %v6342_v24  ;;  %v6726_v24 = vpop.eup %6725 }
 0xba4   :  { %v6728_v8 = vpop.eup %6727  ;;  %v3772_v30 = vadd.f32 1.0, %v6726_v24 }
 0xba5   :  { %v6730_v34 = vpop.eup %6729  ;;  %v3773_v59 = vadd.f32 1.0, %v6728_v8 }
 0xba6   :  { %v6732_v13 = vpop.eup %6731 }
 0xba7   :  { %v6734_v49 = vpop.eup %6733 }
 0xba8   :  { %v6736_v23 = vpop.eup %6735  ;;  %v3776_v4 = vadd.f32 1.0, %v6734_v49 }
 0xba9   :  { %v6738_v40 = vpop.eup %6737 }
 0xbaa   :  { %v6740_v24 = vpop.eup %6739 }
 0xbab   :  { %v3779_v8 = vadd.f32 1.0, %v6740_v24 }
 0xc66   :  { %v3992_v48 = vpop.f32.mrb[18].mxu1 }
 0xc67   :  { %v4021_v1 = vcombine.high %v3992_v48, %v3992_v48  ;;  %v4028_v53 = vrot.slane %v3992_v48, %v7173_v37  ;;  %v5871_v20 = vpop.f32.mrb[19].mxu1 }
 0xc69   :  { %v4035_v43 = vrot.slane %v4021_v1, %v7173_v37  ;;  %v4036_v55 = vcombine.high %v4028_v53, %v4028_v53  ;;  %v4044_v50 = vrot.slane %v4028_v53, %v7173_v37  ;;  %v3774_v1 = vadd.f32 1.0, %v6730_v34 }
 0xc6a   :  { %v4011_v53 = vrot.slane %v8171_v44, 2  ;;  %v3784_v44 = vmul.f32 0.5, %v3776_v4 }
 0xc6b   :  { %v4037_v12 = vcombine.high %v4035_v43, %v4035_v43  ;;  %v4051_v10 = vrot.slane %v4035_v43, %v7173_v37  ;;  %v4058_v29 = vrot.slane %v4036_v55, %v7173_v37  ;;  %v4066_v38 = vcombine.high %v4044_v50, %v4044_v50 }
 0xc6c   :  { %v4078_v17 = vadd.f32 %v4044_v50, %v4004_v51  ;;  %v3775_v43 = vadd.f32 1.0, %v6732_v13  ;;  %v3780_v55 = vmul.f32 0.5, %v3772_v30  ;;  %v3777_v51 = vadd.f32 1.0, %v6736_v23 }
 0xc6d   :  { %v4065_v47 = vrot.slane %v4037_v12, %v7173_v37  ;;  %v4067_v14 = vcombine.high %v4051_v10, %v4051_v10  ;;  %v4068_v33 = vcombine.high %v4058_v29, %v4058_v29  ;;  %v4079_v2 = vadd.f32 %v4058_v29, %v4005_v19 }
 0xc6e   :  { %v4080_v11 = vadd.f32 %v4066_v38, %v4006_v45  ;;  %6741 = vtanh.f32 %v4078_v17  ;;  %v4082_v48 = vadd.f32 %v4051_v10, %v4008_v56  ;;  %v3781_v19 = vmul.f32 0.5, %v3773_v59 }
 0xc6f   :  { %v4069_v39 = vcombine.high %v4065_v47, %v4065_v47  ;;  %v4081_v57 = vadd.f32 %v4068_v33, %v4007_v52  ;;  %v4083_v20 = vadd.f32 %v4065_v47, %v4009_v62  ;;  %6743 = vtanh.f32 %v4079_v2 }
 0xc70   :  { %v4084_v50 = vadd.f32 %v4067_v14, %v4010_v60  ;;  %6745 = vtanh.f32 %v4080_v11  ;;  %v3778_v45 = vadd.f32 1.0, %v6738_v40  ;;  %v3782_v12 = vmul.f32 0.5, %v3774_v1 }
 0xc71   :  { %v4085_v31 = vadd.f32 %v4069_v39, %v4011_v53  ;;  %6747 = vtanh.f32 %v4081_v57  ;;  %v3783_v10 = vmul.f32 0.5, %v3775_v43  ;;  %v4094_v29 = vsub.f32 1.0, %v3780_v55 }
 0xc72   :  { %6749 = vtanh.f32 %v4082_v48  ;;  %v3785_v38 = vmul.f32 0.5, %v3777_v51  ;;  %v4095_v34 = vsub.f32 1.0, %v3781_v19  ;;  %v3786_v52 = vmul.f32 0.5, %v3778_v45 }
 0xc73   :  { %6751 = vtanh.f32 %v4083_v20  ;;  %v3787_v56 = vmul.f32 0.5, %v3779_v8  ;;  %v4096_v17 = vsub.f32 1.0, %v3782_v12  ;;  %v4097_v13 = vsub.f32 1.0, %v3783_v10 }
 0xc74   :  { %6753 = vtanh.f32 %v4084_v50  ;;  %v4102_v47 = vmul.f32 %v4094_v29, %v8086_v61  ;;  %v4098_v2 = vsub.f32 1.0, %v3784_v44  ;;  %v4099_v62 = vsub.f32 1.0, %v3785_v38 }
 0xc75   :  { %6755 = vtanh.f32 %v4085_v31  ;;  %v4103_v60 = vmul.f32 %v4095_v34, %v8090_v21  ;;  %v4100_v39 = vsub.f32 1.0, %v3786_v52  ;;  %v4101_v57 = vsub.f32 1.0, %v3787_v56 }
 0xc76   :  { %v4104_v48 = vmul.f32 %v4096_v17, %v8094_v3  ;;  %v4105_v53 = vmul.f32 %v4097_v13, %v8097_v22  ;;  %v4106_v21 = vmul.f32 %v4098_v2, %v8102_v16  ;;  %v4107_v4 = vmul.f32 %v4099_v62, %v8105_v25  ;;  %v4486_v2 = vld [vmem:[#allocation10 + $0x58] sm:$0xff]  ;;  %v4487_v62 = vld [vmem:[#allocation10 + $0x60] sm:$0xff] }
 0xc77   :  { %v4108_v51 = vmul.f32 %v4100_v39, %v8112_v36  ;;  %v4490_v39 = vld [vmem:[#allocation10 + $0x78] sm:$0xff] }
 0xc78   :  { %v6742_v30 = vpop.eup %6741 }
 0xc79   :  { %v4110_v14 = vmul.f32 %v6742_v30, %v3780_v55  ;;  %v6744_v33 = vpop.eup %6743 }
 0xc7a   :  { %v6746_v49 = vpop.eup %6745  ;;  %v4111_v11 = vmul.f32 %v6744_v33, %v3781_v19  ;;  %v4109_v19 = vmul.f32 %v4101_v57, %v8116_v54  ;;  %v4485_v33 = vld [vmem:[#allocation10 + $0x50] sm:$0xff] }
 0xc7b   :  { %v8270_v23 = vadd.f32 %v4110_v14, %v4102_v47  ;;  %v6748_v59 = vpop.eup %6747  ;;  %v4112_v40 = vmul.f32 %v6746_v49, %v3782_v12  ;;  %v8350_v49 = vpack.c.bf16 %v4486_v2, %v4485_v33 }
 0xc7c   :  { %v6750_v1 = vpop.eup %6749  ;;  %v4113_v61 = vmul.f32 %v6748_v59, %v3783_v10  ;;  %v8274_v20 = vadd.f32 %v4111_v11, %v4103_v60  ;;  %v4488_v60 = vld [vmem:[#allocation10 + $0x68] sm:$0xff]  ;;  %v4489_v59 = vld [vmem:[#allocation10 + $0x70] sm:$0xff] }
 0xc7d   :  { %4126 = vst [vmem:[#allocation12 + $0x5] sm:$0x1] %v8270_v23  ;;  %v6752_v24 = vpop.eup %6751  ;;  %v4114_v43 = vmul.f32 %v6750_v1, %v3784_v44  ;;  %v8278_v55 = vadd.f32 %v4112_v40, %v4104_v48  ;;  %v8353_v11 = vpack.c.bf16 %v4488_v60, %v4487_v62  ;;  %v8357_v57 = vpack.c.bf16 %v4490_v39, %v4489_v59 }
 0xc7e   :  { %v6754_v50 = vpop.eup %6753  ;;  %v4115_v31 = vmul.f32 %v6752_v24, %v3785_v38  ;;  %v8281_v3 = vadd.f32 %v4113_v61, %v4105_v53  ;;  %4127 = vst [vmem:[#allocation12 + $0xd] sm:$0x1] %v8274_v20  ;;  %v4190_v25 = vcombine.low %v8270_v23, %v8274_v20 }
 0xc7f   :  { %v6756_v22 = vpop.eup %6755  ;;  %v4116_v45 = vmul.f32 %v6754_v50, %v3786_v52  ;;  %v8286_v8 = vadd.f32 %v4114_v43, %v4106_v21  ;;  %4128 = vst [vmem:[#allocation12 + $0x15] sm:$0x1] %v8278_v55 }
 0xc80   :  { %v4117_v16 = vmul.f32 %v6756_v22, %v3787_v56  ;;  %v8289_v12 = vadd.f32 %v4115_v31, %v4107_v4  ;;  %4129 = vst [vmem:[#allocation12 + $0x1d] sm:$0x1] %v8281_v3  ;;  %v4191_v10 = vcombine.low %v8278_v55, %v8281_v3  ;;  %v4200_v34 = vrot.slane %v4190_v25, %v7173_v37  ;;  %v8366_v31 = vld [vmem:[#allocation3 + $0x6] ss:$8 sm:$0x7] }
 0xc81   :  { %v8296_v29 = vadd.f32 %v4116_v45, %v4108_v51  ;;  %4130 = vst [vmem:[#allocation12 + $0x25] sm:$0x1] %v8286_v8  ;;  %v8370_v45 = vld [vmem:[#allocation3 + $0x1e] ss:$8 sm:$0x7] }
 0xc82   :  { %4131 = vst [vmem:[#allocation12 + $0x2d] sm:$0x1] %v8289_v12  ;;  %v8300_v36 = vadd.f32 %v4117_v16, %v4109_v19  ;;  %v4192_v54 = vcombine.low %v8286_v8, %v8289_v12  ;;  %v4207_v44 = vrot.slane %v4191_v10, %v7173_v37  ;;  %v8375_v25 = vld [vmem:[#allocation3 + $0x36] ss:$8 sm:$0x7] }
 0xc83   :  { %4132 = vst [vmem:[#allocation12 + $0x35] sm:$0x1] %v8296_v29 }
 0xc84   :  { %4133 = vst [vmem:[#allocation12 + $0x3d] sm:$0x1] %v8300_v36  ;;  %v4193_v38 = vcombine.low %v8296_v29, %v8300_v36  ;;  %v4214_v30 = vrot.slane %v4192_v54, %v7173_v37  ;;  %v4222_v56 = vcombine.low %v4200_v34, %v4207_v44  ;;  %v8380_v44 = vld [vmem:[#allocation3 + $0x4e] ss:$8 sm:$0x7] }
 0xc86   :  { %v4221_v52 = vrot.slane %v4193_v38, %v7173_v37  ;;  %v4230_v13 = vrot.slane %v4222_v56, %v7173_v37 }
 0xc88   :  { %v4223_v17 = vcombine.low %v4214_v30, %v4221_v52  ;;  %v8385_v30 = vld [vmem:[#allocation3 + $0x66] ss:$8 sm:$0x7] }
 0xc8a   :  { %v4237_v47 = vrot.slane %v4223_v17, %v7173_v37  ;;  %v8390_v17 = vld [vmem:[#allocation3 + $0x7e] ss:$8 sm:$0x7] }
 0xc8c   :  { %v4238_v14 = vcombine.low %v4230_v13, %v4237_v47 }
 0xc8e   :  { %4305 = vmatmul.mubr.f32.vlgmr.msra.gmra.mrb[28].mxu0 %v4238_v14  ;;  %v8396_v14 = vld [vmem:[#allocation3 + $0x96] ss:$8 sm:$0x7] }
 0xc8f   :  { %6401 = vmatpush1.bf16.msra.mxu0 %v8201_v9  ;;  %4927 = vmatprep.mubr.f32.mxu0 %v6981_v0  ;;  %v4475_v9 = vld [vmem:[#allocation10] sm:$0xff] }
 0xc90   :  { %6403 = vmatprep.subr.bf16.mxu0 %v8204_v32  ;;  %v4476_v32 = vld [vmem:[#allocation10 + $0x8] sm:$0xff] }
 0xc93   :  { %6405 = vmatpush1.bf16.msra.mxu0 %v8206_v7  ;;  %v8330_v7 = vpack.c.bf16 %v4476_v32, %v4475_v9 }
 0xc94   :  { %6407 = vmatprep.subr.bf16.mxu0 %v8210_v18  ;;  %v4477_v18 = vld [vmem:[#allocation10 + $0x10] sm:$0xff] }
 0xc95   :  { %6376 = vmatpush3.bf16.msra.mxu1 %v8330_v7 }
 0xc96   :  { %6377 = vmatprep.subr.bf16.mxu1 %v6982_v6 }
 0xc97   :  { %6409 = vmatpush1.bf16.msra.mxu0 %v8212_v5  ;;  %v4478_v5 = vld [vmem:[#allocation10 + $0x18] sm:$0xff] }
 0xc98   :  { %6411 = vmatprep.subr.bf16.mxu0 %v8216_v42  ;;  %v8334_v42 = vpack.c.bf16 %v4478_v5, %v4477_v18  ;;  %v8402_v18 = vld [vmem:[#allocation3 + $0xae] ss:$8 sm:$0x7] }
 0xc9a   :  { %6379 = vmatpush3.bf16.msra.mxu1 %v8334_v42 }
 0xc9b   :  { %6413 = vmatpush1.bf16.msra.mxu0 %v8218_v28  ;;  %6380 = vmatprep.subr.bf16.mxu1 %v6982_v6  ;;  %v4479_v28 = vld [vmem:[#allocation10 + $0x20] sm:$0xff] }
 0xc9c   :  { %6415 = vmatprep.subr.bf16.mxu0 %v8222_v26  ;;  %v4480_v26 = vld [vmem:[#allocation10 + $0x28] sm:$0xff] }
 0xc9f   :  { %6417 = vmatpush1.bf16.msra.mxu0 %v8224_v35  ;;  %v8338_v35 = vpack.c.bf16 %v4480_v26, %v4479_v28 }
 0xca0   :  { %6419 = vmatprep.subr.bf16.mxu0 %v8228_v58  ;;  %v4481_v58 = vld [vmem:[#allocation10 + $0x30] sm:$0xff] }
 0xca1   :  { %6382 = vmatpush3.bf16.msra.mxu1 %v8338_v35 }
 0xca2   :  { %6383 = vmatprep.subr.bf16.mxu1 %v6982_v6 }
 0xca3   :  { %6421 = vmatpush1.bf16.msra.mxu0 %v8230_v27  ;;  %v4482_v27 = vld [vmem:[#allocation10 + $0x38] sm:$0xff] }
 0xca4   :  { %6423 = vmatprep.subr.bf16.mxu0 %v8234_v41  ;;  %v8342_v41 = vpack.c.bf16 %v4482_v27, %v4481_v58 }
 0xca6   :  { %6385 = vmatpush3.bf16.msra.mxu1 %v8342_v41 }
 0xca7   :  { %6425 = vmatpush1.bf16.msra.mxu0 %v8236_v63  ;;  %6386 = vmatprep.subr.bf16.mxu1 %v6982_v6  ;;  %v4483_v63 = vld [vmem:[#allocation10 + $0x40] sm:$0xff] }
 0xca8   :  { %6427 = vmatprep.subr.bf16.mxu0 %v8238_v46  ;;  %v4484_v46 = vld [vmem:[#allocation10 + $0x48] sm:$0xff] }
 0xcab   :  { %6429 = vmatpush1.bf16.msra.mxu0 %v8242_v15  ;;  %v8346_v15 = vpack.c.bf16 %v4484_v46, %v4483_v63 }
 0xcad   :  { %6388 = vmatpush3.bf16.msra.mxu1 %v8346_v15 }
 0xcae   :  { %6389 = vmatprep.subr.bf16.mxu1 %v6982_v6 }
 0xcb1   :  { %6391 = vmatpush3.bf16.msra.mxu1 %v8350_v49 }
 0xcb2   :  { %6392 = vmatprep.subr.bf16.mxu1 %v6982_v6 }
 0xcb5   :  { %6394 = vmatpush3.bf16.msra.mxu1 %v8353_v11 }
 0xcb6   :  { %6395 = vmatprep.subr.bf16.mxu1 %v6982_v6 }
 0xcb9   :  { %6397 = vmatpush3.bf16.msra.mxu1 %v8357_v57 }
 0xcba   :  { %6430 = vmatprep.subr.bf16.mxu1 %v6982_v6 }
 0xd61   :  { %v4306_v48 = vpop.f32.mrb[28].mxu0 }
 0xd62   :  { %v4308_v40 = vpop.f32.mrb[29].mxu0 }
 0xd63   :  { %v4313_v1 = vcombine.low %v4306_v48, %v4308_v40  ;;  %v4314_v53 = vcombine.high %v4306_v48, %v4308_v40 }
 0xd65   :  { %v4321_v61 = vrot.slane %v4313_v1, %v7173_v37  ;;  %v4328_v24 = vrot.slane %v4314_v53, %v7173_v37 }
 0xd67   :  { %v4329_v21 = vcombine.high %v4321_v61, %v4321_v61  ;;  %v4330_v43 = vcombine.high %v4328_v24, %v4328_v24  ;;  %v4337_v50 = vrot.slane %v4321_v61, %v7173_v37  ;;  %v4344_v4 = vrot.slane %v4328_v24, %v7173_v37 }
 0xd69   :  { %v4351_v22 = vrot.slane %v4329_v21, %v7173_v37  ;;  %v4358_v51 = vrot.slane %v4330_v43, %v7173_v37  ;;  %v4359_v19 = vcombine.high %v4337_v50, %v4337_v50  ;;  %v8373_v16 = vadd.f32 %v4337_v50, %v8366_v31 }
 0xd6a   :  { %v4360_v38 = vcombine.high %v4344_v4, %v4344_v4  ;;  %v8393_v13 = vadd.f32 %v4344_v4, %v8385_v30 }
 0xd6b   :  { %v4361_v10 = vcombine.high %v4351_v22, %v4351_v22  ;;  %v8378_v54 = vadd.f32 %v4351_v22, %v8370_v45  ;;  %v8383_v34 = vadd.f32 %v4359_v19, %v8375_v25  ;;  %v4362_v52 = vcombine.high %v4358_v51, %v4358_v51 }
 0xd6c   :  { %v4419_v47 = vrot.slane %v8373_v16, 1  ;;  %v8399_v9 = vadd.f32 %v4358_v51, %v8390_v17  ;;  %v8405_v5 = vadd.f32 %v4360_v38, %v8396_v14  ;;  %v4423_v27 = vrot.slane %v8393_v13, 1 }
 0xd6d   :  { %v8388_v56 = vadd.f32 %v4361_v10, %v8380_v44  ;;  %v4420_v32 = vrot.slane %v8378_v54, 1  ;;  %v4421_v28 = vrot.slane %v8383_v34, 1  ;;  %v8409_v26 = vadd.f32 %v4362_v52, %v8402_v18 }
 0xd6e   :  { %v4435_v63 = vmul.f32 0.5, %v4419_v47  ;;  %v4424_v46 = vrot.slane %v8399_v9, 1  ;;  %v4425_v2 = vrot.slane %v8405_v5, 1  ;;  %v4439_v39 = vmul.f32 0.5, %v4423_v27 }
 0xd6f   :  { %v4422_v58 = vrot.slane %v8388_v56, 1  ;;  %v4436_v33 = vmul.f32 0.5, %v4420_v32  ;;  %v4437_v62 = vmul.f32 0.5, %v4421_v28  ;;  %v4426_v60 = vrot.slane %v8409_v26, 1 }
 0xd70   :  { %6757 = vtanh.f32 %v4435_v63  ;;  %v4440_v48 = vmul.f32 0.5, %v4424_v46  ;;  %v4441_v40 = vmul.f32 0.5, %v4425_v2 }
 0xd71   :  { %v4438_v59 = vmul.f32 0.5, %v4422_v58  ;;  %6759 = vtanh.f32 %v4436_v33  ;;  %v4442_v1 = vmul.f32 0.5, %v4426_v60 }
 0xd72   :  { %6761 = vtanh.f32 %v4437_v62 }
 0xd73   :  { %6763 = vtanh.f32 %v4438_v59 }
 0xd74   :  { %6765 = vtanh.f32 %v4439_v39 }
 0xd75   :  { %6767 = vtanh.f32 %v4440_v48 }
 0xd76   :  { %6769 = vtanh.f32 %v4441_v40 }
 0xd77   :  { %6771 = vtanh.f32 %v4442_v1 }
 0xd7a   :  { %v6758_v53 = vpop.eup %6757 }
 0xd7b   :  { %v6760_v61 = vpop.eup %6759  ;;  %v4451_v24 = vadd.f32 1.0, %v6758_v53 }
 0xd7c   :  { %v6762_v21 = vpop.eup %6761  ;;  %v4452_v43 = vadd.f32 1.0, %v6760_v61 }
 0xd7d   :  { %v6764_v50 = vpop.eup %6763  ;;  %v4453_v4 = vadd.f32 1.0, %v6762_v21  ;;  %v4459_v22 = vmul.f32 0.5, %v4451_v24 }
 0xd7e   :  { %v6766_v51 = vpop.eup %6765  ;;  %v4454_v19 = vadd.f32 1.0, %v6764_v50  ;;  %v4460_v10 = vmul.f32 0.5, %v4452_v43 }
 0xd7f   :  { %v6768_v38 = vpop.eup %6767  ;;  %v4455_v52 = vadd.f32 1.0, %v6766_v51  ;;  %v4461_v47 = vmul.f32 0.5, %v4453_v4  ;;  %v4467_v27 = vmul.f32 %v4459_v22, %v8270_v23 }
 0xd80   :  { %v6770_v32 = vpop.eup %6769  ;;  %v4456_v28 = vadd.f32 1.0, %v6768_v38  ;;  %v4462_v58 = vmul.f32 0.5, %v4454_v19  ;;  %v4468_v63 = vmul.f32 %v4460_v10, %v8274_v20 }
 0xd81   :  { %v6772_v46 = vpop.eup %6771  ;;  %v4457_v33 = vadd.f32 1.0, %v6770_v32  ;;  %v4463_v2 = vmul.f32 0.5, %v4455_v52  ;;  %v4469_v62 = vmul.f32 %v4461_v47, %v8278_v55 }
 0xd82   :  { %v4458_v60 = vadd.f32 1.0, %v6772_v46  ;;  %v4464_v59 = vmul.f32 0.5, %v4456_v28  ;;  %v4470_v39 = vmul.f32 %v4462_v58, %v8281_v3  ;;  %v4499_v48 = vcombine.low %v4467_v27, %v4468_v63 }
 0xd83   :  { %v4465_v40 = vmul.f32 0.5, %v4457_v33  ;;  %v4471_v53 = vmul.f32 %v4463_v2, %v8286_v8  ;;  %v4629_v58 = vrot.slane %v8375_v25, 2 }
 0xd84   :  { %v4466_v1 = vmul.f32 0.5, %v4458_v60  ;;  %v4472_v61 = vmul.f32 %v4464_v59, %v8289_v12  ;;  %v4500_v24 = vcombine.low %v4469_v62, %v4470_v39  ;;  %v4509_v21 = vrot.slane %v4499_v48, %v7173_v37 }
 0xd85   :  { %v4473_v43 = vmul.f32 %v4465_v40, %v8296_v29  ;;  %v4630_v59 = vrot.slane %v8380_v44, 2  ;;  %v4631_v39 = vrot.slane %v8385_v30, 2 }
 0xd86   :  { %v4474_v50 = vmul.f32 %v4466_v1, %v8300_v36  ;;  %v4501_v4 = vcombine.low %v4471_v53, %v4472_v61  ;;  %v4516_v22 = vrot.slane %v4500_v24, %v7173_v37  ;;  %v4632_v61 = vrot.slane %v8390_v17, 2 }
 0xd87   :  { %v4633_v24 = vrot.slane %v8396_v14, 2 }
 0xd88   :  { %v4502_v51 = vcombine.low %v4473_v43, %v4474_v50  ;;  %v4531_v19 = vcombine.low %v4509_v21, %v4516_v22  ;;  %v4523_v10 = vrot.slane %v4501_v4, %v7173_v37 }
 0xd8a   :  { %v4530_v38 = vrot.slane %v4502_v51, %v7173_v37  ;;  %v4539_v47 = vrot.slane %v4531_v19, %v7173_v37  ;;  %v4634_v19 = vrot.slane %v8402_v18, 2 }
 0xd8c   :  { %v4532_v52 = vcombine.low %v4523_v10, %v4530_v38 }
 0xd8e   :  { %v4546_v32 = vrot.slane %v4532_v52, %v7173_v37 }
 0xd90   :  { %v4547_v28 = vcombine.low %v4539_v47, %v4546_v32 }
 0xd92   :  { %5905 = vmatmul.mubr.f32.vlgmr.msra.gmra.mrb[20].mxu1 %v4547_v28 }
 0xd93   :  { %6432 = vmatpush3.bf16.msra.mxu1 %v8330_v7  ;;  %5939 = vmatprep.mubr.msk.f32.mxu1 %vm6983_vm0, %v6981_v0  ;;  %v4379_v0 = vmul.f32 0.5, %v8373_v16  ;;  %v4380_v7 = vmul.f32 0.5, %v8378_v54 }
 0xd94   :  { %6433 = vmatprep.subr.bf16.mxu1 %v6982_v6 }
 0xd95   :  { %6773 = vtanh.f32 %v4379_v0 }
 0xd96   :  { %6775 = vtanh.f32 %v4380_v7 }
 0xd97   :  { %6435 = vmatpush3.bf16.msra.mxu1 %v8334_v42  ;;  %v4381_v42 = vmul.f32 0.5, %v8383_v34 }
 0xd98   :  { %6436 = vmatprep.subr.bf16.mxu1 %v6982_v6 }
 0xd99   :  { %6777 = vtanh.f32 %v4381_v42 }
 0xd9b   :  { %6438 = vmatpush3.bf16.msra.mxu1 %v8338_v35  ;;  %v4382_v35 = vmul.f32 0.5, %v8388_v56 }
 0xd9c   :  { %6439 = vmatprep.subr.bf16.mxu1 %v6982_v6 }
 0xd9d   :  { %6779 = vtanh.f32 %v4382_v35 }
 0xd9f   :  { %6441 = vmatpush3.bf16.msra.mxu1 %v8342_v41  ;;  %v4383_v41 = vmul.f32 0.5, %v8393_v13  ;;  %v6774_v34 = vpop.eup %6773 }
 0xda0   :  { %6442 = vmatprep.subr.bf16.mxu1 %v6982_v6  ;;  %v6776_v27 = vpop.eup %6775  ;;  %v4395_v60 = vadd.f32 1.0, %v6774_v34 }
 0xda1   :  { %6781 = vtanh.f32 %v4383_v41  ;;  %v4396_v50 = vadd.f32 1.0, %v6776_v27 }
 0xda2   :  { %v4403_v47 = vmul.f32 0.5, %v4395_v60 }
 0xda3   :  { %6444 = vmatpush3.bf16.msra.mxu1 %v8346_v15  ;;  %v4384_v15 = vmul.f32 0.5, %v8399_v9  ;;  %v6778_v62 = vpop.eup %6777  ;;  %v4404_v0 = vmul.f32 0.5, %v4396_v50 }
 0xda4   :  { %6445 = vmatprep.subr.bf16.mxu1 %v6982_v6  ;;  %v4397_v51 = vadd.f32 1.0, %v6778_v62 }
 0xda5   :  { %6783 = vtanh.f32 %v4384_v15  ;;  %v4717_v15 = vsub.f32 1.0, %v4403_v47 }
 0xda6   :  { %v4405_v35 = vmul.f32 0.5, %v4397_v51 }
 0xda7   :  { %6447 = vmatpush3.bf16.msra.mxu1 %v8350_v49  ;;  %v4385_v49 = vmul.f32 0.5, %v8405_v5  ;;  %v4627_v5 = vrot.slane %v8366_v31, 2  ;;  %v6780_v40 = vpop.eup %6779 }
 0xda8   :  { %6448 = vmatprep.subr.bf16.mxu1 %v6982_v6  ;;  %v4398_v52 = vadd.f32 1.0, %v6780_v40 }
 0xda9   :  { %6785 = vtanh.f32 %v4385_v49 }
 0xdaa   :  { %v4406_v41 = vmul.f32 0.5, %v4398_v52 }
 0xdab   :  { %6450 = vmatpush3.bf16.msra.mxu1 %v8353_v11  ;;  %v6782_v53 = vpop.eup %6781 }
 0xdac   :  { %6451 = vmatprep.subr.bf16.mxu1 %v6982_v6  ;;  %v4386_v6 = vmul.f32 0.5, %v8409_v26  ;;  %v4628_v26 = vrot.slane %v8370_v45, 2  ;;  %v4399_v17 = vadd.f32 1.0, %v6782_v53  ;;  %v4720_v34 = vsub.f32 1.0, %v4406_v41 }
 0xdae   :  { %6787 = vtanh.f32 %v4386_v6  ;;  %v4407_v18 = vmul.f32 0.5, %v4399_v17  ;;  %v4718_v6 = vsub.f32 1.0, %v4404_v0 }
 0xdaf   :  { %6453 = vmatpush3.bf16.msra.mxu1 %v8357_v57  ;;  %v6784_v43 = vpop.eup %6783 }
 0xdb0   :  { %v4400_v28 = vadd.f32 1.0, %v6784_v43  ;;  %v4726_v27 = vmul.f32 %v4718_v6, %v8274_v20 }
 0xdb2   :  { %v4408_v49 = vmul.f32 0.5, %v4400_v28 }
 0xdb3   :  { %v6786_v30 = vpop.eup %6785 }
 0xdb4   :  { %v4401_v7 = vadd.f32 1.0, %v6786_v30 }
 0xdb8   :  { %v6788_v38 = vpop.eup %6787 }
 0xdb9   :  { %v4402_v42 = vadd.f32 1.0, %v6788_v38 }
 0xe65   :  { %v4615_v11 = vpop.f32.mrb[20].mxu1 }
 0xe66   :  { %v4644_v57 = vcombine.high %v4615_v11, %v4615_v11  ;;  %v4651_v16 = vrot.slane %v4615_v11, %v7173_v37  ;;  %v5906_v54 = vpop.f32.mrb[21].mxu1 }
 0xe67   :  { %v4719_v54 = vsub.f32 1.0, %v4405_v35 }
 0xe68   :  { %v4658_v56 = vrot.slane %v4644_v57, %v7173_v37  ;;  %v4659_v13 = vcombine.high %v4651_v16, %v4651_v16  ;;  %v4667_v9 = vrot.slane %v4651_v16, %v7173_v37  ;;  %v4409_v57 = vmul.f32 0.5, %v4401_v7 }
 0xe69   :  { %v4410_v16 = vmul.f32 0.5, %v4402_v42  ;;  %v4727_v60 = vmul.f32 %v4719_v54, %v8278_v55 }
 0xe6a   :  { %v4660_v63 = vcombine.high %v4658_v56, %v4658_v56  ;;  %v4674_v46 = vrot.slane %v4658_v56, %v7173_v37  ;;  %v4681_v33 = vrot.slane %v4659_v13, %v7173_v37  ;;  %v4689_v2 = vcombine.high %v4667_v9, %v4667_v9 }
 0xe6b   :  { %v4701_v48 = vadd.f32 %v4667_v9, %v4627_v5  ;;  %v4725_v56 = vmul.f32 %v4717_v15, %v8270_v23  ;;  %v4721_v5 = vsub.f32 1.0, %v4407_v18  ;;  %v4724_v62 = vsub.f32 1.0, %v4410_v16 }
 0xe6c   :  { %v4688_v31 = vrot.slane %v4660_v63, %v7173_v37  ;;  %v4690_v45 = vcombine.high %v4674_v46, %v4674_v46  ;;  %v4691_v1 = vcombine.high %v4681_v33, %v4681_v33  ;;  %v4702_v25 = vadd.f32 %v4681_v33, %v4628_v26 }
 0xe6d   :  { %v4703_v21 = vadd.f32 %v4689_v2, %v4629_v58  ;;  %6789 = vtanh.f32 %v4701_v48  ;;  %v4705_v22 = vadd.f32 %v4674_v46, %v4631_v39  ;;  %v4722_v58 = vsub.f32 1.0, %v4408_v49 }
 0xe6e   :  { %v4692_v4 = vcombine.high %v4688_v31, %v4688_v31  ;;  %v4704_v44 = vadd.f32 %v4691_v1, %v4630_v59  ;;  %v4706_v10 = vadd.f32 %v4688_v31, %v4632_v61  ;;  %6791 = vtanh.f32 %v4702_v25 }
 0xe6f   :  { %v4707_v32 = vadd.f32 %v4690_v45, %v4633_v24  ;;  %6793 = vtanh.f32 %v4703_v21  ;;  %v4723_v2 = vsub.f32 1.0, %v4409_v57  ;;  %v4728_v48 = vmul.f32 %v4720_v34, %v8281_v3  ;;  %v8523_v34 = vld [vmem:[#allocation3 + $0x1f] ss:$8 sm:$0x7] }
 0xe70   :  { %v4708_v14 = vadd.f32 %v4692_v4, %v4634_v19  ;;  %6795 = vtanh.f32 %v4704_v44  ;;  %v4729_v20 = vmul.f32 %v4721_v5, %v8286_v8  ;;  %v4730_v53 = vmul.f32 %v4722_v58, %v8289_v12 }
 0xe71   :  { %6797 = vtanh.f32 %v4705_v22  ;;  %v4731_v24 = vmul.f32 %v4723_v2, %v8296_v29  ;;  %v4732_v21 = vmul.f32 %v4724_v62, %v8300_v36  ;;  %v8543_v62 = vld [vmem:[#allocation3 + $0x7f] ss:$8 sm:$0x7] }
 0xe72   :  { %6799 = vtanh.f32 %v4706_v10 }
 0xe73   :  { %6801 = vtanh.f32 %v4707_v32 }
 0xe74   :  { %6803 = vtanh.f32 %v4708_v14 }
 0xe77   :  { %v6790_v11 = vpop.eup %6789 }
 0xe78   :  { %v4733_v13 = vmul.f32 %v6790_v11, %v4403_v47  ;;  %v6792_v9 = vpop.eup %6791  ;;  %v8519_v11 = vld [vmem:[#allocation3 + $0x7] ss:$8 sm:$0x7] }
 0xe79   :  { %v6794_v26 = vpop.eup %6793  ;;  %v4734_v63 = vmul.f32 %v6792_v9, %v4404_v0 }
 0xe7a   :  { %v8471_v46 = vadd.f32 %v4733_v13, %v4725_v56  ;;  %v6796_v33 = vpop.eup %6795  ;;  %v4735_v59 = vmul.f32 %v6794_v26, %v4405_v35  ;;  %v8528_v13 = vld [vmem:[#allocation3 + $0x37] ss:$8 sm:$0x7] }
 0xe7b   :  { %v6798_v39 = vpop.eup %6797  ;;  %v4736_v23 = vmul.f32 %v6796_v33, %v4406_v41  ;;  %v8475_v40 = vadd.f32 %v4734_v63, %v4726_v27  ;;  %v8533_v26 = vld [vmem:[#allocation3 + $0x4f] ss:$8 sm:$0x7] }
 0xe7c   :  { %4749 = vst [vmem:[#allocation12 + $0x6] sm:$0x1] %v8471_v46  ;;  %v6800_v31 = vpop.eup %6799  ;;  %v4737_v45 = vmul.f32 %v6798_v39, %v4407_v18  ;;  %v8479_v1 = vadd.f32 %v4735_v59, %v4727_v60  ;;  %v8538_v63 = vld [vmem:[#allocation3 + $0x67] ss:$8 sm:$0x7] }
 0xe7d   :  { %v6802_v25 = vpop.eup %6801  ;;  %v4738_v61 = vmul.f32 %v6800_v31, %v4408_v49  ;;  %v8482_v55 = vadd.f32 %v4736_v23, %v4728_v48  ;;  %4750 = vst [vmem:[#allocation12 + $0xe] sm:$0x1] %v8475_v40  ;;  %v4813_v12 = vcombine.low %v8471_v46, %v8475_v40  ;;  %v8549_v39 = vld [vmem:[#allocation3 + $0x97] ss:$8 sm:$0x7] }
 0xe7e   :  { %v6804_v3 = vpop.eup %6803  ;;  %v4739_v43 = vmul.f32 %v6802_v25, %v4409_v57  ;;  %v8487_v50 = vadd.f32 %v4737_v45, %v4729_v20  ;;  %4751 = vst [vmem:[#allocation12 + $0x16] sm:$0x1] %v8479_v1  ;;  %v8555_v31 = vld [vmem:[#allocation3 + $0xaf] ss:$8 sm:$0x7] }
 0xe7f   :  { %v4740_v8 = vmul.f32 %v6804_v3, %v4410_v16  ;;  %v8490_v4 = vadd.f32 %v4738_v61, %v4730_v53  ;;  %4752 = vst [vmem:[#allocation12 + $0x1e] sm:$0x1] %v8482_v55  ;;  %v4814_v44 = vcombine.low %v8479_v1, %v8482_v55  ;;  %v4823_v19 = vrot.slane %v4813_v12, %v7173_v37 }
 0xe80   :  { %v8497_v22 = vadd.f32 %v4739_v43, %v4731_v24  ;;  %4753 = vst [vmem:[#allocation12 + $0x26] sm:$0x1] %v8487_v50 }
 0xe81   :  { %4754 = vst [vmem:[#allocation12 + $0x2e] sm:$0x1] %v8490_v4  ;;  %v8501_v29 = vadd.f32 %v4740_v8, %v4732_v21  ;;  %v4815_v36 = vcombine.low %v8487_v50, %v8490_v4  ;;  %v4830_v30 = vrot.slane %v4814_v44, %v7173_v37 }
 0xe82   :  { %4755 = vst [vmem:[#allocation12 + $0x36] sm:$0x1] %v8497_v22 }
 0xe83   :  { %4756 = vst [vmem:[#allocation12 + $0x3e] sm:$0x1] %v8501_v29  ;;  %v4816_v51 = vcombine.low %v8497_v22, %v8501_v29  ;;  %v4837_v10 = vrot.slane %v4815_v36, %v7173_v37  ;;  %v4845_v52 = vcombine.low %v4823_v19, %v4830_v30 }
 0xe85   :  { %v4844_v38 = vrot.slane %v4816_v51, %v7173_v37  ;;  %v4853_v32 = vrot.slane %v4845_v52, %v7173_v37 }
 0xe87   :  { %v4846_v47 = vcombine.low %v4837_v10, %v4844_v38 }
 0xe89   :  { %v4860_v17 = vrot.slane %v4846_v47, %v7173_v37 }
 0xe8b   :  { %v4861_v14 = vcombine.low %v4853_v32, %v4860_v17 }
 0xe8d   :  { %4928 = vmatmul.mubr.f32.vlgmr.msra.gmra.mrb[30].mxu0 %v4861_v14 }
 0xf60   :  { %v4929_v28 = vpop.f32.mrb[30].mxu0 }
 0xf61   :  { %v4931_v0 = vpop.f32.mrb[31].mxu0 }
 0xf62   :  { %v4936_v7 = vcombine.low %v4929_v28, %v4931_v0  ;;  %v4937_v42 = vcombine.high %v4929_v28, %v4931_v0 }
 0xf64   :  { %v4944_v35 = vrot.slane %v4936_v7, %v7173_v37  ;;  %v4951_v41 = vrot.slane %v4937_v42, %v7173_v37 }
 0xf66   :  { %v4952_v15 = vcombine.high %v4944_v35, %v4944_v35  ;;  %v4953_v18 = vcombine.high %v4951_v41, %v4951_v41  ;;  %v4960_v49 = vrot.slane %v4944_v35, %v7173_v37  ;;  %v4967_v6 = vrot.slane %v4951_v41, %v7173_v37 }
 0xf68   :  { %v4974_v57 = vrot.slane %v4952_v15, %v7173_v37  ;;  %v4981_v16 = vrot.slane %v4953_v18, %v7173_v37  ;;  %v4982_v54 = vcombine.high %v4960_v49, %v4960_v49  ;;  %v8526_v56 = vadd.f32 %v4960_v49, %v8519_v11 }
 0xf69   :  { %v4983_v58 = vcombine.high %v4967_v6, %v4967_v6  ;;  %v8546_v60 = vadd.f32 %v4967_v6, %v8538_v63 }
 0xf6a   :  { %v4984_v9 = vcombine.high %v4974_v57, %v4974_v57  ;;  %v8531_v5 = vadd.f32 %v4974_v57, %v8523_v34  ;;  %v8536_v27 = vadd.f32 %v4982_v54, %v8528_v13  ;;  %v4985_v33 = vcombine.high %v4981_v16, %v4981_v16 }
 0xf6b   :  { %v5042_v59 = vrot.slane %v8526_v56, 1  ;;  %v8552_v48 = vadd.f32 %v4981_v16, %v8543_v62  ;;  %v8558_v20 = vadd.f32 %v4983_v58, %v8549_v39  ;;  %v5046_v61 = vrot.slane %v8546_v60, 1 }
 0xf6c   :  { %v8541_v2 = vadd.f32 %v4984_v9, %v8533_v26  ;;  %v5043_v23 = vrot.slane %v8531_v5, 1  ;;  %v5044_v45 = vrot.slane %v8536_v27, 1  ;;  %v8562_v25 = vadd.f32 %v4985_v33, %v8555_v31 }
 0xf6d   :  { %v5058_v3 = vmul.f32 0.5, %v5042_v59  ;;  %v5047_v24 = vrot.slane %v8552_v48, 1  ;;  %v5048_v43 = vrot.slane %v8558_v20, 1  ;;  %v5062_v36 = vmul.f32 0.5, %v5046_v61 }
 0xf6e   :  { %v5045_v53 = vrot.slane %v8541_v2, 1  ;;  %v5059_v21 = vmul.f32 0.5, %v5043_v23  ;;  %v5060_v8 = vmul.f32 0.5, %v5044_v45  ;;  %v5049_v12 = vrot.slane %v8562_v25, 1 }
 0xf6f   :  { %6805 = vtanh.f32 %v5058_v3  ;;  %v5063_v30 = vmul.f32 0.5, %v5047_v24  ;;  %v5064_v51 = vmul.f32 0.5, %v5048_v43 }
 0xf70   :  { %v5061_v44 = vmul.f32 0.5, %v5045_v53  ;;  %6807 = vtanh.f32 %v5059_v21  ;;  %v5065_v19 = vmul.f32 0.5, %v5049_v12 }
 0xf71   :  { %6809 = vtanh.f32 %v5060_v8 }
 0xf72   :  { %6811 = vtanh.f32 %v5061_v44 }
 0xf73   :  { %6813 = vtanh.f32 %v5062_v36 }
 0xf74   :  { %6815 = vtanh.f32 %v5063_v30 }
 0xf75   :  { %6817 = vtanh.f32 %v5064_v51 }
 0xf76   :  { %6819 = vtanh.f32 %v5065_v19 }
 0xf79   :  { %v6806_v10 = vpop.eup %6805 }
 0xf7a   :  { %v6808_v38 = vpop.eup %6807  ;;  %v5074_v52 = vadd.f32 1.0, %v6806_v10 }
 0xf7b   :  { %v6810_v47 = vpop.eup %6809  ;;  %v5075_v32 = vadd.f32 1.0, %v6808_v38 }
 0xf7c   :  { %v6812_v17 = vpop.eup %6811  ;;  %v5076_v14 = vadd.f32 1.0, %v6810_v47  ;;  %v5082_v28 = vmul.f32 0.5, %v5074_v52 }
 0xf7d   :  { %v6814_v0 = vpop.eup %6813  ;;  %v5077_v7 = vadd.f32 1.0, %v6812_v17  ;;  %v5083_v42 = vmul.f32 0.5, %v5075_v32 }
 0xf7e   :  { %v6816_v35 = vpop.eup %6815  ;;  %v5078_v41 = vadd.f32 1.0, %v6814_v0  ;;  %v5084_v15 = vmul.f32 0.5, %v5076_v14  ;;  %v5090_v57 = vmul.f32 %v5082_v28, %v8471_v46  ;;  %v5002_v14 = vmul.f32 0.5, %v8526_v56 }
 0xf7f   :  { %v6818_v18 = vpop.eup %6817  ;;  %v5079_v49 = vadd.f32 1.0, %v6816_v35  ;;  %v5085_v6 = vmul.f32 0.5, %v5077_v7  ;;  %v5091_v16 = vmul.f32 %v5083_v42, %v8475_v40  ;;  %v5003_v28 = vmul.f32 0.5, %v8531_v5 }
 0xf80   :  { %v6820_v54 = vpop.eup %6819  ;;  %v5080_v9 = vadd.f32 1.0, %v6818_v18  ;;  %v5086_v58 = vmul.f32 0.5, %v5078_v41  ;;  %v5092_v33 = vmul.f32 %v5084_v15, %v8479_v1  ;;  %v5004_v0 = vmul.f32 0.5, %v8536_v27 }
 0xf81   :  { %v5081_v59 = vadd.f32 1.0, %v6820_v54  ;;  %v5087_v23 = vmul.f32 0.5, %v5079_v49  ;;  %v5093_v45 = vmul.f32 %v5085_v6, %v8482_v55  ;;  %v5122_v53 = vcombine.low %v5090_v57, %v5091_v16 }
 0xf82   :  { %v5088_v61 = vmul.f32 0.5, %v5080_v9  ;;  %v5094_v24 = vmul.f32 %v5086_v58, %v8487_v50  ;;  %6821 = vtanh.f32 %v5002_v14  ;;  %v5005_v7 = vmul.f32 0.5, %v8541_v2 }
 0xf83   :  { %v5089_v3 = vmul.f32 0.5, %v5081_v59  ;;  %v5095_v21 = vmul.f32 %v5087_v23, %v8490_v4  ;;  %v5123_v43 = vcombine.low %v5092_v33, %v5093_v45  ;;  %v5132_v8 = vrot.slane %v5122_v53, %v7173_v37 }
 0xf84   :  { %v5096_v12 = vmul.f32 %v5088_v61, %v8497_v22  ;;  %v5006_v42 = vmul.f32 0.5, %v8546_v60  ;;  %v5007_v35 = vmul.f32 0.5, %v8552_v48  ;;  %6823 = vtanh.f32 %v5003_v28 }
 0xf85   :  { %v5097_v44 = vmul.f32 %v5089_v3, %v8501_v29  ;;  %v5124_v36 = vcombine.low %v5094_v24, %v5095_v21  ;;  %v5139_v30 = vrot.slane %v5123_v43, %v7173_v37  ;;  %v5008_v41 = vmul.f32 0.5, %v8558_v20 }
 0xf86   :  { %6825 = vtanh.f32 %v5004_v0  ;;  %v5009_v15 = vmul.f32 0.5, %v8562_v25  ;;  %v5254_v20 = vrot.slane %v8538_v63, 2  ;;  %v5250_v25 = vrot.slane %v8519_v11, 2 }
 0xf87   :  { %v5125_v51 = vcombine.low %v5096_v12, %v5097_v44  ;;  %v5154_v19 = vcombine.low %v5132_v8, %v5139_v30  ;;  %v5146_v10 = vrot.slane %v5124_v36, %v7173_v37  ;;  %6827 = vtanh.f32 %v5005_v7 }
 0xf88   :  { %6829 = vtanh.f32 %v5006_v42  ;;  %v5251_v6 = vrot.slane %v8523_v34, 2  ;;  %v5252_v59 = vrot.slane %v8528_v13, 2  ;;  %v5253_v23 = vrot.slane %v8533_v26, 2 }
 0xf89   :  { %v5153_v38 = vrot.slane %v5125_v51, %v7173_v37  ;;  %v5162_v47 = vrot.slane %v5154_v19, %v7173_v37  ;;  %6831 = vtanh.f32 %v5007_v35  ;;  %v5255_v24 = vrot.slane %v8543_v62, 2 }
 0xf8a   :  { %6833 = vtanh.f32 %v5008_v41  ;;  %v5256_v21 = vrot.slane %v8549_v39, 2  ;;  %v5257_v51 = vrot.slane %v8555_v31, 2 }
 0xf8b   :  { %v5155_v52 = vcombine.low %v5146_v10, %v5153_v38  ;;  %6835 = vtanh.f32 %v5009_v15 }
 0xf8c   :  { %v6822_v2 = vpop.eup %6821 }
 0xf8d   :  { %v5169_v32 = vrot.slane %v5155_v52, %v7173_v37  ;;  %v5018_v33 = vadd.f32 1.0, %v6822_v2 }
 0xf8e   :  { %v6824_v58 = vpop.eup %6823 }
 0xf8f   :  { %v5170_v17 = vcombine.low %v5162_v47, %v5169_v32  ;;  %v5019_v12 = vadd.f32 1.0, %v6824_v58  ;;  %v5026_v38 = vmul.f32 0.5, %v5018_v33 }
 0xf90   :  { %v6826_v53 = vpop.eup %6825 }
 0xf91   :  { %5940 = vmatmul.mubr.f32.vlgmr.msra.gmra.mrb[22].mxu1 %v5170_v17  ;;  %v6828_v34 = vpop.eup %6827  ;;  %v5020_v30 = vadd.f32 1.0, %v6826_v53  ;;  %v5027_v17 = vmul.f32 0.5, %v5019_v12  ;;  %v5340_v31 = vsub.f32 1.0, %v5026_v38 }
 0xf92   :  { %v6830_v8 = vpop.eup %6829  ;;  %v5021_v10 = vadd.f32 1.0, %v6828_v34 }
 0xf93   :  { %v6832_v26 = vpop.eup %6831  ;;  %v5022_v39 = vadd.f32 1.0, %v6830_v8  ;;  %v5028_v28 = vmul.f32 0.5, %v5020_v30  ;;  %v5341_v41 = vsub.f32 1.0, %v5027_v17  ;;  %v5348_v2 = vmul.f32 %v5340_v31, %v8471_v46 }
 0xf94   :  { %v6834_v19 = vpop.eup %6833  ;;  %v5023_v32 = vadd.f32 1.0, %v6832_v26  ;;  %v5029_v7 = vmul.f32 0.5, %v5021_v10 }
 0xf95   :  { %v6836_v62 = vpop.eup %6835  ;;  %v5024_v14 = vadd.f32 1.0, %v6834_v19  ;;  %v5030_v42 = vmul.f32 0.5, %v5022_v39 }
 0xf96   :  { %v5025_v0 = vadd.f32 1.0, %v6836_v62  ;;  %v5031_v35 = vmul.f32 0.5, %v5023_v32 }
0x1064   :  { %v5238_v56 = vpop.f32.mrb[22].mxu1 }
0x1065   :  { %v5267_v5 = vcombine.high %v5238_v56, %v5238_v56  ;;  %v5274_v27 = vrot.slane %v5238_v56, %v7173_v37  ;;  %v5941_v18 = vpop.f32.mrb[23].mxu1  ;;  %v5032_v56 = vmul.f32 0.5, %v5024_v14 }
0x1066   :  { %v5343_v18 = vsub.f32 1.0, %v5029_v7 }
0x1067   :  { %v5281_v60 = vrot.slane %v5267_v5, %v7173_v37  ;;  %v5282_v48 = vcombine.high %v5274_v27, %v5274_v27  ;;  %v5290_v49 = vrot.slane %v5274_v27, %v7173_v37  ;;  %v5342_v5 = vsub.f32 1.0, %v5028_v28 }
0x1068   :  { %v5033_v27 = vmul.f32 0.5, %v5025_v0 }
0x1069   :  { %v5283_v57 = vcombine.high %v5281_v60, %v5281_v60  ;;  %v5297_v16 = vrot.slane %v5281_v60, %v7173_v37  ;;  %v5304_v54 = vrot.slane %v5282_v48, %v7173_v37  ;;  %v5312_v9 = vcombine.high %v5290_v49, %v5290_v49 }
0x106a   :  { %v5324_v45 = vadd.f32 %v5290_v49, %v5250_v25  ;;  %v5344_v49 = vsub.f32 1.0, %v5030_v42  ;;  %v5345_v25 = vsub.f32 1.0, %v5031_v35  ;;  %v5350_v58 = vmul.f32 %v5342_v5, %v8479_v1 }
0x106b   :  { %v5311_v63 = vrot.slane %v5283_v57, %v7173_v37  ;;  %v5313_v61 = vcombine.high %v5297_v16, %v5297_v16  ;;  %v5314_v11 = vcombine.high %v5304_v54, %v5304_v54  ;;  %v5325_v3 = vadd.f32 %v5304_v54, %v5251_v6 }
0x106c   :  { %v5326_v43 = vadd.f32 %v5312_v9, %v5252_v59  ;;  %6837 = vtanh.f32 %v5324_v45  ;;  %v5328_v36 = vadd.f32 %v5297_v16, %v5254_v20  ;;  %v5349_v6 = vmul.f32 %v5341_v41, %v8475_v40 }
0x106d   :  { %v5315_v44 = vcombine.high %v5311_v63, %v5311_v63  ;;  %v5327_v13 = vadd.f32 %v5314_v11, %v5253_v23  ;;  %v5329_v37 = vadd.f32 %v5311_v63, %v5255_v24  ;;  %6839 = vtanh.f32 %v5325_v3 }
0x106e   :  { %v5330_v52 = vadd.f32 %v5313_v61, %v5256_v21  ;;  %6841 = vtanh.f32 %v5326_v43  ;;  %v5346_v9 = vsub.f32 1.0, %v5032_v56  ;;  %v5347_v23 = vsub.f32 1.0, %v5033_v27 }
0x106f   :  { %v5331_v47 = vadd.f32 %v5315_v44, %v5257_v51  ;;  %6843 = vtanh.f32 %v5327_v13  ;;  %v5351_v45 = vmul.f32 %v5343_v18, %v8482_v55  ;;  %v5352_v61 = vmul.f32 %v5344_v49, %v8487_v50 }
0x1070   :  { %6845 = vtanh.f32 %v5328_v36  ;;  %v5353_v34 = vmul.f32 %v5345_v25, %v8490_v4  ;;  %v5354_v43 = vmul.f32 %v5346_v9, %v8497_v22  ;;  %v5355_v55 = vmul.f32 %v5347_v23, %v8501_v29 }
0x1071   :  { %6847 = vtanh.f32 %v5329_v37 }
0x1072   :  { %6849 = vtanh.f32 %v5330_v52 }
0x1073   :  { %6851 = vtanh.f32 %v5331_v47 }
0x1076   :  { %v6838_v15 = vpop.eup %6837 }
0x1077   :  { %v5356_v60 = vmul.f32 %v6838_v15, %v5026_v38  ;;  %v6840_v48 = vpop.eup %6839 }
0x1078   :  { %v6842_v20 = vpop.eup %6841  ;;  %v5357_v57 = vmul.f32 %v6840_v48, %v5027_v17 }
0x1079   :  { %v5364_v16 = vadd.f32 %v5356_v60, %v5348_v2  ;;  %v6844_v54 = vpop.eup %6843  ;;  %v5358_v33 = vmul.f32 %v6842_v20, %v5028_v28 }
0x107a   :  { %v6846_v59 = vpop.eup %6845  ;;  %v5359_v53 = vmul.f32 %v6844_v54, %v5029_v7  ;;  %v5365_v46 = vadd.f32 %v5357_v57, %v5349_v6 }
0x107b   :  { %5372 = vst [vmem:[#allocation12 + $0x7] sm:$0x1] %v5364_v16  ;;  %v6848_v63 = vpop.eup %6847  ;;  %v5360_v11 = vmul.f32 %v6846_v59, %v5030_v42  ;;  %v5366_v3 = vadd.f32 %v5358_v33, %v5350_v58 }
0x107c   :  { %v6850_v40 = vpop.eup %6849  ;;  %v5361_v24 = vmul.f32 %v6848_v63, %v5031_v35  ;;  %v5367_v21 = vadd.f32 %v5359_v53, %v5351_v45  ;;  %5373 = vst [vmem:[#allocation12 + $0xf] sm:$0x1] %v5365_v46 }
0x107d   :  { %v6852_v1 = vpop.eup %6851  ;;  %v5362_v8 = vmul.f32 %v6850_v40, %v5032_v56  ;;  %v5368_v12 = vadd.f32 %v5360_v11, %v5352_v61  ;;  %5374 = vst [vmem:[#allocation12 + $0x17] sm:$0x1] %v5366_v3 }
0x107e   :  { %v5363_v44 = vmul.f32 %v6852_v1, %v5033_v27  ;;  %v5369_v50 = vadd.f32 %v5361_v24, %v5353_v34  ;;  %5375 = vst [vmem:[#allocation12 + $0x1f] sm:$0x1] %v5367_v21 }
0x107f   :  { %v5370_v13 = vadd.f32 %v5362_v8, %v5354_v43  ;;  %5376 = vst [vmem:[#allocation12 + $0x27] sm:$0x1] %v5368_v12 }
0x1080   :  { %v5371_v36 = vadd.f32 %v5363_v44, %v5355_v55  ;;  %5377 = vst [vmem:[#allocation12 + $0x2f] sm:$0x1] %v5369_v50 }
0x1081   :  { %5378 = vst [vmem:[#allocation12 + $0x37] sm:$0x1] %v5370_v13 }
0x1082   :  { %5379 = vst [vmem:[#allocation12 + $0x3f] sm:$0x1] %v5371_v36 }
0x1083   :  { %6952 = shalt.err (!%p6949_p8)
}
0x1084   :  { %s6953_s25 = scalar_lea.hbm %s8633_s5, 1024 }
0x1085   :  { %p6954_p9 = scmp.ne.s32.totalorder %s8633_s5, %s6953_s25  ;;  %p6957_p10 = scmp.lt.u32.totalorder %s6953_s25, %s8633_s5 }
0x1087   :  { %p6959_p11 = pnand %p6957_p10, %p6954_p9 }
0x1089   :  { %6962 = shalt.err (!%p6959_p11)
}
0x108a   :  { %5450 = dma.vmem_to_hbm [thread:$0]  %s5445_s21, 1024, %s8633_s5, [#allocation6], %s6975_s1, %s6975_s1, %s6976_s17  }
0x108b   :  { %6969 = dma.done.wait [#allocation6], 1024  }
0x108c   :  { %6970 = vsyncadd [#allocation6], 4294966272 }
0x108d   :  { %5454 = vsyncpa [#allocation5], 1 }
0x108e   :  { %5455 = vsyncpa [#allocation8], 1 }
0x108f   :  { %5456 = vsyncpa [#allocation11], 1 }
0x1090   :  { %5457 = vsyncpa [#allocation6], 1 }

</bundles_post_ra>
